<compile_context>
chip_gen: v5e
topology: v5e:2x2
jax: 0.10.0
libtpu: 0.0.40
codegen_flags: <defaults>
</compile_context>

<pallas_src>
import functools

import jax
import jax.numpy as jnp
import numpy as np
from jax.experimental import pallas as pl
from jax.experimental.pallas import tpu as pltpu

_NEG = -1e30  # marker for "no detection" slots in the fixed-shape score tensor


# ----------------------------------------------------------------------------
# Pallas kernel: pairwise IoU matrix
# ----------------------------------------------------------------------------
def _iou_kernel(bi_ref, bj_ref, iou_ref):
    """Computes one (TILE_I, TILE_J) tile of the IoU matrix.

    bi_ref : (TILE_I, 4)  boxes, row-major      [x1, y1, x2, y2]
    bj_ref : (4, TILE_J)  boxes, channel-major (lane-dense along boxes)
    iou_ref: (TILE_I, TILE_J) output tile

    All arithmetic stays 2-D via (TILE_I,1) x (1,TILE_J) broadcasts: pure VPU
    work, no jnp.stack / sublane relayouts.
    """
    bi = bi_ref[...]
    bj = bj_ref[...]
    x1i, y1i, x2i, y2i = bi[:, 0:1], bi[:, 1:2], bi[:, 2:3], bi[:, 3:4]
    x1j, y1j, x2j, y2j = bj[0:1, :], bj[1:2, :], bj[2:3, :], bj[3:4, :]

    iw = jnp.maximum(jnp.minimum(x2i, x2j) - jnp.maximum(x1i, x1j), 0.0)
    ih = jnp.maximum(jnp.minimum(y2i, y2j) - jnp.maximum(y1i, y1j), 0.0)
    inter = iw * ih                                    # (TILE_I, TILE_J)
    area_i = (x2i - x1i) * (y2i - y1i)                 # (TILE_I, 1)
    area_j = (x2j - x1j) * (y2j - y1j)                 # (1, TILE_J)
    union = jnp.maximum(area_i + area_j - inter, 1e-8)
    iou_ref[...] = inter / union


def _round_up(x, m):
    return (x + m - 1) // m * m


def pairwise_iou(boxes):
    """boxes: (N, 4) -> (N_pad, N_pad) float32 IoU matrix.

    Padded rows/columns correspond to zero-area boxes (IoU == 0); callers mask
    them via the score validity mask, so the N^2-sized output needs no extra
    unpad / transpose HBM pass.
    """
    n = boxes.shape[0]
    n_pad = _round_up(max(n, 1), 256)
    if n_pad > 2048:
        tile_j = 2048                       # large lane tile (~2 MiB f32 out block)
        n_pad = _round_up(n_pad, tile_j)
    else:
        tile_j = n_pad                      # whole padded row range in one block
    tile_i = 256                            # sublane tile (multiple of 8)

    boxes_f = boxes.astype(jnp.float32)
    boxes_p = jnp.pad(boxes_f, ((0, n_pad - n), (0, 0)))   # (N_pad, 4)  tiny
    boxes_t = boxes_p.T                                     # (4, N_pad)  tiny

    grid = (n_pad // tile_i, n_pad // tile_j)
    return pl.pallas_call(
        _iou_kernel,
        out_shape=jax.ShapeDtypeStruct((n_pad, n_pad), jnp.float32),
        grid=grid,
        in_specs=[
            pl.BlockSpec((tile_i, 4), lambda i, j: (i, 0)),
            pl.BlockSpec((4, tile_j), lambda i, j: (0, j)),
        ],
        out_specs=pl.BlockSpec((tile_i, tile_j), lambda i, j: (i, j)),
        compiler_params=pltpu.CompilerParams(
            dimension_semantics=("parallel", "parallel"),
        ),
    )(boxes_p, boxes_t)


# ----------------------------------------------------------------------------
# Fixed-shape greedy NMS over the Pallas IoU matrix
# ----------------------------------------------------------------------------
def _greedy_nms_single(iou, scores, valid, *, nms_threshold):
    # TODO(synk): greedy NMS carries a sequential dependence on the running
    # "suppressed" set, so it stays as a lax.fori_loop over rows of the
    # Pallas-computed IoU matrix rather than being forced into a kernel.
    n_pad = scores.shape[0]
    order = jnp.argsort(jnp.where(valid, scores, -jnp.inf))[::-1]  # desc score

    def body(k, carry):
        keep, suppressed = carry
        i = order[k]
        take = jnp.logical_and(valid[i], jnp.logical_not(suppressed[i]))
        keep = keep.at[i].set(take)
        suppressed = jnp.logical_or(
            suppressed, jnp.logical_and(take, iou[i] > nms_threshold))
        return keep, suppressed

    keep0 = jnp.zeros((n_pad,), jnp.bool_)
    sup0 = jnp.zeros((n_pad,), jnp.bool_)
    keep, _ = jax.lax.fori_loop(0, n_pad, body, (keep0, sup0))
    return keep


# ----------------------------------------------------------------------------
# Full FilterDetections forward (fixed output shape = max_detections)
# ----------------------------------------------------------------------------
@functools.partial(jax.jit, static_argnums=(4, 5, 6, 7, 8))
def _filter_detections_impl(boxes, classification, rotation, translation,
                            class_specific_filter, nms, score_threshold,
                            max_detections, nms_threshold):
    n, num_classes = classification.shape
    boxes = boxes.astype(jnp.float32)
    classification = classification.astype(jnp.float32)
    rotation = rotation.astype(jnp.float32)
    translation = translation.astype(jnp.float32)

    # Dense O(N^2) part in Pallas.
    iou = pairwise_iou(boxes)                       # (N_pad, N_pad)
    n_pad = iou.shape[0]

    if class_specific_filter:
        scores_cn = jnp.full((num_classes, n_pad), _NEG, jnp.float32)
        scores_cn = scores_cn.at[:, :n].set(classification.T)
        labels_all = None
    else:
        labels_all = jnp.argmax(classification, axis=1).astype(jnp.int32)
        smax = jnp.max(classification, axis=1)
        scores_cn = jnp.full((1, n_pad), _NEG, jnp.float32)
        scores_cn = scores_cn.at[:, :n].set(smax[None, :])

    valid = scores_cn > score_threshold             # (C_eff, N_pad)

    if nms:
        nms_fn = functools.partial(_greedy_nms_single, nms_threshold=nms_threshold)
        keep = jax.vmap(nms_fn, in_axes=(None, 0, 0))(iou, scores_cn, valid)
    else:
        keep = valid

    # TODO(synk): top-k selection and row gathers stay in XLA (lax.top_k,
    # take); a Pallas row-gather via pl.Element + scalar prefetch would be
    # `max_detections` tiny grid steps and slower than the fused XLA gather.
    masked = jnp.where(keep, scores_cn, _NEG).reshape(-1)
    if masked.shape[0] < max_detections:
        masked = jnp.concatenate(
            [masked,
             jnp.full((max_detections - masked.shape[0],), _NEG, jnp.float32)])
    topk_scores, topk_idx = jax.lax.top_k(masked, max_detections)
    box_idx = jnp.minimum(topk_idx % n_pad, n - 1)
    cls_idx = (topk_idx // n_pad).astype(jnp.int32)
    is_det = topk_scores > score_threshold

    if class_specific_filter:
        labels = jnp.where(is_det, cls_idx, -1)
    else:
        labels = jnp.where(is_det, labels_all[box_idx], -1)

    scores_out = jnp.where(is_det, topk_scores, -1.0)
    boxes_out = jnp.where(is_det[:, None], boxes[box_idx], -1.0)
    rotation_out = jnp.where(is_det[:, None], rotation[box_idx], -1.0)
    translation_out = jnp.where(is_det[:, None], translation[box_idx], -1.0)
    # Detections are emitted in globally descending score order (the PyTorch
    # code's order when num_dets > max_detections); unused slots are -1,
    # matching the reference padding.  Labels are int32 (torch uses int64).
    return boxes_out, scores_out, labels, rotation_out, translation_out


def filter_detections(boxes, classification, rotation, translation,
                      num_rotation_parameters=None, num_translation_parameters=3,
                      class_specific_filter=True, nms=True, score_threshold=0.01,
                      max_detections=100, nms_threshold=0.5):
    del num_rotation_parameters, num_translation_parameters  # from input shapes
    return _filter_detections_impl(
        boxes, classification, rotation, translation,
        bool(class_specific_filter), bool(nms), float(score_threshold),
        int(max_detections), float(nms_threshold))


class FilterDetections:
    """JAX/Pallas analogue of the PyTorch FilterDetections module."""

    def __init__(self, num_rotation_parameters, num_translation_parameters=3,
                 nms=True, class_specific_filter=True, nms_threshold=0.5,
                 score_threshold=0.01, max_detections=100):
        self.num_rotation_parameters = num_rotation_parameters
        self.num_translation_parameters = num_translation_parameters
        self.nms = nms
        self.class_specific_filter = class_specific_filter
        self.nms_threshold = nms_threshold
        self.score_threshold = score_threshold
        self.max_detections = max_detections

    def __call__(self, boxes, classification, rotation, translation):
        return filter_detections(
            boxes, classification, rotation, translation,
            self.num_rotation_parameters, self.num_translation_parameters,
            self.class_specific_filter, self.nms, self.score_threshold,
            self.max_detections, self.nms_threshold)


# ----------------------------------------------------------------------------
# NumPy reference that mimics the PyTorch code (greedy torchvision-style NMS)
# ----------------------------------------------------------------------------
def _iou_np(box, boxes):
    xx1 = np.maximum(box[0], boxes[:, 0])
    yy1 = np.maximum(box[1], boxes[:, 1])
    xx2 = np.minimum(box[2], boxes[:, 2])
    yy2 = np.minimum(box[3], boxes[:, 3])
    inter = np.maximum(xx2 - xx1, 0.0) * np.maximum(yy2 - yy1, 0.0)
    a1 = (box[2] - box[0]) * (box[3] - box[1])
    a2 = (boxes[:, 2] - boxes[:, 0]) * (boxes[:, 3] - boxes[:, 1])
    return inter / np.maximum(a1 + a2 - inter, 1e-8)


def _nms_np(boxes, scores, thr):
    order = np.argsort(-scores, kind="stable")
    suppressed = np.zeros(scores.shape[0], bool)
    keep = []
    for i in order:
        if suppressed[i]:
            continue
        keep.append(int(i))
        suppressed |= _iou_np(boxes[i], boxes) > thr
    return np.asarray(keep, np.int64)


def _reference_filter(boxes, classification, rotation, translation, *,
                      class_specific_filter, nms, score_threshold,
                      max_detections, nms_threshold):
    boxes = np.asarray(boxes); classification = np.asarray(classification)
    rotation = np.asarray(rotation); translation = np.asarray(translation)
    num_boxes, num_classes = classification.shape
    dets = []  # (score, label, box_index)
    if class_specific_filter:
        for c in range(num_classes):
            s = classification[:, c]
            idx = np.nonzero(s > score_threshold)[0]
            if idx.size == 0:
                continue
            if nms:
                idx = idx[_nms_np(boxes[idx], s[idx], nms_threshold)]
            dets.extend((float(s[i]), c, int(i)) for i in idx)
    else:
        lab = np.argmax(classification, axis=1)
        s = classification[np.arange(num_boxes), lab]
        idx = np.nonzero(s > score_threshold)[0]
        if idx.size and nms:
            idx = idx[_nms_np(boxes[idx], s[idx], nms_threshold)]
        dets.extend((float(s[i]), int(lab[i]), int(i)) for i in idx)

    dets.sort(key=lambda t: -t[0])          # same ordering convention as kernel
    dets = dets[:max_detections]
    r_dim, t_dim = rotation.shape[1], translation.shape[1]
    b_out = -np.ones((max_detections, 4), np.float32)
    s_out = -np.ones((max_detections,), np.float32)
    l_out = -np.ones((max_detections,), np.int64)
    r_out = -np.ones((max_detections, r_dim), np.float32)
    t_out = -np.ones((max_detections, t_dim), np.float32)
    for k, (sc, c, bi) in enumerate(dets):
        b_out[k] = boxes[bi]; s_out[k] = sc; l_out[k] = c
        r_out[k] = rotation[bi]; t_out[k] = translation[bi]
    return b_out, s_out, l_out, r_out, t_out


if __name__ == "__main__":
    key = jax.random.PRNGKey(0)
    kb, kw, kc, kr, kt = jax.random.split(key, 5)

    N, C, R, T = 64, 4, 3, 3
    xy = jax.random.uniform(kb, (N, 2), jnp.float32) * 96.0
    wh = jax.random.uniform(kw, (N, 2), jnp.float32) * 48.0 + 4.0
    boxes = jnp.concatenate([xy, xy + wh], axis=-1)            # (N, 4)
    classification = jax.random.uniform(kc, (N, C), jnp.float32)
    rotation = jax.random.normal(kr, (N, R), jnp.float32)
    translation = jax.random.normal(kt, (N, T), jnp.float32)

    module = FilterDetections(num_rotation_parameters=R,
                              num_translation_parameters=T)

    configs = [
        dict(class_specific_filter=True, nms=True, score_threshold=0.01,
             max_detections=100, nms_threshold=0.5),
        dict(class_specific_filter=True, nms=True, score_threshold=0.5,
             max_detections=100, nms_threshold=0.5),
        dict(class_specific_filter=False, nms=True, score_threshold=0.05,
             max_detections=32, nms_threshold=0.5),
    ]

    for ci, cfg in enumerate(configs):
        if ci == 0:
            out = module(boxes, classification, rotation, translation)
        else:
            out = filter_detections(boxes, classification, rotation, translation,
                                    num_rotation_parameters=R, **cfg)
        out = jax.block_until_ready(out)
        ref = _reference_filter(boxes, classification, rotation, translation, **cfg)
        names = ("boxes", "scores", "labels", "rotation", "translation")
        for nm, a, b in zip(names, out, ref):
            a = np.asarray(a)
            if nm == "labels":
                assert np.array_equal(a.astype(np.int64), b.astype(np.int64)), nm
            else:
                assert np.allclose(a, b, atol=1e-5, rtol=1e-5), (nm, cfg)

    print("KERNEL_OK")
</pallas_src>

<mosaic_0001>
module attributes {stable_mosaic.version = 11 : i64} {
  func.func @_iou_kernel(%arg0: i32, %arg1: i32, %arg2: memref<256x4xf32, #tpu.memory_space<vmem>>, %arg3: memref<4x256xf32, #tpu.memory_space<vmem>>, %arg4: memref<256x256xf32, #tpu.memory_space<vmem>>) attributes {dimension_semantics = [#tpu.dimension_semantics<parallel>, #tpu.dimension_semantics<parallel>], iteration_bounds = array<i64: 1, 1>, scalar_prefetch = 0 : i64, scratch_operands = 0 : i64, tpu.core_type = #tpu.core_type<tc>, window_params = [{transform_indices = @transform_0, window_bounds = array<i64: 256, 4>}, {transform_indices = @transform_1, window_bounds = array<i64: 4, 256>}, {transform_indices = @transform_2, window_bounds = array<i64: 256, 256>}]} {
    %c0 = arith.constant 0 : index
    %c0_0 = arith.constant 0 : index
    %0 = vector.load %arg2[%c0, %c0_0] : memref<256x4xf32, #tpu.memory_space<vmem>>, vector<256x4xf32>
    %c0_1 = arith.constant 0 : index
    %c0_2 = arith.constant 0 : index
    %1 = vector.load %arg3[%c0_1, %c0_2] : memref<4x256xf32, #tpu.memory_space<vmem>>, vector<4x256xf32>
    %2 = vector.extract_strided_slice %0 {offsets = [0, 0], sizes = [256, 1], strides = [1, 1]} : vector<256x4xf32> to vector<256x1xf32>
    %3 = vector.extract_strided_slice %0 {offsets = [0, 1], sizes = [256, 1], strides = [1, 1]} : vector<256x4xf32> to vector<256x1xf32>
    %4 = vector.extract_strided_slice %0 {offsets = [0, 2], sizes = [256, 1], strides = [1, 1]} : vector<256x4xf32> to vector<256x1xf32>
    %5 = vector.extract_strided_slice %0 {offsets = [0, 3], sizes = [256, 1], strides = [1, 1]} : vector<256x4xf32> to vector<256x1xf32>
    %6 = vector.extract_strided_slice %1 {offsets = [0, 0], sizes = [1, 256], strides = [1, 1]} : vector<4x256xf32> to vector<1x256xf32>
    %7 = vector.extract_strided_slice %1 {offsets = [1, 0], sizes = [1, 256], strides = [1, 1]} : vector<4x256xf32> to vector<1x256xf32>
    %8 = vector.extract_strided_slice %1 {offsets = [2, 0], sizes = [1, 256], strides = [1, 1]} : vector<4x256xf32> to vector<1x256xf32>
    %9 = vector.extract_strided_slice %1 {offsets = [3, 0], sizes = [1, 256], strides = [1, 1]} : vector<4x256xf32> to vector<1x256xf32>
    %10 = vector.broadcast %4 : vector<256x1xf32> to vector<256x256xf32>
    %11 = vector.broadcast %8 : vector<1x256xf32> to vector<256x256xf32>
    %12 = arith.minimumf %10, %11 : vector<256x256xf32>
    %13 = vector.broadcast %2 : vector<256x1xf32> to vector<256x256xf32>
    %14 = vector.broadcast %6 : vector<1x256xf32> to vector<256x256xf32>
    %15 = arith.maximumf %13, %14 : vector<256x256xf32>
    %16 = arith.subf %12, %15 : vector<256x256xf32>
    %cst = arith.constant 0.000000e+00 : f32
    %17 = vector.broadcast %cst : f32 to vector<256x256xf32>
    %18 = arith.maximumf %16, %17 : vector<256x256xf32>
    %19 = vector.broadcast %5 : vector<256x1xf32> to vector<256x256xf32>
    %20 = vector.broadcast %9 : vector<1x256xf32> to vector<256x256xf32>
    %21 = arith.minimumf %19, %20 : vector<256x256xf32>
    %22 = vector.broadcast %3 : vector<256x1xf32> to vector<256x256xf32>
    %23 = vector.broadcast %7 : vector<1x256xf32> to vector<256x256xf32>
    %24 = arith.maximumf %22, %23 : vector<256x256xf32>
    %25 = arith.subf %21, %24 : vector<256x256xf32>
    %cst_3 = arith.constant 0.000000e+00 : f32
    %26 = vector.broadcast %cst_3 : f32 to vector<256x256xf32>
    %27 = arith.maximumf %25, %26 : vector<256x256xf32>
    %28 = arith.mulf %18, %27 : vector<256x256xf32>
    %29 = arith.subf %4, %2 : vector<256x1xf32>
    %30 = arith.subf %5, %3 : vector<256x1xf32>
    %31 = arith.mulf %29, %30 : vector<256x1xf32>
    %32 = arith.subf %8, %6 : vector<1x256xf32>
    %33 = arith.subf %9, %7 : vector<1x256xf32>
    %34 = arith.mulf %32, %33 : vector<1x256xf32>
    %35 = vector.broadcast %31 : vector<256x1xf32> to vector<256x256xf32>
    %36 = vector.broadcast %34 : vector<1x256xf32> to vector<256x256xf32>
    %37 = arith.addf %35, %36 : vector<256x256xf32>
    %38 = arith.subf %37, %28 : vector<256x256xf32>
    %cst_4 = arith.constant 9.99999993E-9 : f32
    %39 = vector.broadcast %cst_4 : f32 to vector<256x256xf32>
    %40 = arith.maximumf %38, %39 : vector<256x256xf32>
    %41 = arith.divf %28, %40 : vector<256x256xf32>
    %c0_5 = arith.constant 0 : index
    %c0_6 = arith.constant 0 : index
    %42 = vector.load %arg4[%c0_5, %c0_6] : memref<256x256xf32, #tpu.memory_space<vmem>>, vector<256x256xf32>
    tpu.vector_store %arg4[%c0_5, %c0_6], %41 {strides = array<i32>} : memref<256x256xf32, #tpu.memory_space<vmem>>, vector<256x256xf32>,
    return
  }
  func.func @transform_0(%arg0: i32, %arg1: i32) -> (i32, i32) {
    %c0_i32 = arith.constant 0 : i32
    %c0_i32_0 = arith.constant 0 : i32
    return %arg0, %c0_i32 : i32, i32
  }
  func.func @transform_1(%arg0: i32, %arg1: i32) -> (i32, i32) {
    %c0_i32 = arith.constant 0 : i32
    %c0_i32_0 = arith.constant 0 : i32
    return %c0_i32, %arg1 : i32, i32
  }
  func.func @transform_2(%arg0: i32, %arg1: i32) -> (i32, i32) {
    %c0_i32 = arith.constant 0 : i32
    return %arg0, %arg1 : i32, i32
  }
}

</mosaic_0001>

<bundles_post_ra>
// kernel: custom-call.8
= control target key start
LH: loop header
LB: loop body
LE: loop exit
PB: predicated region body
PF: predicated region fallthrough
CT: control target
= control target key end

     0   :  { %s6_s0 = inlined_call_operand.vmem [shape: pred[4,256], index: 0, kind: output, shape index: {}]  }

// kernel: _filter_detections_impl.1
= control target key start
LH: loop header
LB: loop body
LE: loop exit
PB: predicated region body
PF: predicated region fallthrough
CT: control target
= control target key end

     0   :  { %v3047_v0 = vmov 0   ;;  %v6367_v1 = vmov 2   ;;  %v3049_v34 = vmov 3   ;;  %v6365_v56 = vmov 1   ;;  %s3051_s17 = smov 2   ;;  %s3052_s20 = smov 127   ;;  %s6362_s0 = inlined_call_operand.vmem [shape: f32[256,4], index: 0, kind: input, shape index: {}]   ;;  %s6363_s1 = inlined_call_operand.vmem [shape: f32[4,256], index: 1, kind: input, shape index: {}]   ;;  %s6364_s2 = inlined_call_operand.vmem [shape: f32[256,256], index: 2, kind: output, shape index: {}]  }
   0x1   :  { %2882 = vset.pattern.permute.xlu0 %v3047_v0  ;;  %2880 = vset.pattern.permute.xlu2 %v6367_v1  ;;  %v3073_v2 = vld [vmem:[%s6362_s0 + $0x20] sm:$0xff]  ;;  %v3078_v3 = vld [vmem:[%s6362_s0 + $0x10] sm:$0xff]  ;;  %v3083_v4 = vld [vmem:[%s6362_s0 + $0x8] sm:$0xff] }
   0x2   :  { %6552 = vst [vmem:[#allocation2_spill] sm:$0xff] %v3073_v2  ;;  %2879 = vset.pattern.permute.xlu1 %v6367_v1  ;;  %66 = vperm.xlu2 %2880, %v3073_v2   ;;  %v3092_v5 = vld [vmem:[%s6362_s0 + $0x28] sm:$0xff]  ;;  %v3097_v6 = vld [vmem:[%s6362_s0 + $0x18] sm:$0xff]  ;;  %v3102_v7 = vld [vmem:[%s6362_s0 + $0x30] sm:$0xff] }
   0x3   :  { %6553 = vst [vmem:[#allocation3_spill] sm:$0xff] %v3083_v4  ;;  %56 = vperm.xlu1 %2879, %v3078_v3   ;;  %280 = vperm.xlu0 %2882, %v3083_v4   ;;  %v3110_v8 = vld [vmem:[%s6362_s0 + $0x40] sm:$0xff]  ;;  %v3115_v9 = vld [vmem:[%s6362_s0 + $0x38] sm:$0xff]  ;;  %v3120_v10 = vld [vmem:[%s6362_s0 + $0x48] sm:$0xff] }
   0x4   :  { %6554 = vst [vmem:[#allocation4_spill] sm:$0xff] %v3097_v6  ;;  %v3128_v11 = vld [vmem:[%s6362_s0 + $0x58] sm:$0xff]  ;;  %v3133_v12 = vld [vmem:[%s6362_s0 + $0x50] sm:$0xff]  ;;  %v3138_v13 = vld [vmem:[%s6362_s0 + $0x60] sm:$0xff] }
   0x5   :  { %6555 = vst [vmem:[#allocation5_spill] sm:$0xff] %v3115_v9  ;;  %v3146_v14 = vld [vmem:[%s6362_s0 + $0x70] sm:$0xff]  ;;  %v3151_v15 = vld [vmem:[%s6362_s0 + $0x68] sm:$0xff]  ;;  %v3156_v16 = vld [vmem:[%s6362_s0 + $0x78] sm:$0xff] }
   0x6   :  { %v3164_v17 = vld [vmem:[%s6362_s0 + $0x88] sm:$0xff]  ;;  %v3169_v18 = vld [vmem:[%s6362_s0 + $0x80] sm:$0xff]  ;;  %v3174_v19 = vld [vmem:[%s6362_s0 + $0x90] sm:$0xff] }
   0x7   :  { %v3182_v20 = vld [vmem:[%s6362_s0 + $0xa0] sm:$0xff]  ;;  %v3187_v21 = vld [vmem:[%s6362_s0 + $0x98] sm:$0xff]  ;;  %v3192_v22 = vld [vmem:[%s6362_s0 + $0xa8] sm:$0xff] }
   0x8   :  { %v3200_v23 = vld [vmem:[%s6362_s0 + $0xb8] sm:$0xff]  ;;  %v3205_v24 = vld [vmem:[%s6362_s0 + $0xb0] sm:$0xff]  ;;  %v3210_v25 = vld [vmem:[%s6362_s0 + $0xc0] sm:$0xff] }
   0x9   :  { %v3218_v26 = vld [vmem:[%s6362_s0 + $0xd0] sm:$0xff]  ;;  %v3223_v27 = vld [vmem:[%s6362_s0 + $0xc8] sm:$0xff]  ;;  %v3228_v28 = vld [vmem:[%s6362_s0 + $0xd8] sm:$0xff] }
   0xa   :  { %71 = vperm.xlu2 %2880, %v3092_v5   ;;  %v3236_v29 = vld [vmem:[%s6362_s0 + $0xe8] sm:$0xff]  ;;  %v3241_v30 = vld [vmem:[%s6362_s0 + $0xe0] sm:$0xff]  ;;  %v3246_v31 = vld [vmem:[%s6362_s0 + $0xf0] sm:$0xff] }
   0xb   :  { %61 = vperm.xlu1 %2879, %v3097_v6   ;;  %300 = vperm.xlu0 %2882, %v3102_v7   ;;  %6556 = vst [vmem:[#allocation6_spill] sm:$0xff] %v3246_v31  ;;  %v3254_v32 = vld [vmem:[%s6362_s0 + $0xf8] sm:$0xff]  ;;  %v3259_v33 = vld [vmem:[%s6362_s0] sm:$0xff] }
   0xc   :  { %6557 = vst [vmem:[#allocation7_spill] sm:$0xff] %v3259_v33 }
  0x12   :  { %86 = vperm.xlu2 %2880, %v3110_v8  }
  0x13   :  { %81 = vperm.xlu1 %2879, %v3115_v9   ;;  %312 = vperm.xlu0 %2882, %v3120_v10  }
  0x1a   :  { %101 = vperm.xlu2 %2880, %v3128_v11  }
  0x1b   :  { %96 = vperm.xlu1 %2879, %v3133_v12   ;;  %324 = vperm.xlu0 %2882, %v3138_v13  }
  0x22   :  { %116 = vperm.xlu2 %2880, %v3146_v14  }
  0x23   :  { %111 = vperm.xlu1 %2879, %v3151_v15   ;;  %336 = vperm.xlu0 %2882, %v3156_v16  }
  0x2a   :  { %131 = vperm.xlu2 %2880, %v3164_v17  }
  0x2b   :  { %126 = vperm.xlu1 %2879, %v3169_v18   ;;  %348 = vperm.xlu0 %2882, %v3174_v19  }
  0x32   :  { %146 = vperm.xlu2 %2880, %v3182_v20  }
  0x33   :  { %141 = vperm.xlu1 %2879, %v3187_v21   ;;  %360 = vperm.xlu0 %2882, %v3192_v22  }
  0x3a   :  { %161 = vperm.xlu2 %2880, %v3200_v23  }
  0x3b   :  { %156 = vperm.xlu1 %2879, %v3205_v24   ;;  %372 = vperm.xlu0 %2882, %v3210_v25  }
  0x42   :  { %176 = vperm.xlu2 %2880, %v3218_v26  }
  0x43   :  { %171 = vperm.xlu1 %2879, %v3223_v27   ;;  %384 = vperm.xlu0 %2882, %v3228_v28  }
  0x4a   :  { %191 = vperm.xlu2 %2880, %v3236_v29  }
  0x4b   :  { %186 = vperm.xlu1 %2879, %v3241_v30   ;;  %396 = vperm.xlu0 %2882, %v3246_v31  }
  0x52   :  { %2881 = vset.pattern.permute.xlu2 %v3047_v0 }
  0x53   :  { %201 = vperm.xlu1 %2879, %v3254_v32   ;;  %2885 = vset.pattern.permute.xlu0 %v3049_v34 }
  0x54   :  { %606 = vperm.xlu0 %2885, %v3083_v4   ;;  %276 = vperm.xlu2 %2881, %v3259_v33  }
  0x5b   :  { %2883 = vset.pattern.permute.xlu1 %v3047_v0 }
  0x5c   :  { %284 = vperm.xlu1 %2883, %v3078_v3   ;;  %626 = vperm.xlu0 %2885, %v3102_v7   ;;  %v3269_v35 = vpop.permute.xlu2 %66 }
  0x5d   :  { %6558 = vst [vmem:[#allocation8_spill] sm:$0xff] %v3269_v35  ;;  %288 = vperm.xlu2 %2881, %v3097_v6  }
  0x64   :  { %292 = vperm.xlu1 %2883, %v3073_v2   ;;  %638 = vperm.xlu0 %2885, %v3120_v10   ;;  %v3274_v36 = vpop.permute.xlu2 %71 }
  0x65   :  { %6559 = vst [vmem:[#allocation9_spill] sm:$0xff] %v3274_v36  ;;  %296 = vperm.xlu2 %2881, %v3092_v5   ;;  %v43_v36 = vld [vmem:[%s6363_s1] sm:$0xff] }
  0x66   :  { %v927_v35 = vperm.slane %v43_v36, 1 }
  0x6c   :  { %304 = vperm.xlu1 %2883, %v3115_v9   ;;  %650 = vperm.xlu0 %2885, %v3138_v13   ;;  %v3279_v37 = vpop.permute.xlu2 %86 }
  0x6d   :  { %6560 = vst [vmem:[#allocation10_spill] sm:$0xff] %v3279_v37  ;;  %308 = vperm.xlu2 %2881, %v3110_v8  }
  0x74   :  { %316 = vperm.xlu1 %2883, %v3133_v12   ;;  %662 = vperm.xlu0 %2885, %v3156_v16   ;;  %v3284_v38 = vpop.permute.xlu2 %101 }
  0x75   :  { %6561 = vst [vmem:[#allocation11_spill] sm:$0xff] %v3284_v38  ;;  %320 = vperm.xlu2 %2881, %v3128_v11   ;;  %v3287_v39 = vpop.permute.xlu1 %56  ;;  %v3289_v40 = vpop.permute.xlu0 %280 }
  0x76   :  { %6562 = vst [vmem:[#allocation12_spill] sm:$0xff] %v3287_v39 }
  0x77   :  { %6563 = vst [vmem:[#allocation13_spill] sm:$0xff] %v3289_v40 }
  0x7c   :  { %328 = vperm.xlu1 %2883, %v3151_v15   ;;  %674 = vperm.xlu0 %2885, %v3174_v19   ;;  %v3293_v41 = vpop.permute.xlu2 %116 }
  0x7d   :  { %6564 = vst [vmem:[#allocation14_spill] sm:$0xff] %v3293_v41  ;;  %332 = vperm.xlu2 %2881, %v3146_v14   ;;  %v3296_v42 = vpop.permute.xlu1 %61  ;;  %v3298_v43 = vpop.permute.xlu0 %300 }
  0x7e   :  { %6565 = vst [vmem:[#allocation15_spill] sm:$0xff] %v3296_v42 }
  0x7f   :  { %6566 = vst [vmem:[#allocation16_spill] sm:$0xff] %v3298_v43 }
  0x84   :  { %340 = vperm.xlu1 %2883, %v3169_v18   ;;  %686 = vperm.xlu0 %2885, %v3192_v22   ;;  %v3302_v44 = vpop.permute.xlu2 %131 }
  0x85   :  { %6567 = vst [vmem:[#allocation17_spill] sm:$0xff] %v3302_v44  ;;  %344 = vperm.xlu2 %2881, %v3164_v17   ;;  %v3305_v45 = vpop.permute.xlu1 %81  ;;  %v3307_v46 = vpop.permute.xlu0 %312 }
  0x86   :  { %6568 = vst [vmem:[#allocation18_spill] sm:$0xff] %v3305_v45 }
  0x87   :  { %6569 = vst [vmem:[#allocation19_spill] sm:$0xff] %v3307_v46 }
  0x8c   :  { %352 = vperm.xlu1 %2883, %v3187_v21   ;;  %698 = vperm.xlu0 %2885, %v3210_v25   ;;  %v3311_v47 = vpop.permute.xlu2 %146 }
  0x8d   :  { %6570 = vst [vmem:[#allocation20_spill] sm:$0xff] %v3311_v47  ;;  %356 = vperm.xlu2 %2881, %v3182_v20   ;;  %v3314_v48 = vpop.permute.xlu1 %96  ;;  %v3316_v49 = vpop.permute.xlu0 %324 }
  0x8e   :  { %6571 = vst [vmem:[#allocation21_spill] sm:$0xff] %v3314_v48 }
  0x94   :  { %364 = vperm.xlu1 %2883, %v3205_v24   ;;  %710 = vperm.xlu0 %2885, %v3228_v28   ;;  %v3320_v50 = vpop.permute.xlu2 %161 }
  0x95   :  { %6572 = vst [vmem:[#allocation22_spill] sm:$0xff] %v3320_v50  ;;  %368 = vperm.xlu2 %2881, %v3200_v23   ;;  %v3323_v51 = vpop.permute.xlu1 %111  ;;  %v3325_v52 = vpop.permute.xlu0 %336 }
  0x96   :  { %6573 = vst [vmem:[#allocation23_spill] sm:$0xff] %v3323_v51 }
  0x9c   :  { %376 = vperm.xlu1 %2883, %v3223_v27   ;;  %722 = vperm.xlu0 %2885, %v3246_v31   ;;  %v3329_v53 = vpop.permute.xlu2 %176 }
  0x9d   :  { %6574 = vst [vmem:[#allocation24_spill] sm:$0xff] %v3329_v53  ;;  %380 = vperm.xlu2 %2881, %v3218_v26   ;;  %v3332_v54 = vpop.permute.xlu1 %126  ;;  %v3334_v55 = vpop.permute.xlu0 %348 }
  0x9e   :  { %6575 = vst [vmem:[#allocation25_spill] sm:$0xff] %v3332_v54 }
  0xa4   :  { %388 = vperm.xlu1 %2883, %v3241_v30   ;;  %2888 = vset.pattern.permute.xlu0 %v6365_v56  ;;  %v3338_v57 = vpop.permute.xlu2 %191 }
  0xa5   :  { %6576 = vst [vmem:[#allocation26_spill] sm:$0xff] %v3338_v57  ;;  %392 = vperm.xlu2 %2881, %v3236_v29   ;;  %v3341_v58 = vpop.permute.xlu1 %141  ;;  %804 = vperm.xlu0 %2888, %v3083_v4   ;;  %v3344_v59 = vpop.permute.xlu0 %360 }
  0xa6   :  { %6577 = vst [vmem:[#allocation27_spill] sm:$0xff] %v3341_v58 }
  0xa7   :  { %6578 = vst [vmem:[#allocation28_spill] sm:$0xff] %v3344_v59 }
  0xac   :  { %400 = vperm.xlu1 %2883, %v3254_v32  }
  0xad   :  { %2884 = vset.pattern.permute.xlu2 %v3049_v34  ;;  %v3348_v60 = vpop.permute.xlu1 %156  ;;  %824 = vperm.xlu0 %2888, %v3102_v7   ;;  %v3351_v61 = vpop.permute.xlu0 %372 }
  0xae   :  { %6579 = vst [vmem:[#allocation29_spill] sm:$0xff] %v3348_v60  ;;  %602 = vperm.xlu2 %2884, %v3259_v33   ;;  %v3354_v62 = vpop.permute.xlu2 %276 }
  0xaf   :  { %6580 = vst [vmem:[#allocation30_spill] sm:$0xff] %v3351_v61  ;;  %v404_v61 = vperm.slane %v43_v36, 4 }
  0xb4   :  { %2886 = vset.pattern.permute.xlu1 %v3049_v34 }
  0xb5   :  { %610 = vperm.xlu1 %2886, %v3078_v3   ;;  %v3358_v63 = vpop.permute.xlu1 %171  ;;  %836 = vperm.xlu0 %2888, %v3120_v10   ;;  %v3361_v0 = vpop.permute.xlu0 %384 }
  0xb6   :  { %6581 = vst [vmem:[#allocation31_spill] sm:$0xff] %v3358_v63  ;;  %614 = vperm.xlu2 %2884, %v3097_v6  }
  0xb7   :  { %6582 = vst [vmem:[#allocation32_spill] sm:$0xff] %v3361_v0  ;;  %v3364_v56 = vpop.permute.xlu2 %288  ;;  %v730_v0 = vperm.slane %v43_v36, 7 }
  0xb8   :  { %6583 = vst [vmem:[#allocation33_spill] sm:$0xff] %v3364_v56 }
  0xbd   :  { %618 = vperm.xlu1 %2886, %v3073_v2   ;;  %v3367_v1 = vpop.permute.xlu1 %186  ;;  %848 = vperm.xlu0 %2888, %v3138_v13   ;;  %v3370_v60 = vpop.permute.xlu0 %396 }
  0xbe   :  { %6584 = vst [vmem:[#allocation34_spill] sm:$0xff] %v3367_v1  ;;  %622 = vperm.xlu2 %2884, %v3092_v5  }
  0xbf   :  { %6585 = vst [vmem:[#allocation35_spill] sm:$0xff] %v3370_v60  ;;  %v3373_v34 = vpop.permute.xlu2 %296 }
  0xc0   :  { %6586 = vst [vmem:[#allocation36_spill] sm:$0xff] %v3373_v34  ;;  %v6602_v34 = vmov 2  }
  0xc5   :  { %630 = vperm.xlu1 %2886, %v3115_v9   ;;  %v3376_v63 = vpop.permute.xlu1 %201  ;;  %860 = vperm.xlu0 %2888, %v3156_v16  }
  0xc6   :  { %6587 = vst [vmem:[#allocation37_spill] sm:$0xff] %v3376_v63  ;;  %634 = vperm.xlu2 %2884, %v3110_v8   ;;  %v3380_v58 = vpop.permute.xlu0 %606 }
  0xc7   :  { %6588 = vst [vmem:[#allocation38_spill] sm:$0xff] %v3380_v58  ;;  %v3382_v57 = vpop.permute.xlu2 %308 }
  0xc8   :  { %6589 = vst [vmem:[#allocation39_spill] sm:$0xff] %v3382_v57 }
  0xcd   :  { %642 = vperm.xlu1 %2886, %v3133_v12   ;;  %872 = vperm.xlu0 %2888, %v3174_v19  }
  0xce   :  { %646 = vperm.xlu2 %2884, %v3128_v11   ;;  %v3387_v1 = vpop.permute.xlu1 %284  ;;  %v3389_v54 = vpop.permute.xlu0 %626 }
  0xcf   :  { %6590 = vst [vmem:[#allocation40_spill] sm:$0xff] %v3387_v1  ;;  %v3391_v53 = vpop.permute.xlu2 %320 }
  0xd0   :  { %6591 = vst [vmem:[#allocation41_spill] sm:$0xff] %v3389_v54 }
  0xd1   :  { %6592 = vst [vmem:[#allocation42_spill] sm:$0xff] %v3391_v53 }
  0xd5   :  { %654 = vperm.xlu1 %2886, %v3151_v15   ;;  %884 = vperm.xlu0 %2888, %v3192_v22  }
  0xd6   :  { %658 = vperm.xlu2 %2884, %v3146_v14   ;;  %v3396_v58 = vpop.permute.xlu1 %292  ;;  %v3398_v63 = vpop.permute.xlu0 %638 }
  0xd7   :  { %6593 = vst [vmem:[#allocation43_spill] sm:$0xff] %v3396_v58  ;;  %v3400_v57 = vpop.permute.xlu2 %332 }
  0xd8   :  { %6594 = vst [vmem:[#allocation44_spill] sm:$0xff] %v3398_v63 }
  0xd9   :  { %6595 = vst [vmem:[#allocation45_spill] sm:$0xff] %v3400_v57 }
  0xdd   :  { %666 = vperm.xlu1 %2886, %v3169_v18   ;;  %896 = vperm.xlu0 %2888, %v3210_v25  }
  0xde   :  { %670 = vperm.xlu2 %2884, %v3164_v17   ;;  %v3405_v54 = vpop.permute.xlu1 %304  ;;  %v3407_v53 = vpop.permute.xlu0 %650 }
  0xdf   :  { %6596 = vst [vmem:[#allocation46_spill] sm:$0xff] %v3405_v54  ;;  %v3409_v1 = vpop.permute.xlu2 %344 }
  0xe0   :  { %6597 = vst [vmem:[#allocation47_spill] sm:$0xff] %v3409_v1 }
  0xe5   :  { %678 = vperm.xlu1 %2886, %v3187_v21   ;;  %908 = vperm.xlu0 %2888, %v3228_v28  }
  0xe6   :  { %682 = vperm.xlu2 %2884, %v3182_v20   ;;  %v3414_v63 = vpop.permute.xlu1 %316  ;;  %v3416_v57 = vpop.permute.xlu0 %662 }
  0xe7   :  { %6598 = vst [vmem:[#allocation48_spill] sm:$0xff] %v3414_v63  ;;  %v3418_v58 = vpop.permute.xlu2 %356 }
  0xe8   :  { %6599 = vst [vmem:[#allocation49_spill] sm:$0xff] %v3418_v58 }
  0xed   :  { %690 = vperm.xlu1 %2886, %v3205_v24   ;;  %920 = vperm.xlu0 %2888, %v3246_v31  }
  0xee   :  { %694 = vperm.xlu2 %2884, %v3200_v23   ;;  %v3423_v54 = vpop.permute.xlu1 %328  ;;  %v3425_v1 = vpop.permute.xlu0 %674 }
  0xef   :  { %6600 = vst [vmem:[#allocation50_spill] sm:$0xff] %v3423_v54  ;;  %v3427_v51 = vpop.permute.xlu2 %368 }
  0xf0   :  { %6601 = vst [vmem:[#allocation51_spill] sm:$0xff] %v3427_v51 }
  0xf5   :  { %702 = vperm.xlu1 %2886, %v3223_v27   ;;  %2890 = vset.pattern.permute.xlu0 %v6602_v34 }
  0xf6   :  { %706 = vperm.xlu2 %2884, %v3218_v26   ;;  %v3432_v63 = vpop.permute.xlu1 %340  ;;  %v3434_v58 = vpop.permute.xlu0 %686  ;;  %46 = vperm.xlu0 %2890, %v3259_v33  }
  0xf7   :  { %6603 = vst [vmem:[#allocation52_spill] sm:$0xff] %v3432_v63  ;;  %v3437_v50 = vpop.permute.xlu2 %380  ;;  %v6609_v63 = vmov 1  }
  0xf8   :  { %6604 = vst [vmem:[#allocation53_spill] sm:$0xff] %v3434_v58  ;;  %v206_v58 = vperm.slane %v43_v36, 6 }
  0xf9   :  { %6605 = vst [vmem:[#allocation54_spill] sm:$0xff] %v3437_v50 }
  0xfd   :  { %714 = vperm.xlu1 %2886, %v3241_v30  }
  0xfe   :  { %718 = vperm.xlu2 %2884, %v3236_v29   ;;  %v3441_v54 = vpop.permute.xlu1 %352  ;;  %v3443_v51 = vpop.permute.xlu0 %698  ;;  %51 = vperm.xlu0 %2890, %v3083_v4  }
  0xff   :  { %6606 = vst [vmem:[#allocation55_spill] sm:$0xff] %v3441_v54  ;;  %v3446_v56 = vpop.permute.xlu2 %392 }
 0x100   :  { %6607 = vst [vmem:[#allocation56_spill] sm:$0xff] %v3443_v51 }
 0x101   :  { %6608 = vst [vmem:[#allocation57_spill] sm:$0xff] %v3446_v56 }
 0x105   :  { %726 = vperm.xlu1 %2886, %v3254_v32  }
 0x106   :  { %2887 = vset.pattern.permute.xlu2 %v6609_v63  ;;  %v3450_v48 = vpop.permute.xlu1 %364  ;;  %v3452_v47 = vpop.permute.xlu0 %710  ;;  %76 = vperm.xlu0 %2890, %v3102_v7  }
 0x107   :  { %6610 = vst [vmem:[#allocation58_spill] sm:$0xff] %v3450_v48  ;;  %800 = vperm.xlu2 %2887, %v3259_v33  }
 0x108   :  { %6611 = vst [vmem:[#allocation59_spill] sm:$0xff] %v3452_v47  ;;  %v3456_v50 = vpop.permute.xlu2 %602 }
 0x10d   :  { %2889 = vset.pattern.permute.xlu1 %v6609_v63 }
 0x10e   :  { %808 = vperm.xlu1 %2889, %v3078_v3   ;;  %v3460_v54 = vpop.permute.xlu1 %376  ;;  %v3462_v56 = vpop.permute.xlu0 %722  ;;  %91 = vperm.xlu0 %2890, %v3120_v10  }
 0x10f   :  { %6612 = vst [vmem:[#allocation60_spill] sm:$0xff] %v3460_v54  ;;  %812 = vperm.xlu2 %2887, %v3097_v6  }
 0x110   :  { %6613 = vst [vmem:[#allocation61_spill] sm:$0xff] %v3462_v56  ;;  %v3466_v48 = vpop.permute.xlu2 %614  ;;  %v928_v56 = vperm.slane %v43_v36, 5 }
 0x111   :  { %6614 = vst [vmem:[#allocation62_spill] sm:$0xff] %v3466_v48 }
 0x116   :  { %816 = vperm.xlu1 %2889, %v3073_v2   ;;  %v3469_v46 = vpop.permute.xlu1 %388  ;;  %106 = vperm.xlu0 %2890, %v3138_v13  }
 0x117   :  { %6615 = vst [vmem:[#allocation63_spill] sm:$0xff] %v3469_v46  ;;  %820 = vperm.xlu2 %2887, %v3092_v5   ;;  %v3473_v63 = vpop.permute.xlu0 %804 }
 0x118   :  { %6616 = vst [vmem:[#allocation64_spill] sm:$0xff] %v3473_v63  ;;  %v3475_v45 = vpop.permute.xlu2 %622 }
 0x119   :  { %6617 = vst [vmem:[#allocation65_spill] sm:$0xff] %v3475_v45 }
 0x11e   :  { %828 = vperm.xlu1 %2889, %v3115_v9   ;;  %v3478_v54 = vpop.permute.xlu1 %400  ;;  %121 = vperm.xlu0 %2890, %v3156_v16  }
 0x11f   :  { %6618 = vst [vmem:[#allocation66_spill] sm:$0xff] %v3478_v54  ;;  %832 = vperm.xlu2 %2887, %v3110_v8   ;;  %v3482_v48 = vpop.permute.xlu0 %824 }
 0x120   :  { %6619 = vst [vmem:[#allocation67_spill] sm:$0xff] %v3482_v48  ;;  %v3484_v44 = vpop.permute.xlu2 %634 }
 0x121   :  { %6620 = vst [vmem:[#allocation68_spill] sm:$0xff] %v3484_v44 }
 0x126   :  { %840 = vperm.xlu1 %2889, %v3133_v12   ;;  %136 = vperm.xlu0 %2890, %v3174_v19  }
 0x127   :  { %844 = vperm.xlu2 %2887, %v3128_v11   ;;  %v3489_v63 = vpop.permute.xlu1 %610  ;;  %v3491_v45 = vpop.permute.xlu0 %836 }
 0x128   :  { %6621 = vst [vmem:[#allocation69_spill] sm:$0xff] %v3489_v63  ;;  %v3493_v46 = vpop.permute.xlu2 %646 }
 0x129   :  { %6622 = vst [vmem:[#allocation70_spill] sm:$0xff] %v3491_v45 }
 0x12a   :  { %6623 = vst [vmem:[#allocation71_spill] sm:$0xff] %v3493_v46 }
 0x12e   :  { %852 = vperm.xlu1 %2889, %v3151_v15   ;;  %151 = vperm.xlu0 %2890, %v3192_v22  }
 0x12f   :  { %856 = vperm.xlu2 %2887, %v3146_v14   ;;  %v3498_v48 = vpop.permute.xlu1 %618  ;;  %v3500_v44 = vpop.permute.xlu0 %848 }
 0x130   :  { %6624 = vst [vmem:[#allocation72_spill] sm:$0xff] %v3498_v48  ;;  %v3502_v54 = vpop.permute.xlu2 %658 }
 0x131   :  { %6625 = vst [vmem:[#allocation73_spill] sm:$0xff] %v3502_v54 }
 0x136   :  { %864 = vperm.xlu1 %2889, %v3169_v18   ;;  %166 = vperm.xlu0 %2890, %v3210_v25  }
 0x137   :  { %868 = vperm.xlu2 %2887, %v3164_v17   ;;  %v3507_v63 = vpop.permute.xlu1 %630  ;;  %v3509_v46 = vpop.permute.xlu0 %860 }
 0x138   :  { %6626 = vst [vmem:[#allocation74_spill] sm:$0xff] %v3507_v63  ;;  %v3511_v45 = vpop.permute.xlu2 %670 }
 0x13e   :  { %876 = vperm.xlu1 %2889, %v3187_v21   ;;  %181 = vperm.xlu0 %2890, %v3228_v28  }
 0x13f   :  { %880 = vperm.xlu2 %2887, %v3182_v20   ;;  %v3516_v48 = vpop.permute.xlu1 %642  ;;  %v3518_v54 = vpop.permute.xlu0 %872 }
 0x140   :  { %6627 = vst [vmem:[#allocation75_spill] sm:$0xff] %v3516_v48  ;;  %v3520_v43 = vpop.permute.xlu2 %682 }
 0x141   :  { %6628 = vst [vmem:[#allocation76_spill] sm:$0xff] %v3518_v54 }
 0x146   :  { %888 = vperm.xlu1 %2889, %v3205_v24   ;;  %196 = vperm.xlu0 %2890, %v3246_v31  }
 0x147   :  { %892 = vperm.xlu2 %2887, %v3200_v23   ;;  %v3525_v63 = vpop.permute.xlu1 %654  ;;  %v3527_v42 = vpop.permute.xlu0 %884 }
 0x148   :  { %6629 = vst [vmem:[#allocation77_spill] sm:$0xff] %v3525_v63  ;;  %v3529_v41 = vpop.permute.xlu2 %694 }
 0x149   :  { %6630 = vst [vmem:[#allocation78_spill] sm:$0xff] %v3527_v42  ;;  %v3564_v42 = vperm.slane %v927_v35, 1 }
 0x14e   :  { %900 = vperm.xlu1 %2889, %v3223_v27   ;;  %1191 = vrot.lane.b32.xlu0 %v3083_v4, %s3051_s17  ;;  %v3570_v4 = vperm.slane %v730_v0, 3 }
 0x14f   :  { %904 = vperm.xlu2 %2887, %v3218_v26   ;;  %v3535_v48 = vpop.permute.xlu1 %666  ;;  %v3537_v40 = vpop.permute.xlu0 %896 }
 0x150   :  { %6631 = vst [vmem:[#allocation79_spill] sm:$0xff] %v3537_v40  ;;  %v3539_v39 = vpop.permute.xlu2 %706  ;;  %v403_v40 = vperm.slane %v43_v36, 0 }
 0x156   :  { %912 = vperm.xlu1 %2889, %v3241_v30   ;;  %1197 = vrot.lane.b32.xlu0 %v3073_v2, %s3051_s17  ;;  %v205_v2 = vperm.slane %v43_v36, 2 }
 0x157   :  { %916 = vperm.xlu2 %2887, %v3236_v29   ;;  %v3545_v63 = vpop.permute.xlu1 %678  ;;  %v3547_v38 = vpop.permute.xlu0 %908 }
 0x158   :  { %6632 = vst [vmem:[#allocation80_spill] sm:$0xff] %v3545_v63  ;;  %v3549_v37 = vpop.permute.xlu2 %718  ;;  %v3582_v35 = vperm.slane %v205_v2, 2 }
 0x159   :  { %6633 = vst [vmem:[#allocation81_spill] sm:$0xff] %v3547_v38  ;;  %v729_v38 = vperm.slane %v43_v36, 3  ;;  %v3584_v36 = vperm.slane %v206_v58, 2 }
 0x15a   :  { %6634 = vst [vmem:[#allocation82_spill] sm:$0xff] %v3549_v37  ;;  %v3576_v37 = vperm.slane %v404_v61, 0 }
 0x15b   :  { %v3568_v59 = vperm.slane %v729_v38, 3 }
 0x15c   :  { %v410_v2 = vmax.f32 %v3354_v62, %v3576_v37 }
 0x15d   :  { %v735_v38 = vmin.f32 %v3456_v50, %v3568_v59 }
 0x15e   :  { %924 = vperm.xlu1 %2889, %v3254_v32   ;;  %1203 = vrot.lane.b32.xlu0 %v3115_v9, %s3051_s17  ;;  %v3566_v9 = vperm.slane %v928_v56, 1 }
 0x15f   :  { %1189 = vrot.lane.b32.xlu2 %v3259_v33, %s3051_s17  ;;  %v3559_v60 = vpop.permute.xlu1 %690  ;;  %v3561_v47 = vpop.permute.xlu0 %920 }
 0x160   :  { %6635 = vst [vmem:[#allocation83_spill] sm:$0xff] %v3559_v60  ;;  %2892 = vset.pattern.permute.xlu2 %v6602_v34  ;;  %v3574_v60 = vperm.slane %v403_v40, 0 }
 0x161   :  { %6636 = vst [vmem:[#allocation84_spill] sm:$0xff] %v3561_v47  ;;  %v801_v51 = vpop.permute.xlu2 %800 }
 0x162   :  { %v933_v33 = vmax.f32 %v801_v51, %v3564_v42  ;;  %v934_v47 = vmax.f32 %v801_v51, %v3566_v9  ;;  %v736_v51 = vmin.f32 %v3456_v50, %v3570_v4 }
 0x164   :  { %v997_v56 = vsub.f32 %v735_v38, %v933_v33  ;;  %v998_v58 = vsub.f32 %v736_v51, %v934_v47 }
 0x166   :  { %1193 = vrot.lane.b32.xlu1 %v3078_v3, %s3051_s17  ;;  %1209 = vrot.lane.b32.xlu0 %v3133_v12, %s3051_s17  ;;  %v409_v3 = vmax.f32 %v3354_v62, %v3574_v60  ;;  %v1062_v54 = vmax.f32 %v998_v58, 0.0 }
 0x167   :  { %1195 = vrot.lane.b32.xlu2 %v3097_v6, %s3051_s17  ;;  %v3592_v40 = vpop.permute.xlu1 %702  ;;  %2891 = vset.pattern.permute.xlu1 %v6602_v34 }
 0x168   :  { %6637 = vst [vmem:[#allocation85_spill] sm:$0xff] %v3592_v40  ;;  %v47_v12 = vpop.permute.xlu0 %46  ;;  %v1061_v40 = vmax.f32 %v997_v56, 0.0 }
 0x169   :  { %v211_v61 = vmin.f32 %v47_v12, %v3582_v35  ;;  %v212_v50 = vmin.f32 %v47_v12, %v3584_v36  ;;  %v3601_v0 = vpop.permute.xlu2 %812 }
 0x16b   :  { %v473_v6 = vsub.f32 %v211_v61, %v409_v3  ;;  %v474_v63 = vsub.f32 %v212_v50, %v410_v2 }
 0x16d   :  { %v537_v34 = vmax.f32 %v473_v6, 0.0  ;;  %v538_v31 = vmax.f32 %v474_v63, 0.0  ;;  %v958_v63 = vmax.f32 %v3500_v44, %v3566_v9 }
 0x16e   :  { %1199 = vrot.lane.b32.xlu1 %v3092_v5, %s3051_s17  ;;  %1215 = vrot.lane.b32.xlu0 %v3151_v15, %s3051_s17 }
 0x16f   :  { %1201 = vrot.lane.b32.xlu2 %v3102_v7, %s3051_s17  ;;  %v3609_v33 = vpop.permute.xlu1 %714  ;;  %v3611_v47 = vmul.f32 %v1061_v40, %v537_v34  ;;  %v3613_v62 = vmul.f32 %v1062_v54, %v538_v31  ;;  %v957_v54 = vmax.f32 %v3500_v44, %v3564_v42  ;;  %v434_v44 = vmax.f32 %v3316_v49, %v3576_v37 }
 0x170   :  { %v3615_v38 = vpop.permute.xlu0 %51 }
 0x171   :  { %6638 = vst [vmem:[#allocation86_spill] sm:$0xff] %v3611_v47  ;;  %v3617_v51 = vpop.permute.xlu2 %820 }
 0x172   :  { %6639 = vst [vmem:[#allocation87_spill] sm:$0xff] %v3613_v62 }
 0x176   :  { %1205 = vrot.lane.b32.xlu1 %v3110_v8, %s3051_s17  ;;  %1221 = vrot.lane.b32.xlu0 %v3169_v18, %s3051_s17 }
 0x177   :  { %1207 = vrot.lane.b32.xlu2 %v3120_v10, %s3051_s17  ;;  %v3625_v5 = vpop.permute.xlu1 %726 }
 0x178   :  { %v3627_v6 = vpop.permute.xlu0 %76 }
 0x179   :  { %6640 = vst [vmem:[#allocation88_spill] sm:$0xff] %v3627_v6  ;;  %v3629_v15 = vpop.permute.xlu2 %832 }
 0x17a   :  { %6641 = vst [vmem:[#allocation89_spill] sm:$0xff] %v3629_v15 }
 0x17e   :  { %1211 = vrot.lane.b32.xlu1 %v3128_v11, %s3051_s17  ;;  %1227 = vrot.lane.b32.xlu0 %v3187_v21, %s3051_s17  ;;  %v759_v11 = vmin.f32 %v3407_v53, %v3568_v59  ;;  %v433_v21 = vmax.f32 %v3316_v49, %v3574_v60 }
 0x17f   :  { %1213 = vrot.lane.b32.xlu2 %v3138_v13, %s3051_s17  ;;  %v760_v13 = vmin.f32 %v3407_v53, %v3570_v4 }
 0x180   :  { %v3637_v8 = vpop.permute.xlu1 %808  ;;  %v3639_v18 = vpop.permute.xlu0 %91  ;;  %v1021_v3 = vsub.f32 %v759_v11, %v957_v54 }
 0x181   :  { %6642 = vst [vmem:[#allocation90_spill] sm:$0xff] %v3637_v8  ;;  %v3641_v31 = vpop.permute.xlu2 %844 }
 0x182   :  { %6643 = vst [vmem:[#allocation91_spill] sm:$0xff] %v3639_v18  ;;  %v6738_v18 = vld [vmem:[#allocation25_spill] sm:$0xff] }
 0x183   :  { %6644 = vst [vmem:[#allocation92_spill] sm:$0xff] %v3641_v31 }
 0x186   :  { %1217 = vrot.lane.b32.xlu1 %v3146_v14, %s3051_s17  ;;  %1233 = vrot.lane.b32.xlu0 %v3205_v24, %s3051_s17  ;;  %v1022_v24 = vsub.f32 %v760_v13, %v958_v63 }
 0x187   :  { %1219 = vrot.lane.b32.xlu2 %v3156_v16, %s3051_s17  ;;  %v1085_v16 = vmax.f32 %v1021_v3, 0.0 }
 0x188   :  { %v3661_v40 = vpop.permute.xlu1 %816  ;;  %v107_v14 = vpop.permute.xlu0 %106  ;;  %v1086_v61 = vmax.f32 %v1022_v24, 0.0 }
 0x189   :  { %6645 = vst [vmem:[#allocation93_spill] sm:$0xff] %v3661_v40  ;;  %v235_v2 = vmin.f32 %v107_v14, %v3582_v35  ;;  %v236_v12 = vmin.f32 %v107_v14, %v3584_v36  ;;  %v3665_v56 = vpop.permute.xlu2 %856 }
 0x18a   :  { %6646 = vst [vmem:[#allocation94_spill] sm:$0xff] %v3665_v56 }
 0x18b   :  { %v497_v53 = vsub.f32 %v235_v2, %v433_v21  ;;  %v498_v58 = vsub.f32 %v236_v12, %v434_v44  ;;  %v769_v21 = vmin.f32 %v3511_v45, %v3568_v59  ;;  %v440_v2 = vmax.f32 %v3325_v52, %v3576_v37 }
 0x18c   :  { %v963_v12 = vmax.f32 %v3509_v46, %v3564_v42 }
 0x18d   :  { %v561_v50 = vmax.f32 %v497_v53, 0.0  ;;  %v562_v34 = vmax.f32 %v498_v58, 0.0  ;;  %v964_v53 = vmax.f32 %v3509_v46, %v3566_v9 }
 0x18e   :  { %1223 = vrot.lane.b32.xlu1 %v3164_v17, %s3051_s17  ;;  %1239 = vrot.lane.b32.xlu0 %v3223_v27, %s3051_s17  ;;  %v770_v17 = vmin.f32 %v3511_v45, %v3570_v4  ;;  %v439_v45 = vmax.f32 %v3325_v52, %v3574_v60  ;;  %v776_v52 = vmin.f32 %v3520_v43, %v3570_v4 }
 0x18f   :  { %1225 = vrot.lane.b32.xlu2 %v3174_v19, %s3051_s17  ;;  %v3673_v49 = vmul.f32 %v1085_v16, %v561_v50  ;;  %v3675_v54 = vmul.f32 %v1086_v61, %v562_v34  ;;  %v775_v16 = vmin.f32 %v3520_v43, %v3568_v59 }
 0x190   :  { %v3677_v63 = vpop.permute.xlu1 %828  ;;  %v122_v11 = vpop.permute.xlu0 %121 }
 0x191   :  { %6647 = vst [vmem:[#allocation95_spill] sm:$0xff] %v3673_v49  ;;  %v869_v13 = vpop.permute.xlu2 %868  ;;  %v241_v3 = vmin.f32 %v122_v11, %v3582_v35  ;;  %v242_v24 = vmin.f32 %v122_v11, %v3584_v36 }
 0x192   :  { %6648 = vst [vmem:[#allocation96_spill] sm:$0xff] %v3675_v54  ;;  %v967_v44 = vmax.f32 %v869_v13, %v3564_v42  ;;  %v968_v27 = vmax.f32 %v869_v13, %v3566_v9 }
 0x193   :  { %6649 = vst [vmem:[#allocation97_spill] sm:$0xff] %v3677_v63  ;;  %v503_v50 = vsub.f32 %v241_v3, %v439_v45  ;;  %v504_v34 = vsub.f32 %v242_v24, %v440_v2  ;;  %v781_v2 = vmin.f32 %v3529_v41, %v3568_v59 }
 0x194   :  { %v3685_v14 = vsub.f32 %v769_v21, %v967_v44  ;;  %v3687_v19 = vsub.f32 %v770_v17, %v968_v27 }
 0x195   :  { %v568_v27 = vmax.f32 %v504_v34, 0.0 }
 0x196   :  { %6650 = vst [vmem:[#allocation98_spill] sm:$0xff] %v3685_v14  ;;  %1229 = vrot.lane.b32.xlu1 %v3182_v20, %s3051_s17  ;;  %1245 = vrot.lane.b32.xlu0 %v3241_v30, %s3051_s17  ;;  %v765_v30 = vmin.f32 %v3416_v57, %v3568_v59  ;;  %v3037_v14 = vld [vmem:[%s6362_s0 + $0xc8] sm:$0xff] }
 0x197   :  { %6651 = vst [vmem:[#allocation99_spill] sm:$0xff] %v3687_v19  ;;  %1231 = vrot.lane.b32.xlu2 %v3192_v22, %s3051_s17  ;;  %v766_v22 = vmin.f32 %v3416_v57, %v3570_v4  ;;  %v567_v57 = vmax.f32 %v503_v50, 0.0  ;;  %v768_v50 = vmin.f32 %v3535_v48, %v3570_v4 }
 0x198   :  { %v3705_v58 = vpop.permute.xlu1 %840  ;;  %v3707_v20 = vpop.permute.xlu0 %136  ;;  %v1027_v13 = vsub.f32 %v765_v30, %v963_v12  ;;  %v782_v12 = vmin.f32 %v3529_v41, %v3570_v4 }
 0x199   :  { %6652 = vst [vmem:[#allocation100_spill] sm:$0xff] %v3705_v58  ;;  %v881_v61 = vpop.permute.xlu2 %880  ;;  %v1028_v21 = vsub.f32 %v766_v22, %v964_v53 }
 0x19a   :  { %v973_v46 = vmax.f32 %v881_v61, %v3564_v42  ;;  %v974_v11 = vmax.f32 %v881_v61, %v3566_v9  ;;  %v1091_v43 = vmax.f32 %v1027_v13, 0.0  ;;  %v767_v61 = vmin.f32 %v3535_v48, %v3568_v59 }
 0x19b   :  { %v1092_v3 = vmax.f32 %v1028_v21, 0.0 }
 0x19c   :  { %v3719_v17 = vsub.f32 %v775_v16, %v973_v46  ;;  %v3721_v44 = vsub.f32 %v776_v52, %v974_v11  ;;  %v3739_v30 = vmul.f32 %v1091_v43, %v567_v57 }
 0x19e   :  { %6653 = vst [vmem:[#allocation101_spill] sm:$0xff] %v3719_v17  ;;  %1235 = vrot.lane.b32.xlu1 %v3200_v23, %s3051_s17  ;;  %1251 = vrot.lane.b32.xlu0 %v3254_v32, %s3051_s17  ;;  %v3036_v17 = vld [vmem:[%s6362_s0 + $0x88] sm:$0xff] }
 0x19f   :  { %6654 = vst [vmem:[#allocation102_spill] sm:$0xff] %v3721_v44  ;;  %1237 = vrot.lane.b32.xlu2 %v3210_v25, %s3051_s17  ;;  %v3741_v25 = vmul.f32 %v1092_v3, %v568_v27  ;;  %v247_v3 = vmin.f32 %v3707_v20, %v3582_v35 }
 0x1a0   :  { %v3729_v24 = vpop.permute.xlu1 %852  ;;  %v3731_v45 = vpop.permute.xlu0 %151  ;;  %6656 = vst [vmem:[#allocation104_spill] sm:$0xff] %v3739_v30 }
 0x1a1   :  { %6655 = vst [vmem:[#allocation103_spill] sm:$0xff] %v3729_v24  ;;  %v893_v53 = vpop.permute.xlu2 %892 }
 0x1a2   :  { %v979_v23 = vmax.f32 %v893_v53, %v3564_v42  ;;  %v980_v32 = vmax.f32 %v893_v53, %v3566_v9  ;;  %6657 = vst [vmem:[#allocation105_spill] sm:$0xff] %v3741_v25  ;;  %v771_v53 = vmin.f32 %v3425_v1, %v3568_v59 }
 0x1a4   :  { %v3743_v22 = vsub.f32 %v781_v2, %v979_v23  ;;  %v3745_v16 = vsub.f32 %v782_v12, %v980_v32  ;;  %v248_v2 = vmin.f32 %v3707_v20, %v3584_v36  ;;  %v446_v12 = vmax.f32 %v3334_v55, %v3576_v37  ;;  %v6664_v32 = vld [vmem:[#allocation6_spill] sm:$0xff]  ;;  %v6665_v20 = vld [vmem:[#allocation76_spill] sm:$0xff] }
 0x1a5   :  { %v772_v23 = vmin.f32 %v3425_v1, %v3570_v4  ;;  %v6667_v1 = vld [vmem:[#allocation82_spill] sm:$0xff] }
 0x1a6   :  { %6658 = vst [vmem:[#allocation106_spill] sm:$0xff] %v3743_v22  ;;  %1241 = vrot.lane.b32.xlu1 %v3218_v26, %s3051_s17  ;;  %v787_v26 = vmin.f32 %v3539_v39, %v3568_v59 }
 0x1a7   :  { %6659 = vst [vmem:[#allocation107_spill] sm:$0xff] %v3745_v16  ;;  %1243 = vrot.lane.b32.xlu2 %v3228_v28, %s3051_s17  ;;  %v788_v28 = vmin.f32 %v3539_v39, %v3570_v4  ;;  %v445_v39 = vmax.f32 %v3334_v55, %v3574_v60 }
 0x1a8   :  { %v865_v41 = vpop.permute.xlu1 %864  ;;  %v3751_v52 = vpop.permute.xlu0 %166 }
 0x1a9   :  { %v965_v34 = vmax.f32 %v865_v41, %v3564_v42  ;;  %v966_v46 = vmax.f32 %v865_v41, %v3566_v9  ;;  %v905_v11 = vpop.permute.xlu2 %904  ;;  %v969_v41 = vmax.f32 %v6665_v20, %v3564_v42 }
 0x1aa   :  { %v985_v13 = vmax.f32 %v905_v11, %v3564_v42  ;;  %v986_v21 = vmax.f32 %v905_v11, %v3566_v9  ;;  %v793_v11 = vmin.f32 %v6667_v1, %v3568_v59 }
 0x1ab   :  { %v3765_v57 = vsub.f32 %v767_v61, %v965_v34  ;;  %v3767_v27 = vsub.f32 %v768_v50, %v966_v46  ;;  %v6666_v61 = vld [vmem:[#allocation80_spill] sm:$0xff]  ;;  %v1033_v49 = vsub.f32 %v771_v53, %v969_v41  ;;  %v6673_v41 = vld [vmem:[#allocation7_spill] sm:$0xff] }
 0x1ac   :  { %v3769_v48 = vsub.f32 %v787_v26, %v985_v13  ;;  %v3771_v43 = vsub.f32 %v788_v28, %v986_v21  ;;  %v773_v50 = vmin.f32 %v6666_v61, %v3568_v59  ;;  %v774_v55 = vmin.f32 %v6666_v61, %v3570_v4 }
 0x1ad   :  { %6660 = vst [vmem:[#allocation108_spill] sm:$0xff] %v3765_v57  ;;  %v794_v26 = vmin.f32 %v6667_v1, %v3570_v4 }
 0x1ae   :  { %6661 = vst [vmem:[#allocation109_spill] sm:$0xff] %v3767_v27  ;;  %1247 = vrot.lane.b32.xlu1 %v3236_v29, %s3051_s17  ;;  %v970_v29 = vmax.f32 %v6665_v20, %v3566_v9  ;;  %v510_v20 = vsub.f32 %v248_v2, %v446_v12 }
 0x1af   :  { %6662 = vst [vmem:[#allocation110_spill] sm:$0xff] %v3769_v48  ;;  %1249 = vrot.lane.b32.xlu2 %v6664_v32, %s3051_s17  ;;  %v509_v32 = vsub.f32 %v247_v3, %v445_v39  ;;  %v6672_v39 = vld [vmem:[#allocation83_spill] sm:$0xff] }
 0x1b0   :  { %6663 = vst [vmem:[#allocation111_spill] sm:$0xff] %v3771_v43  ;;  %v877_v34 = vpop.permute.xlu1 %876  ;;  %v3797_v46 = vpop.permute.xlu0 %181  ;;  %v1034_v62 = vsub.f32 %v772_v23, %v970_v29  ;;  %v574_v48 = vmax.f32 %v510_v20, 0.0  ;;  %v779_v12 = vmin.f32 %v6672_v39, %v3568_v59 }
 0x1b1   :  { %v971_v28 = vmax.f32 %v877_v34, %v3564_v42  ;;  %v972_v13 = vmax.f32 %v877_v34, %v3566_v9  ;;  %v917_v21 = vpop.permute.xlu2 %916  ;;  %v573_v43 = vmax.f32 %v509_v32, 0.0  ;;  %v1097_v34 = vmax.f32 %v1033_v49, 0.0 }
 0x1b2   :  { %v991_v25 = vmax.f32 %v917_v21, %v3564_v42  ;;  %v992_v61 = vmax.f32 %v917_v21, %v3566_v9  ;;  %v1098_v27 = vmax.f32 %v1034_v62, 0.0 }
 0x1b3   :  { %v3807_v30 = vsub.f32 %v773_v50, %v971_v28  ;;  %v3809_v54 = vsub.f32 %v774_v55, %v972_v13  ;;  %v780_v50 = vmin.f32 %v6672_v39, %v3570_v4  ;;  %v3826_v55 = vmul.f32 %v1097_v34, %v573_v43  ;;  %v6680_v34 = vld [vmem:[#allocation4_spill] sm:$0xff] }
 0x1b4   :  { %v3811_v47 = vsub.f32 %v793_v11, %v991_v25  ;;  %v3813_v1 = vsub.f32 %v794_v26, %v992_v61  ;;  %v3828_v62 = vmul.f32 %v1098_v27, %v574_v48  ;;  %v6678_v26 = vld [vmem:[#allocation85_spill] sm:$0xff]  ;;  %v6679_v48 = vld [vmem:[#allocation3_spill] sm:$0xff] }
 0x1b5   :  { %6668 = vst [vmem:[#allocation6_spill] sm:$0xff] %v3807_v30  ;;  %v785_v28 = vmin.f32 %v6678_v26, %v3568_v59  ;;  %v786_v32 = vmin.f32 %v6678_v26, %v3570_v4  ;;  %v6684_v26 = vld [vmem:[#allocation78_spill] sm:$0xff] }
 0x1b6   :  { %6669 = vst [vmem:[#allocation76_spill] sm:$0xff] %v3809_v54  ;;  %v3028_v54 = vld [vmem:[%s6362_s0 + $0x80] sm:$0xff] }
 0x1b7   :  { %6670 = vst [vmem:[#allocation80_spill] sm:$0xff] %v3811_v47 }
 0x1b8   :  { %6671 = vst [vmem:[#allocation82_spill] sm:$0xff] %v3813_v1  ;;  %v889_v3 = vpop.permute.xlu1 %888  ;;  %v3815_v2 = vpop.permute.xlu0 %196  ;;  %v6686_v1 = vld [vmem:[#allocation2_spill] sm:$0xff] }
 0x1b9   :  { %v977_v53 = vmax.f32 %v889_v3, %v3564_v42  ;;  %v978_v25 = vmax.f32 %v889_v3, %v3566_v9  ;;  %v1190_v23 = vpop.permute.xlu2 %1189  ;;  %6674 = vst [vmem:[#allocation83_spill] sm:$0xff] %v3826_v55 }
 0x1ba   :  { %v3824_v29 = vsub.f32 %v6673_v41, %v1190_v23  ;;  %6675 = vst [vmem:[#allocation7_spill] sm:$0xff] %v3828_v62 }
 0x1bb   :  { %v3830_v49 = vsub.f32 %v779_v12, %v977_v53  ;;  %v3832_v11 = vsub.f32 %v780_v50, %v978_v25  ;;  %v253_v50 = vmin.f32 %v3731_v45, %v3582_v35  ;;  %v254_v53 = vmin.f32 %v3731_v45, %v3584_v36  ;;  %v6683_v25 = vld [vmem:[#allocation28_spill] sm:$0xff] }
 0x1bc   :  { %1349 = vrot.lane.b32.xlu1 %v3824_v29, %s3052_s20  ;;  %v451_v23 = vmax.f32 %v6683_v25, %v3574_v60  ;;  %v452_v41 = vmax.f32 %v6683_v25, %v3576_v37  ;;  %v792_v45 = vmin.f32 %v3609_v33, %v3570_v4 }
 0x1bd   :  { %6676 = vst [vmem:[#allocation112_spill] sm:$0xff] %v3830_v49 }
 0x1be   :  { %6677 = vst [vmem:[#allocation113_spill] sm:$0xff] %v3832_v11  ;;  %v516_v55 = vsub.f32 %v254_v53, %v452_v41 }
 0x1c0   :  { %v901_v13 = vpop.permute.xlu1 %900  ;;  %v1192_v21 = vpop.permute.xlu0 %1191 }
 0x1c1   :  { %v983_v43 = vmax.f32 %v901_v13, %v3564_v42  ;;  %v984_v27 = vmax.f32 %v901_v13, %v3566_v9  ;;  %v3843_v20 = vsub.f32 %v6679_v48, %v1192_v21  ;;  %v1196_v61 = vpop.permute.xlu2 %1195  ;;  %v6685_v13 = vld [vmem:[#allocation53_spill] sm:$0xff] }
 0x1c2   :  { %v3846_v3 = vsub.f32 %v6680_v34, %v1196_v61  ;;  %v777_v21 = vmin.f32 %v6685_v13, %v3568_v59  ;;  %v515_v61 = vsub.f32 %v253_v50, %v451_v23  ;;  %v580_v23 = vmax.f32 %v516_v55, 0.0 }
 0x1c3   :  { %v3848_v39 = vsub.f32 %v785_v28, %v983_v43  ;;  %v3850_v12 = vsub.f32 %v786_v32, %v984_v27  ;;  %1351 = vrot.lane.b32.xlu2 %v3843_v20, %s3052_s20  ;;  %v975_v28 = vmax.f32 %v6684_v26, %v3564_v42  ;;  %v976_v32 = vmax.f32 %v6684_v26, %v3566_v9 }
 0x1c4   :  { %1355 = vrot.lane.b32.xlu1 %v3846_v3, %s3052_s20  ;;  %v791_v43 = vmin.f32 %v3609_v33, %v3568_v59  ;;  %v778_v26 = vmin.f32 %v6685_v13, %v3570_v4 }
 0x1c5   :  { %6681 = vst [vmem:[#allocation85_spill] sm:$0xff] %v3848_v39  ;;  %v1039_v39 = vsub.f32 %v777_v21, %v975_v28 }
 0x1c6   :  { %6682 = vst [vmem:[#allocation3_spill] sm:$0xff] %v3850_v12  ;;  %v1040_v50 = vsub.f32 %v778_v26, %v976_v32  ;;  %v6689_v32 = vld [vmem:[#allocation5_spill] sm:$0xff]  ;;  %v3021_v26 = vld [vmem:[%s6362_s0 + $0x10] sm:$0xff] }
 0x1c8   :  { %v913_v27 = vpop.permute.xlu1 %912  ;;  %v1198_v48 = vpop.permute.xlu0 %1197  ;;  %v1104_v13 = vmax.f32 %v1040_v50, 0.0  ;;  %v3022_v50 = vld [vmem:[%s6362_s0 + $0x50] sm:$0xff] }
 0x1c9   :  { %v989_v34 = vmax.f32 %v913_v27, %v3564_v42  ;;  %v990_v25 = vmax.f32 %v913_v27, %v3566_v9  ;;  %v3877_v47 = vsub.f32 %v6686_v1, %v1198_v48  ;;  %v1202_v62 = vpop.permute.xlu2 %1201  ;;  %v579_v1 = vmax.f32 %v515_v61, 0.0 }
 0x1ca   :  { %v3882_v12 = vsub.f32 %v3102_v7, %v1202_v62  ;;  %v1103_v27 = vmax.f32 %v1039_v39, 0.0  ;;  %v797_v7 = vmin.f32 %v3625_v5, %v3568_v59  ;;  %v798_v62 = vmin.f32 %v3625_v5, %v3570_v4 }
 0x1cb   :  { %v3884_v33 = vsub.f32 %v791_v43, %v989_v34  ;;  %v3886_v11 = vsub.f32 %v792_v45, %v990_v25  ;;  %1357 = vrot.lane.b32.xlu2 %v3877_v47, %s3052_s20  ;;  %v3906_v39 = vmul.f32 %v1104_v13, %v580_v23 }
 0x1cc   :  { %1361 = vrot.lane.b32.xlu1 %v3882_v12, %s3052_s20  ;;  %v3901_v48 = vmul.f32 %v1103_v27, %v579_v1  ;;  %v3023_v27 = vld [vmem:[%s6362_s0 + $0x60] sm:$0xff] }
 0x1cd   :  { %6687 = vst [vmem:[#allocation4_spill] sm:$0xff] %v3884_v33  ;;  %v3027_v33 = vld [vmem:[%s6362_s0 + $0x40] sm:$0xff] }
 0x1ce   :  { %6688 = vst [vmem:[#allocation28_spill] sm:$0xff] %v3886_v11 }
 0x1cf   :  { %6690 = vst [vmem:[#allocation78_spill] sm:$0xff] %v3901_v48 }
 0x1d0   :  { %v925_v53 = vpop.permute.xlu1 %924  ;;  %v1204_v41 = vpop.permute.xlu0 %1203  ;;  %6691 = vst [vmem:[#allocation53_spill] sm:$0xff] %v3906_v39 }
 0x1d1   :  { %v995_v28 = vmax.f32 %v925_v53, %v3564_v42  ;;  %v996_v21 = vmax.f32 %v925_v53, %v3566_v9  ;;  %v3899_v43 = vsub.f32 %v6689_v32, %v1204_v41  ;;  %v1208_v45 = vpop.permute.xlu2 %1207  ;;  %v259_v53 = vmin.f32 %v3751_v52, %v3582_v35  ;;  %v3025_v32 = vld [vmem:[%s6362_s0 + $0x68] sm:$0xff] }
 0x1d2   :  { %v3904_v55 = vsub.f32 %v3120_v10, %v1208_v45  ;;  %v260_v41 = vmin.f32 %v3751_v52, %v3584_v36  ;;  %v3026_v52 = vld [vmem:[%s6362_s0 + $0x78] sm:$0xff] }
 0x1d3   :  { %v3908_v61 = vsub.f32 %v797_v7, %v995_v28  ;;  %v3910_v5 = vsub.f32 %v798_v62, %v996_v21  ;;  %1363 = vrot.lane.b32.xlu2 %v3899_v43, %s3052_s20  ;;  %v3024_v28 = vld [vmem:[%s6362_s0 + $0x28] sm:$0xff] }
 0x1d4   :  { %1367 = vrot.lane.b32.xlu1 %v3904_v55, %s3052_s20 }
 0x1d5   :  { %6692 = vst [vmem:[#allocation2_spill] sm:$0xff] %v3908_v61 }
 0x1d6   :  { %6693 = vst [vmem:[#allocation5_spill] sm:$0xff] %v3910_v5 }
 0x1d8   :  { %v1194_v34 = vpop.permute.xlu1 %1193  ;;  %v1210_v25 = vpop.permute.xlu0 %1209 }
 0x1d9   :  { %v3919_v10 = vsub.f32 %v3021_v26, %v1194_v34  ;;  %v3924_v1 = vsub.f32 %v3022_v50, %v1210_v25  ;;  %v1214_v23 = vpop.permute.xlu2 %1213  ;;  %v6694_v25 = vld [vmem:[#allocation30_spill] sm:$0xff] }
 0x1da   :  { %v3929_v13 = vsub.f32 %v3023_v27, %v1214_v23  ;;  %v457_v26 = vmax.f32 %v6694_v25, %v3574_v60  ;;  %v458_v23 = vmax.f32 %v6694_v25, %v3576_v37  ;;  %v6695_v27 = vld [vmem:[#allocation79_spill] sm:$0xff] }
 0x1db   :  { %1353 = vrot.lane.b32.xlu0 %v3919_v10, %s3052_s20  ;;  %1369 = vrot.lane.b32.xlu2 %v3924_v1, %s3052_s20 }
 0x1dc   :  { %1373 = vrot.lane.b32.xlu1 %v3929_v13, %s3052_s20  ;;  %v521_v25 = vsub.f32 %v259_v53, %v457_v26 }
 0x1de   :  { %v585_v61 = vmax.f32 %v521_v25, 0.0 }
 0x1e0   :  { %v1200_v7 = vpop.permute.xlu1 %1199  ;;  %v1216_v62 = vpop.permute.xlu0 %1215 }
 0x1e1   :  { %v3944_v21 = vsub.f32 %v3024_v28, %v1200_v7  ;;  %v3949_v45 = vsub.f32 %v3025_v32, %v1216_v62  ;;  %v1220_v34 = vpop.permute.xlu2 %1219  ;;  %v981_v7 = vmax.f32 %v6695_v27, %v3564_v42  ;;  %v982_v62 = vmax.f32 %v6695_v27, %v3566_v9  ;;  %v6696_v28 = vld [vmem:[#allocation56_spill] sm:$0xff] }
 0x1e2   :  { %v3956_v50 = vsub.f32 %v3026_v52, %v1220_v34  ;;  %v783_v32 = vmin.f32 %v6696_v28, %v3568_v59  ;;  %v784_v34 = vmin.f32 %v6696_v28, %v3570_v4  ;;  %v522_v52 = vsub.f32 %v260_v41, %v458_v23  ;;  %v3029_v41 = vld [vmem:[%s6362_s0 + $0x90] sm:$0xff]  ;;  %v3031_v28 = vld [vmem:[%s6362_s0 + $0x98] sm:$0xff] }
 0x1e3   :  { %1359 = vrot.lane.b32.xlu0 %v3944_v21, %s3052_s20  ;;  %1375 = vrot.lane.b32.xlu2 %v3949_v45, %s3052_s20 }
 0x1e4   :  { %1379 = vrot.lane.b32.xlu1 %v3956_v50, %s3052_s20  ;;  %v1045_v39 = vsub.f32 %v783_v32, %v981_v7  ;;  %v1046_v48 = vsub.f32 %v784_v34, %v982_v62  ;;  %v586_v11 = vmax.f32 %v522_v52, 0.0 }
 0x1e6   :  { %v1109_v23 = vmax.f32 %v1045_v39, 0.0  ;;  %v1110_v7 = vmax.f32 %v1046_v48, 0.0  ;;  %v3030_v39 = vld [vmem:[%s6362_s0 + $0x58] sm:$0xff] }
 0x1e8   :  { %v1206_v27 = vpop.permute.xlu1 %1205  ;;  %v1222_v5 = vpop.permute.xlu0 %1221 }
 0x1e9   :  { %v3977_v49 = vsub.f32 %v3027_v33, %v1206_v27  ;;  %v3982_v30 = vsub.f32 %v3028_v54, %v1222_v5  ;;  %v1226_v53 = vpop.permute.xlu2 %1225  ;;  %v3995_v54 = vmul.f32 %v1109_v23, %v585_v61  ;;  %v3997_v33 = vmul.f32 %v1110_v7, %v586_v11  ;;  %v3032_v11 = vld [vmem:[%s6362_s0 + $0xa8] sm:$0xff]  ;;  %v3034_v7 = vld [vmem:[%s6362_s0 + $0xb0] sm:$0xff] }
 0x1ea   :  { %v3987_v26 = vsub.f32 %v3029_v41, %v1226_v53  ;;  %v265_v27 = vmin.f32 %v3797_v46, %v3582_v35  ;;  %v266_v53 = vmin.f32 %v3797_v46, %v3584_v36  ;;  %v3033_v41 = vld [vmem:[%s6362_s0 + $0x70] sm:$0xff]  ;;  %v3035_v46 = vld [vmem:[%s6362_s0 + $0xc0] sm:$0xff] }
 0x1eb   :  { %1365 = vrot.lane.b32.xlu0 %v3977_v49, %s3052_s20  ;;  %1381 = vrot.lane.b32.xlu2 %v3982_v30, %s3052_s20  ;;  %6697 = vst [vmem:[#allocation30_spill] sm:$0xff] %v3995_v54 }
 0x1ec   :  { %1385 = vrot.lane.b32.xlu1 %v3987_v26, %s3052_s20  ;;  %6698 = vst [vmem:[#allocation79_spill] sm:$0xff] %v3997_v33 }
 0x1f0   :  { %v1212_v5 = vpop.permute.xlu1 %1211  ;;  %v1228_v62 = vpop.permute.xlu0 %1227 }
 0x1f1   :  { %v4002_v48 = vsub.f32 %v3030_v39, %v1212_v5  ;;  %v4007_v32 = vsub.f32 %v3031_v28, %v1228_v62  ;;  %v1232_v34 = vpop.permute.xlu2 %1231  ;;  %v6701_v39 = vld [vmem:[#allocation32_spill] sm:$0xff] }
 0x1f2   :  { %v4012_v61 = vsub.f32 %v3032_v11, %v1232_v34  ;;  %v463_v28 = vmax.f32 %v6701_v39, %v3574_v60  ;;  %v464_v11 = vmax.f32 %v6701_v39, %v3576_v37 }
 0x1f3   :  { %6699 = vst [vmem:[#allocation56_spill] sm:$0xff] %v4007_v32  ;;  %1371 = vrot.lane.b32.xlu0 %v4002_v48, %s3052_s20  ;;  %1387 = vrot.lane.b32.xlu2 %v4007_v32, %s3052_s20  ;;  %v6744_v32 = vld [vmem:[#allocation29_spill] sm:$0xff] }
 0x1f4   :  { %1391 = vrot.lane.b32.xlu1 %v4012_v61, %s3052_s20  ;;  %v528_v33 = vsub.f32 %v266_v53, %v464_v11  ;;  %v3038_v53 = vld [vmem:[%s6362_s0 + $0xd8] sm:$0xff] }
 0x1f6   :  { %v592_v44 = vmax.f32 %v528_v33, 0.0 }
 0x1f8   :  { %v1218_v25 = vpop.permute.xlu1 %1217  ;;  %v1234_v52 = vpop.permute.xlu0 %1233 }
 0x1f9   :  { %v4027_v23 = vsub.f32 %v3033_v41, %v1218_v25  ;;  %v4032_v5 = vsub.f32 %v3034_v7, %v1234_v52  ;;  %v1238_v62 = vpop.permute.xlu2 %1237  ;;  %v6702_v25 = vld [vmem:[#allocation81_spill] sm:$0xff]  ;;  %v6703_v7 = vld [vmem:[#allocation59_spill] sm:$0xff] }
 0x1fa   :  { %v4039_v34 = vsub.f32 %v3035_v46, %v1238_v62  ;;  %v987_v41 = vmax.f32 %v6702_v25, %v3564_v42  ;;  %v988_v52 = vmax.f32 %v6702_v25, %v3566_v9  ;;  %v789_v62 = vmin.f32 %v6703_v7, %v3568_v59 }
 0x1fb   :  { %6700 = vst [vmem:[#allocation114_spill] sm:$0xff] %v4032_v5  ;;  %1377 = vrot.lane.b32.xlu0 %v4027_v23, %s3052_s20  ;;  %1393 = vrot.lane.b32.xlu2 %v4032_v5, %s3052_s20  ;;  %v790_v39 = vmin.f32 %v6703_v7, %v3570_v4  ;;  %v527_v46 = vsub.f32 %v265_v27, %v463_v28  ;;  %v6737_v5 = vld [vmem:[#allocation24_spill] sm:$0xff] }
 0x1fc   :  { %1397 = vrot.lane.b32.xlu1 %v4039_v34, %s3052_s20  ;;  %v1051_v54 = vsub.f32 %v789_v62, %v987_v41 }
 0x1fd   :  { %v1052_v57 = vsub.f32 %v790_v39, %v988_v52  ;;  %v591_v22 = vmax.f32 %v527_v46, 0.0  ;;  %v3040_v52 = vld [vmem:[%s6362_s0 + $0xe0] sm:$0xff] }
 0x1fe   :  { %v1115_v33 = vmax.f32 %v1051_v54, 0.0  ;;  %v3039_v54 = vld [vmem:[%s6362_s0 + $0xa0] sm:$0xff] }
 0x1ff   :  { %v1116_v11 = vmax.f32 %v1052_v57, 0.0 }
 0x200   :  { %v1224_v25 = vpop.permute.xlu1 %1223  ;;  %v1240_v16 = vpop.permute.xlu0 %1239 }
 0x201   :  { %v4060_v19 = vsub.f32 %v3036_v17, %v1224_v25  ;;  %v4065_v24 = vsub.f32 %v3037_v14, %v1240_v16  ;;  %v1244_v27 = vpop.permute.xlu2 %1243  ;;  %v4078_v14 = vmul.f32 %v1115_v33, %v591_v22  ;;  %v4080_v17 = vmul.f32 %v1116_v11, %v592_v44  ;;  %v3041_v44 = vld [vmem:[%s6362_s0 + $0xf0] sm:$0xff]  ;;  %v3042_v25 = vld [vmem:[%s6362_s0 + $0xb8] sm:$0xff] }
 0x202   :  { %v4070_v28 = vsub.f32 %v3038_v53, %v1244_v27  ;;  %v3043_v53 = vld [vmem:[%s6362_s0 + $0xf8] sm:$0xff]  ;;  %v271_v11 = vmin.f32 %v3815_v2, %v3582_v35 }
 0x203   :  { %6704 = vst [vmem:[#allocation32_spill] sm:$0xff] %v4065_v24  ;;  %1383 = vrot.lane.b32.xlu0 %v4060_v19, %s3052_s20  ;;  %1399 = vrot.lane.b32.xlu2 %v4065_v24, %s3052_s20 }
 0x204   :  { %1403 = vrot.lane.b32.xlu1 %v4070_v28, %s3052_s20  ;;  %6705 = vst [vmem:[#allocation81_spill] sm:$0xff] %v4078_v14 }
 0x205   :  { %6706 = vst [vmem:[#allocation59_spill] sm:$0xff] %v4080_v17 }
 0x208   :  { %v1230_v16 = vpop.permute.xlu1 %1229  ;;  %v1246_v41 = vpop.permute.xlu0 %1245 }
 0x209   :  { %v4085_v57 = vsub.f32 %v3039_v54, %v1230_v16  ;;  %v4090_v7 = vsub.f32 %v3040_v52, %v1246_v41  ;;  %v1250_v62 = vpop.permute.xlu2 %1249  ;;  %v272_v16 = vmin.f32 %v3815_v2, %v3584_v36  ;;  %v6712_v41 = vld [vmem:[#allocation35_spill] sm:$0xff]  ;;  %v6714_v2 = vld [vmem:[#allocation61_spill] sm:$0xff] }
 0x20a   :  { %v4095_v22 = vsub.f32 %v3041_v44, %v1250_v62  ;;  %v469_v54 = vmax.f32 %v6712_v41, %v3574_v60  ;;  %v470_v52 = vmax.f32 %v6712_v41, %v3576_v37  ;;  %v6713_v62 = vld [vmem:[#allocation84_spill] sm:$0xff] }
 0x20b   :  { %6707 = vst [vmem:[#allocation115_spill] sm:$0xff] %v4085_v57  ;;  %1389 = vrot.lane.b32.xlu0 %v4085_v57, %s3052_s20  ;;  %1405 = vrot.lane.b32.xlu2 %v4090_v7, %s3052_s20  ;;  %v993_v44 = vmax.f32 %v6713_v62, %v3564_v42  ;;  %v3044_v41 = vld [vmem:[%s6362_s0 + $0xd0] sm:$0xff] }
 0x20c   :  { %6708 = vst [vmem:[#allocation116_spill] sm:$0xff] %v4090_v7  ;;  %1409 = vrot.lane.b32.xlu1 %v4095_v22, %s3052_s20  ;;  %v534_v17 = vsub.f32 %v272_v16, %v470_v52 }
 0x20d   :  { %6709 = vst [vmem:[#allocation117_spill] sm:$0xff] %v4095_v22  ;;  %v6742_v22 = vld [vmem:[#allocation27_spill] sm:$0xff] }
 0x20e   :  { %v598_v63 = vmax.f32 %v534_v17, 0.0 }
 0x210   :  { %v1236_v39 = vpop.permute.xlu1 %1235  ;;  %v1252_v46 = vpop.permute.xlu0 %1251 }
 0x211   :  { %v4106_v27 = vsub.f32 %v3042_v25, %v1236_v39  ;;  %v4111_v33 = vsub.f32 %v3043_v53, %v1252_v46  ;;  %v994_v39 = vmax.f32 %v6713_v62, %v3566_v9  ;;  %v795_v46 = vmin.f32 %v6714_v2, %v3568_v59 }
 0x212   :  { %v796_v25 = vmin.f32 %v6714_v2, %v3570_v4  ;;  %v533_v53 = vsub.f32 %v271_v11, %v469_v54 }
 0x213   :  { %6710 = vst [vmem:[#allocation118_spill] sm:$0xff] %v4106_v27  ;;  %1395 = vrot.lane.b32.xlu0 %v4106_v27, %s3052_s20  ;;  %1411 = vrot.lane.b32.xlu2 %v4111_v33, %s3052_s20  ;;  %v1057_v14 = vsub.f32 %v795_v46, %v993_v44  ;;  %v6720_v46 = vld [vmem:[#allocation9_spill] sm:$0xff]  ;;  %v6739_v27 = vld [vmem:[#allocation26_spill] sm:$0xff] }
 0x214   :  { %6711 = vst [vmem:[#allocation119_spill] sm:$0xff] %v4111_v33  ;;  %v1058_v33 = vsub.f32 %v796_v25, %v994_v39  ;;  %v597_v56 = vmax.f32 %v533_v53, 0.0  ;;  %v222_v25 = vmin.f32 %v6720_v46, %v3584_v36  ;;  %v6726_v39 = vld [vmem:[#allocation15_spill] sm:$0xff]  ;;  %v6729_v53 = vld [vmem:[#allocation18_spill] sm:$0xff] }
 0x215   :  { %v1121_v62 = vmax.f32 %v1057_v14, 0.0 }
 0x216   :  { %v1122_v24 = vmax.f32 %v1058_v33, 0.0  ;;  %v6719_v33 = vld [vmem:[#allocation8_spill] sm:$0xff] }
 0x217   :  { %v4141_v16 = vmul.f32 %v1121_v62, %v597_v56  ;;  %v218_v62 = vmin.f32 %v6726_v39, %v3584_v36 }
 0x218   :  { %v1242_v7 = vpop.permute.xlu1 %1241  ;;  %v4143_v54 = vmul.f32 %v1122_v24, %v598_v63 }
 0x219   :  { %v4136_v58 = vsub.f32 %v3044_v41, %v1242_v7  ;;  %6716 = vst [vmem:[#allocation84_spill] sm:$0xff] %v4141_v16  ;;  %v3045_v7 = vld [vmem:[%s6362_s0 + $0xe8] sm:$0xff] }
 0x21a   :  { %6717 = vst [vmem:[#allocation61_spill] sm:$0xff] %v4143_v54  ;;  %v6722_v41 = vld [vmem:[#allocation11_spill] sm:$0xff]  ;;  %v6733_v54 = vld [vmem:[#allocation33_spill] sm:$0xff] }
 0x21b   :  { %6715 = vst [vmem:[#allocation35_spill] sm:$0xff] %v4136_v58  ;;  %1401 = vrot.lane.b32.xlu0 %v4136_v58, %s3052_s20  ;;  %v415_v58 = vmax.f32 %v6733_v54, %v3574_v60 }
 0x21d   :  { %v1352_v40 = vpop.permute.xlu2 %1351 }
 0x21e   :  { %v1446_v11 = vmul.f32 %v1352_v40, %v3843_v20 }
 0x220   :  { %v1248_v52 = vpop.permute.xlu1 %1247  ;;  %1492 = vperm.xlu1 %2891, %v1446_v11   ;;  %v217_v11 = vmin.f32 %v6726_v39, %v3582_v35  ;;  %v416_v39 = vmax.f32 %v6733_v54, %v3576_v37  ;;  %v6750_v54 = vld [vmem:[#allocation34_spill] sm:$0xff] }
 0x221   :  { %v4148_v44 = vsub.f32 %v3045_v7, %v1248_v52  ;;  %v6723_v52 = vld [vmem:[#allocation12_spill] sm:$0xff] }
 0x222   :  { %v4244_v7 = vsub.f32 %v217_v11, %v415_v58  ;;  %v6757_v8 = vmin.f32 %v6723_v52, %v3582_v35 }
 0x223   :  { %6718 = vst [vmem:[#allocation120_spill] sm:$0xff] %v4148_v44  ;;  %1407 = vrot.lane.b32.xlu0 %v4148_v44, %s3052_s20  ;;  %v6736_v44 = vld [vmem:[#allocation23_spill] sm:$0xff] }
 0x224   :  { %6740 = vst [vmem:[#allocation8_spill] sm:$0xff] %v4244_v7 }
 0x225   :  { %v4155_v20 = vpop.permute.xlu2 %1357 }
 0x22d   :  { %v4224_v31 = vpop.permute.xlu2 %1363 }
 0x22e   :  { %v1350_v14 = vpop.permute.xlu1 %1349 }
 0x22f   :  { %v1445_v17 = vmul.f32 %v1350_v14, %v3824_v29  ;;  %v221_v29 = vmin.f32 %v6720_v46, %v3582_v35  ;;  %v6732_v46 = vld [vmem:[#allocation21_spill] sm:$0xff] }
 0x231   :  { %1487 = vperm.xlu0 %2890, %v1445_v17   ;;  %v4246_v17 = vsub.f32 %v218_v62, %v416_v39  ;;  %v6746_v62 = vld [vmem:[#allocation39_spill] sm:$0xff]  ;;  %v6748_v39 = vld [vmem:[#allocation40_spill] sm:$0xff] }
 0x232   :  { %v425_v11 = vmax.f32 %v6746_v62, %v3574_v60 }
 0x233   :  { %6741 = vst [vmem:[#allocation9_spill] sm:$0xff] %v4246_v17 }
 0x236   :  { %v1356_v40 = vpop.permute.xlu1 %1355 }
 0x237   :  { %v1448_v56 = vmul.f32 %v1356_v40, %v3846_v3  ;;  %v6721_v3 = vld [vmem:[#allocation10_spill] sm:$0xff] }
 0x239   :  { %1502 = vperm.xlu1 %2891, %v1448_v56  }
 0x23e   :  { %v1362_v63 = vpop.permute.xlu1 %1361 }
 0x23f   :  { %v1451_v24 = vmul.f32 %v1362_v63, %v3882_v12  ;;  %v6725_v63 = vld [vmem:[#allocation14_spill] sm:$0xff]  ;;  %v6735_v12 = vld [vmem:[#allocation36_spill] sm:$0xff] }
 0x240   :  { %v419_v56 = vmax.f32 %v6735_v12, %v3574_v60  ;;  %v420_v16 = vmax.f32 %v6735_v12, %v3576_v37 }
 0x241   :  { %1517 = vperm.xlu1 %2891, %v1451_v24   ;;  %v6728_v24 = vld [vmem:[#allocation17_spill] sm:$0xff] }
 0x242   :  { %v4253_v57 = vsub.f32 %v221_v29, %v419_v56  ;;  %v4258_v58 = vsub.f32 %v222_v25, %v420_v16  ;;  %v6747_v29 = vld [vmem:[#allocation31_spill] sm:$0xff]  ;;  %v413_v16 = vmax.f32 %v6748_v39, %v3574_v60  ;;  %v6754_v56 = vmin.f32 %v6721_v3, %v3584_v36 }
 0x243   :  { %v1449_v25 = vmul.f32 %v4155_v20, %v3877_v47 }
 0x244   :  { %6743 = vst [vmem:[#allocation10_spill] sm:$0xff] %v4253_v57 }
 0x245   :  { %6745 = vst [vmem:[#allocation11_spill] sm:$0xff] %v4258_v58  ;;  %v4307_v58 = vsub.f32 %v6757_v8, %v413_v16  ;;  %v6763_v16 = vmin.f32 %v6722_v41, %v3584_v36 }
 0x246   :  { %v1368_v2 = vpop.permute.xlu1 %1367 }
 0x247   :  { %v1454_v40 = vmul.f32 %v1368_v2, %v3904_v55  ;;  %v6731_v2 = vld [vmem:[#allocation20_spill] sm:$0xff]  ;;  %v6734_v55 = vld [vmem:[#allocation22_spill] sm:$0xff]  ;;  %6758 = vst [vmem:[#allocation15_spill] sm:$0xff] %v4307_v58  ;;  %v6793_v58 = vmin.f32 %v6736_v44, %v3582_v35 }
 0x249   :  { %1532 = vperm.xlu1 %2891, %v1454_v40  }
 0x24d   :  { %v1354_v6 = vpop.permute.xlu0 %1353 }
 0x24e   :  { %v1447_v12 = vmul.f32 %v1354_v6, %v3919_v10  ;;  %v1374_v40 = vpop.permute.xlu1 %1373  ;;  %v426_v6 = vmax.f32 %v6746_v62, %v3576_v37  ;;  %v6749_v62 = vld [vmem:[#allocation42_spill] sm:$0xff] }
 0x24f   :  { %v1457_v15 = vmul.f32 %v1374_v40, %v3929_v13  ;;  %v431_v10 = vmax.f32 %v6749_v62, %v3574_v60  ;;  %v6751_v40 = vld [vmem:[#allocation37_spill] sm:$0xff] }
 0x250   :  { %1497 = vperm.xlu2 %2892, %v1447_v12   ;;  %v414_v12 = vmax.f32 %v6748_v39, %v3576_v37  ;;  %v6752_v39 = vmin.f32 %v6721_v3, %v3582_v35  ;;  %v4296_v7 = vsub.f32 %v6754_v56, %v426_v6  ;;  %v6759_v3 = vmin.f32 %v6723_v52, %v3584_v36  ;;  %v6765_v52 = vld [vmem:[#allocation43_spill] sm:$0xff] }
 0x251   :  { %1547 = vperm.xlu1 %2891, %v1457_v15   ;;  %v432_v15 = vmax.f32 %v6749_v62, %v3576_v37  ;;  %v6756_v62 = vld [vmem:[#allocation38_spill] sm:$0xff]  ;;  %v6761_v56 = vmin.f32 %v6722_v41, %v3582_v35 }
 0x252   :  { %v4291_v17 = vsub.f32 %v6752_v39, %v425_v11  ;;  %6755 = vst [vmem:[#allocation14_spill] sm:$0xff] %v4296_v7  ;;  %v4309_v11 = vpop.permute.xlu2 %1369  ;;  %v4314_v6 = vsub.f32 %v6759_v3, %v414_v12  ;;  %v417_v12 = vmax.f32 %v6765_v52, %v3574_v60  ;;  %v418_v3 = vmax.f32 %v6765_v52, %v3576_v37 }
 0x253   :  { %v4319_v14 = vsub.f32 %v6761_v56, %v431_v10  ;;  %v4327_v57 = vsub.f32 %v6763_v16, %v432_v15  ;;  %v6770_v16 = vmin.f32 %v6719_v33, %v3582_v35 }
 0x254   :  { %6753 = vst [vmem:[#allocation12_spill] sm:$0xff] %v4291_v17 }
 0x255   :  { %v1360_v39 = vpop.permute.xlu0 %1359  ;;  %6760 = vst [vmem:[#allocation17_spill] sm:$0xff] %v4314_v6 }
 0x256   :  { %6762 = vst [vmem:[#allocation18_spill] sm:$0xff] %v4319_v14  ;;  %v1450_v13 = vmul.f32 %v1360_v39, %v3944_v21  ;;  %v1380_v8 = vpop.permute.xlu1 %1379  ;;  %v6766_v21 = vld [vmem:[#allocation41_spill] sm:$0xff]  ;;  %v6773_v14 = vmin.f32 %v6725_v63, %v3582_v35 }
 0x257   :  { %6764 = vst [vmem:[#allocation20_spill] sm:$0xff] %v4327_v57  ;;  %v1460_v10 = vmul.f32 %v1380_v8, %v3956_v50  ;;  %v6767_v39 = vld [vmem:[#allocation45_spill] sm:$0xff]  ;;  %v6768_v8 = vld [vmem:[#allocation46_spill] sm:$0xff]  ;;  %v6774_v57 = vld [vmem:[#allocation48_spill] sm:$0xff] }
 0x258   :  { %v437_v41 = vmax.f32 %v6767_v39, %v3574_v60  ;;  %1512 = vperm.xlu0 %2890, %v1450_v13   ;;  %1507 = vperm.xlu2 %2892, %v1449_v25   ;;  %v438_v50 = vmax.f32 %v6767_v39, %v3576_v37  ;;  %v423_v52 = vmax.f32 %v6768_v8, %v3574_v60  ;;  %v6769_v25 = vld [vmem:[#allocation47_spill] sm:$0xff] }
 0x259   :  { %1562 = vperm.xlu1 %2891, %v1460_v10   ;;  %v424_v13 = vmax.f32 %v6768_v8, %v3576_v37  ;;  %v443_v15 = vmax.f32 %v6769_v25, %v3574_v60  ;;  %v4357_v39 = vsub.f32 %v6770_v16, %v417_v12  ;;  %v6771_v10 = vmin.f32 %v6719_v33, %v3584_v36  ;;  %v6772_v8 = vld [vmem:[#allocation44_spill] sm:$0xff] }
 0x25a   :  { %v444_v56 = vmax.f32 %v6769_v25, %v3576_v37  ;;  %v4371_v20 = vsub.f32 %v6773_v14, %v437_v41  ;;  %v429_v12 = vmax.f32 %v6774_v57, %v3574_v60  ;;  %v430_v16 = vmax.f32 %v6774_v57, %v3576_v37  ;;  %v6777_v14 = vld [vmem:[#allocation49_spill] sm:$0xff] }
 0x25b   :  { %v4362_v7 = vsub.f32 %v6771_v10, %v418_v3  ;;  %v6775_v3 = vmin.f32 %v6725_v63, %v3584_v36  ;;  %v6776_v10 = vmin.f32 %v6729_v53, %v3582_v35  ;;  %v449_v41 = vmax.f32 %v6777_v14, %v3574_v60 }
 0x25c   :  { %v6778_v57 = vmin.f32 %v6729_v53, %v3584_v36  ;;  %v6779_v33 = vmin.f32 %v6728_v24, %v3582_v35  ;;  %v6781_v53 = vmin.f32 %v6728_v24, %v3584_v36  ;;  %v450_v24 = vmax.f32 %v6777_v14, %v3576_v37 }
 0x25d   :  { %v4382_v25 = vsub.f32 %v6775_v3, %v438_v50  ;;  %v4387_v47 = vsub.f32 %v6776_v10, %v423_v52  ;;  %v1366_v17 = vpop.permute.xlu0 %1365  ;;  %v1452_v50 = vmul.f32 %v4224_v31, %v3899_v43  ;;  %v6783_v31 = vmin.f32 %v6732_v46, %v3582_v35 }
 0x25e   :  { %v4394_v6 = vsub.f32 %v6778_v57, %v424_v13  ;;  %v4399_v63 = vsub.f32 %v6779_v33, %v443_v15  ;;  %v1453_v52 = vmul.f32 %v1366_v17, %v3977_v49  ;;  %v1386_v3 = vpop.permute.xlu1 %1385  ;;  %v4409_v13 = vsub.f32 %v6781_v53, %v444_v56  ;;  %v4411_v57 = vpop.permute.xlu2 %1375 }
 0x25f   :  { %v1463_v15 = vmul.f32 %v1386_v3, %v3987_v26  ;;  %v4418_v49 = vsub.f32 %v6783_v31, %v429_v12  ;;  %v6784_v43 = vmin.f32 %v6732_v46, %v3584_v36  ;;  %v6785_v26 = vmin.f32 %v6731_v2, %v3582_v35  ;;  %v6787_v12 = vld [vmem:[#allocation50_spill] sm:$0xff] }
 0x260   :  { %6780 = vst [vmem:[#allocation21_spill] sm:$0xff] %v4399_v63  ;;  %1527 = vperm.xlu0 %2890, %v1453_v52   ;;  %1522 = vperm.xlu2 %2892, %v1452_v50   ;;  %v435_v53 = vmax.f32 %v6787_v12, %v3574_v60  ;;  %v436_v46 = vmax.f32 %v6787_v12, %v3576_v37  ;;  %v6788_v52 = vld [vmem:[#allocation51_spill] sm:$0xff] }
 0x261   :  { %6782 = vst [vmem:[#allocation33_spill] sm:$0xff] %v4409_v13  ;;  %v4423_v17 = vsub.f32 %v6784_v43, %v430_v16  ;;  %v4431_v3 = vsub.f32 %v6785_v26, %v449_v41  ;;  %1577 = vperm.xlu1 %2891, %v1463_v15   ;;  %v455_v31 = vmax.f32 %v6788_v52, %v3574_v60  ;;  %v6789_v26 = vld [vmem:[#allocation52_spill] sm:$0xff]  ;;  %v6792_v43 = vld [vmem:[#allocation54_spill] sm:$0xff] }
 0x262   :  { %v456_v41 = vmax.f32 %v6788_v52, %v3576_v37  ;;  %v441_v56 = vmax.f32 %v6789_v26, %v3574_v60  ;;  %v442_v15 = vmax.f32 %v6789_v26, %v3576_v37  ;;  %v6790_v50 = vmin.f32 %v6731_v2, %v3584_v36  ;;  %v6797_v52 = vld [vmem:[#allocation55_spill] sm:$0xff] }
 0x263   :  { %6786 = vst [vmem:[#allocation22_spill] sm:$0xff] %v4431_v3  ;;  %v461_v16 = vmax.f32 %v6792_v43, %v3574_v60  ;;  %v4462_v10 = vsub.f32 %v6793_v58, %v435_v53  ;;  %v6794_v26 = vmin.f32 %v6736_v44, %v3584_v36  ;;  %v462_v2 = vmax.f32 %v6792_v43, %v3576_v37 }
 0x264   :  { %v4454_v14 = vsub.f32 %v6790_v50, %v450_v24  ;;  %v6795_v50 = vmin.f32 %v6734_v55, %v3582_v35  ;;  %v447_v3 = vmax.f32 %v6797_v52, %v3574_v60  ;;  %v1455_v58 = vmul.f32 %v4309_v11, %v3924_v1 }
 0x265   :  { %v4467_v12 = vsub.f32 %v6794_v26, %v436_v46  ;;  %v1372_v24 = vpop.permute.xlu0 %1371  ;;  %v6798_v46 = vmin.f32 %v6734_v55, %v3584_v36  ;;  %v6800_v43 = vmin.f32 %v6738_v18, %v3582_v35  ;;  %v6802_v11 = vmin.f32 %v6737_v5, %v3582_v35 }
 0x266   :  { %6791 = vst [vmem:[#allocation36_spill] sm:$0xff] %v4454_v14  ;;  %v4474_v33 = vsub.f32 %v6795_v50, %v455_v31  ;;  %v1456_v53 = vmul.f32 %v1372_v24, %v4002_v48  ;;  %v1392_v44 = vpop.permute.xlu1 %1391  ;;  %v6801_v31 = vmin.f32 %v6738_v18, %v3584_v36  ;;  %v6805_v18 = vmin.f32 %v6737_v5, %v3584_v36 }
 0x267   :  { %v4484_v26 = vsub.f32 %v6798_v46, %v456_v41  ;;  %v4489_v13 = vsub.f32 %v6800_v43, %v441_v56  ;;  %v1466_v1 = vmul.f32 %v1392_v44, %v4012_v61  ;;  %v4501_v55 = vsub.f32 %v6802_v11, %v461_v16  ;;  %v6804_v56 = vld [vmem:[#allocation58_spill] sm:$0xff]  ;;  %v6807_v61 = vld [vmem:[#allocation57_spill] sm:$0xff] }
 0x268   :  { %6796 = vst [vmem:[#allocation23_spill] sm:$0xff] %v4474_v33  ;;  %v4494_v50 = vsub.f32 %v6801_v31, %v442_v15  ;;  %v448_v41 = vmax.f32 %v6797_v52, %v3576_v37  ;;  %v453_v24 = vmax.f32 %v6804_v56, %v3574_v60  ;;  %1542 = vperm.xlu0 %2890, %v1456_v53   ;;  %v1382_v52 = vpop.permute.xlu2 %1381  ;;  %v6855_v33 = vld [vmem:[#allocation13_spill] sm:$0xff] }
 0x269   :  { %6799 = vst [vmem:[#allocation24_spill] sm:$0xff] %v4484_v26  ;;  %1537 = vperm.xlu2 %2892, %v1455_v58   ;;  %v4510_v15 = vsub.f32 %v6805_v18, %v462_v2  ;;  %v467_v44 = vmax.f32 %v6807_v61, %v3574_v60  ;;  %v468_v16 = vmax.f32 %v6807_v61, %v3576_v37  ;;  %v6821_v18 = vld [vmem:[#allocation63_spill] sm:$0xff] }
 0x26a   :  { %6803 = vst [vmem:[#allocation25_spill] sm:$0xff] %v4501_v55  ;;  %v454_v46 = vmax.f32 %v6804_v56, %v3576_v37  ;;  %1592 = vperm.xlu1 %2891, %v1466_v1   ;;  %v6808_v5 = vmin.f32 %v6742_v22, %v3582_v35  ;;  %v6810_v56 = vld [vmem:[#allocation60_spill] sm:$0xff]  ;;  %v6811_v48 = vmin.f32 %v6742_v22, %v3584_v36 }
 0x26b   :  { %6806 = vst [vmem:[#allocation26_spill] sm:$0xff] %v4510_v15  ;;  %v459_v1 = vmax.f32 %v6810_v56, %v3574_v60  ;;  %v460_v31 = vmax.f32 %v6810_v56, %v3576_v37  ;;  %v6815_v11 = vmin.f32 %v6739_v27, %v3582_v35  ;;  %v6817_v22 = vmin.f32 %v6739_v27, %v3584_v36 }
 0x26c   :  { %v4524_v2 = vsub.f32 %v6808_v5, %v447_v3  ;;  %v4535_v53 = vsub.f32 %v6811_v48, %v448_v41  ;;  %v6813_v3 = vmin.f32 %v6744_v32, %v3582_v35  ;;  %v6819_v41 = vmin.f32 %v6744_v32, %v3584_v36 }
 0x26d   :  { %v4548_v58 = vsub.f32 %v6815_v11, %v467_v44  ;;  %v4553_v48 = vsub.f32 %v6817_v22, %v468_v16  ;;  %v465_v61 = vmax.f32 %v6821_v18, %v3574_v60  ;;  %v1458_v44 = vmul.f32 %v4411_v57, %v3949_v45 }
 0x26e   :  { %6809 = vst [vmem:[#allocation27_spill] sm:$0xff] %v4524_v2  ;;  %v4540_v5 = vsub.f32 %v6813_v3, %v453_v24  ;;  %v4558_v24 = vsub.f32 %v6819_v41, %v454_v46  ;;  %v1378_v3 = vpop.permute.xlu0 %1377  ;;  %v1398_v43 = vpop.permute.xlu1 %1397  ;;  %v6822_v27 = vmin.f32 %v6747_v29, %v3582_v35  ;;  %v466_v32 = vmax.f32 %v6821_v18, %v3576_v37  ;;  %v6824_v46 = vld [vmem:[#allocation64_spill] sm:$0xff]  ;;  %v6872_v2 = vld [vmem:[#allocation114_spill] sm:$0xff] }
 0x26f   :  { %6812 = vst [vmem:[#allocation29_spill] sm:$0xff] %v4535_v53  ;;  %v1459_v11 = vmul.f32 %v1378_v3, %v4027_v23  ;;  %v935_v22 = vmax.f32 %v6824_v46, %v3564_v42  ;;  %v1469_v41 = vmul.f32 %v1398_v43, %v4039_v34  ;;  %v6825_v23 = vmin.f32 %v6747_v29, %v3584_v36  ;;  %v6827_v3 = vld [vmem:[#allocation66_spill] sm:$0xff]  ;;  %v6828_v43 = vld [vmem:[#allocation67_spill] sm:$0xff] }
 0x270   :  { %6814 = vst [vmem:[#allocation39_spill] sm:$0xff] %v4540_v5  ;;  %v4569_v16 = vsub.f32 %v6822_v27, %v459_v1  ;;  %v936_v1 = vmax.f32 %v6824_v46, %v3566_v9  ;;  %v471_v27 = vmax.f32 %v6827_v3, %v3574_v60  ;;  %v472_v34 = vmax.f32 %v6827_v3, %v3576_v37  ;;  %v6829_v29 = vld [vmem:[#allocation62_spill] sm:$0xff]  ;;  %v6857_v5 = vld [vmem:[#allocation88_spill] sm:$0xff] }
 0x271   :  { %6816 = vst [vmem:[#allocation31_spill] sm:$0xff] %v4548_v58  ;;  %v4581_v57 = vsub.f32 %v6825_v23, %v460_v31  ;;  %1557 = vperm.xlu0 %2890, %v1459_v11   ;;  %1552 = vperm.xlu2 %2892, %v1458_v44   ;;  %v945_v45 = vmax.f32 %v6828_v43, %v3564_v42 }
 0x272   :  { %6818 = vst [vmem:[#allocation40_spill] sm:$0xff] %v4553_v48  ;;  %1607 = vperm.xlu1 %2891, %v1469_v41   ;;  %v741_v31 = vmin.f32 %v6829_v29, %v3568_v59  ;;  %v742_v46 = vmin.f32 %v6829_v29, %v3570_v4  ;;  %v6830_v44 = vmin.f32 %v6750_v54, %v3582_v35  ;;  %v6835_v29 = vld [vmem:[#allocation70_spill] sm:$0xff] }
 0x273   :  { %6820 = vst [vmem:[#allocation42_spill] sm:$0xff] %v4558_v24  ;;  %v946_v23 = vmax.f32 %v6828_v43, %v3566_v9  ;;  %v6832_v18 = vmin.f32 %v6750_v54, %v3584_v36  ;;  %v6834_v56 = vmin.f32 %v6756_v62, %v3568_v59  ;;  %v951_v58 = vmax.f32 %v6835_v29, %v3564_v42  ;;  %v6837_v54 = vld [vmem:[#allocation65_spill] sm:$0xff] }
 0x274   :  { %6823 = vst [vmem:[#allocation34_spill] sm:$0xff] %v4569_v16  ;;  %v4599_v11 = vsub.f32 %v6830_v44, %v465_v61  ;;  %v1388_v61 = vpop.permute.xlu2 %1387  ;;  %v6836_v43 = vmin.f32 %v6756_v62, %v3570_v4  ;;  %v6840_v44 = vmin.f32 %v6751_v40, %v3584_v36  ;;  %v6856_v24 = vmax.f32 %v6855_v33, %v3574_v60 }
 0x275   :  { %6826 = vst [vmem:[#allocation37_spill] sm:$0xff] %v4581_v57  ;;  %v4607_v41 = vsub.f32 %v6832_v18, %v466_v32  ;;  %v4612_v48 = vsub.f32 %v6834_v56, %v935_v22  ;;  %v952_v18 = vmax.f32 %v6835_v29, %v3566_v9  ;;  %v6838_v22 = vmin.f32 %v6751_v40, %v3582_v35  ;;  %v6854_v57 = vld [vmem:[#allocation117_spill] sm:$0xff] }
 0x276   :  { %6831 = vst [vmem:[#allocation38_spill] sm:$0xff] %v4599_v11  ;;  %v4620_v3 = vsub.f32 %v6836_v43, %v936_v1  ;;  %v4636_v62 = vsub.f32 %v6840_v44, %v472_v34  ;;  %v6842_v1 = vmin.f32 %v6766_v21, %v3568_v59  ;;  %v1384_v32 = vpop.permute.xlu0 %1383  ;;  %v6843_v56 = vmin.f32 %v6766_v21, %v3570_v4  ;;  %v1404_v40 = vpop.permute.xlu1 %1403  ;;  %v6849_v21 = vld [vmem:[#allocation72_spill] sm:$0xff] }
 0x277   :  { %6833 = vst [vmem:[#allocation43_spill] sm:$0xff] %v4607_v41  ;;  %v4631_v15 = vsub.f32 %v6838_v22, %v471_v27  ;;  %v1461_v27 = vmul.f32 %v1382_v52, %v3982_v30  ;;  %v1462_v22 = vmul.f32 %v1384_v32, %v4060_v19  ;;  %v1472_v29 = vmul.f32 %v1404_v40, %v4070_v28  ;;  %v6851_v44 = vld [vmem:[#allocation56_spill] sm:$0xff]  ;;  %v6852_v32 = vld [vmem:[#allocation115_spill] sm:$0xff] }
 0x278   :  { %6841 = vst [vmem:[#allocation45_spill] sm:$0xff] %v4636_v62  ;;  %v4641_v43 = vsub.f32 %v6842_v1, %v945_v45  ;;  %v4647_v55 = vsub.f32 %v6843_v56, %v946_v23  ;;  %v6844_v45 = vmin.f32 %v6772_v8, %v3568_v59  ;;  %v6845_v23 = vld [vmem:[#allocation68_spill] sm:$0xff]  ;;  %v6846_v19 = vmin.f32 %v6772_v8, %v3570_v4  ;;  %v6847_v8 = vld [vmem:[#allocation69_spill] sm:$0xff] }
 0x279   :  { %6839 = vst [vmem:[#allocation41_spill] sm:$0xff] %v4631_v15  ;;  %v939_v52 = vmax.f32 %v3601_v0, %v3564_v42  ;;  %1572 = vperm.xlu0 %2890, %v1462_v22   ;;  %1567 = vperm.xlu2 %2892, %v1461_v27   ;;  %v6848_v27 = vld [vmem:[#allocation71_spill] sm:$0xff]  ;;  %v940_v34 = vmax.f32 %v3601_v0, %v3566_v9  ;;  %v6850_v22 = vld [vmem:[#allocation73_spill] sm:$0xff]  ;;  %v6853_v0 = vld [vmem:[#allocation74_spill] sm:$0xff] }
 0x27a   :  { %v4656_v1 = vsub.f32 %v6844_v45, %v951_v58  ;;  %v4665_v30 = vsub.f32 %v6846_v19, %v952_v18  ;;  %1622 = vperm.xlu1 %2891, %v1472_v29   ;;  %v3046_v29 = vld [vmem:[%s6363_s1] sm:$0xff]  ;;  %v213_v58 = vmin.f32 %v3615_v38, %v3582_v35  ;;  %v214_v40 = vmin.f32 %v3615_v38, %v3584_v36 }
 0x27b   :  { %v1477_v45 = vrot.slane %v3046_v29, 6  ;;  %v1003_v19 = vsub.f32 %v741_v31, %v939_v52  ;;  %v943_v31 = vmax.f32 %v3617_v51, %v3564_v42  ;;  %v944_v52 = vmax.f32 %v3617_v51, %v3566_v9 }
 0x27c   :  { %v1394_v28 = vpop.permute.xlu2 %1393  ;;  %v1464_v62 = vmul.f32 %v1388_v61, %v6851_v44  ;;  %v1004_v18 = vsub.f32 %v742_v46, %v940_v34  ;;  %v475_v14 = vsub.f32 %v213_v58, %v6856_v24  ;;  %v223_v51 = vmin.f32 %v6857_v5, %v3582_v35  ;;  %v6858_v46 = vld [vmem:[#allocation75_spill] sm:$0xff]  ;;  %v6864_v58 = vld [vmem:[#allocation16_spill] sm:$0xff] }
 0x27d   :  { %v1479_v38 = vsub.f32 %v3046_v29, %v1477_v45  ;;  %v1067_v26 = vmax.f32 %v1003_v19, 0.0  ;;  %v224_v61 = vmin.f32 %v6857_v5, %v3584_v36  ;;  %v6859_v24 = vmax.f32 %v6855_v33, %v3576_v37  ;;  %v6863_v29 = vld [vmem:[#allocation89_spill] sm:$0xff] }
 0x27e   :  { %v1390_v56 = vpop.permute.xlu0 %1389  ;;  %v1410_v41 = vpop.permute.xlu1 %1409  ;;  %v6861_v5 = vmin.f32 %v6837_v54, %v3568_v59  ;;  %v1068_v19 = vmax.f32 %v1004_v18, 0.0  ;;  %v949_v33 = vmax.f32 %v6863_v29, %v3564_v42 }
 0x27f   :  { %v1465_v15 = vmul.f32 %v1390_v56, %v6852_v32  ;;  %v1475_v16 = vmul.f32 %v1410_v41, %v6854_v57  ;;  %v476_v34 = vsub.f32 %v214_v40, %v6859_v24  ;;  %v6860_v56 = vld [vmem:[#allocation77_spill] sm:$0xff]  ;;  %v6862_v32 = vmin.f32 %v6837_v54, %v3570_v4  ;;  %v6867_v57 = vld [vmem:[#allocation8_spill] sm:$0xff] }
 0x280   :  { %v2872_v40 = vrot.slane %v1479_v38, 9  ;;  %v539_v24 = vmax.f32 %v475_v14, 0.0  ;;  %v6868_v54 = vmax.f32 %v6867_v57, 0.0  ;;  %v6871_v14 = vld [vmem:[#allocation91_spill] sm:$0xff] }
 0x281   :  { %1587 = vperm.xlu0 %2890, %v1465_v15   ;;  %1582 = vperm.xlu2 %2892, %v1464_v62   ;;  %v1007_v62 = vsub.f32 %v6861_v5, %v943_v31  ;;  %v1008_v45 = vsub.f32 %v6862_v32, %v944_v52  ;;  %v6865_v15 = vmax.f32 %v6864_v58, %v3574_v60  ;;  %v540_v18 = vmax.f32 %v476_v34, 0.0  ;;  %v6870_v32 = vld [vmem:[#allocation90_spill] sm:$0xff] }
 0x282   :  { %1637 = vperm.xlu1 %2891, %v1475_v16   ;;  %v950_v16 = vmax.f32 %v6863_v29, %v3566_v9  ;;  %v6866_v31 = vmax.f32 %v6864_v58, %v3576_v37  ;;  %v4749_v52 = vmul.f32 %v1067_v26, %v6868_v54  ;;  %v937_v44 = vmax.f32 %v6870_v32, %v3564_v42 }
 0x283   :  { %v485_v41 = vsub.f32 %v223_v51, %v6865_v15  ;;  %v938_v29 = vmax.f32 %v6870_v32, %v3566_v9  ;;  %v229_v11 = vmin.f32 %v6871_v14, %v3582_v35  ;;  %v1071_v51 = vmax.f32 %v1007_v62, 0.0  ;;  %v6876_v35 = vld [vmem:[#allocation9_spill] sm:$0xff] }
 0x284   :  { %v486_v5 = vsub.f32 %v224_v61, %v6866_v31  ;;  %6869 = vst [vmem:[#allocation46_spill] sm:$0xff] %v4749_v52  ;;  %v1072_v15 = vmax.f32 %v1008_v45, 0.0  ;;  %v1467_v58 = vmul.f32 %v1394_v28, %v6872_v2  ;;  %v6873_v61 = vld [vmem:[#allocation118_spill] sm:$0xff]  ;;  %v6874_v26 = vmin.f32 %v6845_v23, %v3568_v59  ;;  %v1400_v32 = vpop.permute.xlu2 %1399  ;;  %v6878_v28 = vld [vmem:[#allocation92_spill] sm:$0xff] }
 0x285   :  { %v6875_v34 = vmin.f32 %v6845_v23, %v3570_v4  ;;  %v1484_v52 = vmul.f32 %v2872_v40, %v1479_v38  ;;  %v6877_v63 = vmax.f32 %v6876_v35, 0.0  ;;  %v549_v45 = vmax.f32 %v485_v41, 0.0 }
 0x286   :  { %v1396_v53 = vpop.permute.xlu0 %1395  ;;  %v4762_v57 = vsub.f32 %v6874_v26, %v949_v33  ;;  %v550_v2 = vmax.f32 %v486_v5, 0.0  ;;  %v955_v33 = vmax.f32 %v6878_v28, %v3564_v42  ;;  %v6879_v23 = vmin.f32 %v6847_v8, %v3568_v59 }
 0x287   :  { %v1468_v31 = vmul.f32 %v1396_v53, %v6873_v61  ;;  %v4767_v54 = vsub.f32 %v6875_v34, %v950_v16  ;;  %v4771_v62 = vmul.f32 %v1068_v19, %v6877_v63  ;;  %v230_v53 = vmin.f32 %v6871_v14, %v3584_v36  ;;  %v6881_v63 = vld [vmem:[#allocation19_spill] sm:$0xff] }
 0x288   :  { %v1001_v16 = vsub.f32 %v6879_v23, %v937_v44  ;;  %v6880_v38 = vmin.f32 %v6847_v8, %v3570_v4  ;;  %v6882_v41 = vmax.f32 %v6881_v63, %v3574_v60  ;;  %v956_v36 = vmax.f32 %v6878_v28, %v3566_v9  ;;  %v6885_v44 = vld [vmem:[#allocation10_spill] sm:$0xff]  ;;  %v6887_v8 = vld [vmem:[#allocation11_spill] sm:$0xff] }
 0x289   :  { %1602 = vperm.xlu0 %2890, %v1468_v31   ;;  %1597 = vperm.xlu2 %2892, %v1467_v58   ;;  %v6883_v5 = vmax.f32 %v4612_v48, 0.0  ;;  %v6884_v58 = vmax.f32 %v4620_v3, 0.0  ;;  %v6886_v31 = vmax.f32 %v6885_v44, 0.0  ;;  %v1077_v60 = vmax.f32 %v4762_v57, 0.0 }
 0x28a   :  { %v1002_v40 = vsub.f32 %v6880_v38, %v938_v29  ;;  %v491_v19 = vsub.f32 %v229_v11, %v6882_v41  ;;  %v6888_v29 = vmax.f32 %v6887_v8, 0.0  ;;  %v1646_v35 = vperm.slane %v1484_v52, 2  ;;  %v6898_v8 = vld [vmem:[#allocation94_spill] sm:$0xff] }
 0x28b   :  { %v4790_v14 = vmul.f32 %v6883_v5, %v539_v24  ;;  %v4794_v61 = vmul.f32 %v6884_v58, %v540_v18  ;;  %v4798_v26 = vmul.f32 %v1071_v51, %v6886_v31  ;;  %v1647_v48 = vperm.slane %v1484_v52, 6 }
 0x28c   :  { %v4802_v34 = vmul.f32 %v1072_v15, %v6888_v29  ;;  %v6889_v24 = vmax.f32 %v6881_v63, %v3576_v37  ;;  %v6890_v18 = vmin.f32 %v6848_v27, %v3568_v59  ;;  %v6891_v51 = vmax.f32 %v4641_v43, 0.0 }
 0x28d   :  { %v6892_v15 = vmax.f32 %v4647_v55, 0.0  ;;  %v1065_v41 = vmax.f32 %v1001_v16, 0.0  ;;  %v1066_v5 = vmax.f32 %v1002_v40, 0.0  ;;  %v555_v52 = vmax.f32 %v491_v19, 0.0  ;;  %v6896_v55 = vld [vmem:[#allocation35_spill] sm:$0xff]  ;;  %v6897_v16 = vld [vmem:[#allocation97_spill] sm:$0xff] }
 0x28e   :  { %v492_v3 = vsub.f32 %v230_v53, %v6889_v24  ;;  %v4812_v28 = vsub.f32 %v6890_v18, %v955_v33  ;;  %v4816_v23 = vmul.f32 %v6891_v51, %v549_v45  ;;  %v6893_v37 = vmin.f32 %v6848_v27, %v3570_v4  ;;  %v1402_v63 = vpop.permute.xlu0 %1401  ;;  %v6894_v33 = vld [vmem:[#allocation93_spill] sm:$0xff]  ;;  %v6895_v45 = vld [vmem:[#allocation32_spill] sm:$0xff] }
 0x28f   :  { %v4820_v38 = vmul.f32 %v6892_v15, %v550_v2  ;;  %v941_v58 = vmax.f32 %v6894_v33, %v3564_v42  ;;  %v942_v43 = vmax.f32 %v6894_v33, %v3566_v9  ;;  %v1470_v44 = vmul.f32 %v1400_v32, %v6895_v45  ;;  %v6899_v32 = vld [vmem:[#allocation100_spill] sm:$0xff] }
 0x290   :  { %v4825_v53 = vsub.f32 %v6893_v37, %v956_v36  ;;  %v1471_v2 = vmul.f32 %v1402_v63, %v6896_v55  ;;  %v947_v40 = vmax.f32 %v6897_v16, %v3564_v42  ;;  %v948_v19 = vmax.f32 %v6897_v16, %v3566_v9  ;;  %v6904_v16 = vld [vmem:[#allocation17_spill] sm:$0xff] }
 0x291   :  { %v4837_v27 = vperm.slane %v1646_v35, 2  ;;  %v4839_v36 = vperm.slane %v1647_v48, 2  ;;  %v556_v31 = vmax.f32 %v492_v3, 0.0  ;;  %v961_v29 = vmax.f32 %v6898_v8, %v3564_v42  ;;  %1612 = vperm.xlu2 %2892, %v1470_v44   ;;  %v1406_v48 = vpop.permute.xlu2 %1405  ;;  %v6900_v3 = vld [vmem:[#allocation15_spill] sm:$0xff] }
 0x292   :  { %v962_v24 = vmax.f32 %v6898_v8, %v3566_v9  ;;  %v953_v18 = vmax.f32 %v6899_v32, %v3564_v42  ;;  %1617 = vperm.xlu0 %2890, %v1471_v2   ;;  %v954_v35 = vmax.f32 %v6899_v32, %v3566_v9  ;;  %v6901_v37 = vmax.f32 %v6900_v3, 0.0  ;;  %v1493_v2 = vpop.permute.xlu1 %1492 }
 0x293   :  { %v6902_v33 = vmin.f32 %v6849_v21, %v3568_v59  ;;  %v6903_v55 = vmin.f32 %v6849_v21, %v3570_v4  ;;  %v6905_v8 = vmax.f32 %v6904_v16, 0.0  ;;  %v6906_v32 = vmax.f32 %v4656_v1, 0.0 }
 0x294   :  { %v4853_v63 = vmul.f32 %v1065_v41, %v6901_v37  ;;  %v6907_v41 = vmin.f32 %v6853_v0, %v3568_v59  ;;  %v1654_v21 = vadd.f32 %v4837_v27, %v1493_v2  ;;  %v6910_v1 = vmin.f32 %v6850_v22, %v3570_v4 }
 0x295   :  { %v1005_v45 = vsub.f32 %v6902_v33, %v941_v58  ;;  %v1006_v44 = vsub.f32 %v6903_v55, %v942_v43  ;;  %v4863_v15 = vmul.f32 %v1066_v5, %v6905_v8  ;;  %v4867_v51 = vmul.f32 %v6906_v32, %v555_v52 }
 0x296   :  { %v1011_v3 = vsub.f32 %v6907_v41, %v947_v40  ;;  %v6908_v58 = vmin.f32 %v6853_v0, %v3570_v4  ;;  %v1655_v43 = vadd.f32 %v4839_v36, %v1493_v2  ;;  %v6909_v5 = vmin.f32 %v6850_v22, %v3568_v59  ;;  %v6912_v0 = vld [vmem:[#allocation103_spill] sm:$0xff] }
 0x297   :  { %v4885_v52 = vsub.f32 %v6910_v1, %v962_v24  ;;  %v6911_v40 = vmin.f32 %v6858_v46, %v3568_v59  ;;  %v6913_v2 = vmin.f32 %v6858_v46, %v3570_v4  ;;  %v1718_v8 = vsub.f32 %v1654_v21, %v4790_v14  ;;  %v1408_v24 = vpop.permute.xlu0 %1407 }
 0x298   :  { %v1012_v37 = vsub.f32 %v6908_v58, %v948_v19  ;;  %v4880_v33 = vsub.f32 %v6909_v5, %v961_v29  ;;  %v959_v19 = vmax.f32 %v6912_v0, %v3564_v42  ;;  %v960_v29 = vmax.f32 %v6912_v0, %v3566_v9  ;;  %v6914_v58 = vld [vmem:[#allocation116_spill] sm:$0xff] }
 0x299   :  { %v1017_v55 = vsub.f32 %v6911_v40, %v953_v18  ;;  %v1018_v16 = vsub.f32 %v6913_v2, %v954_v35  ;;  %v1719_v22 = vsub.f32 %v1655_v43, %v4794_v61  ;;  %v1069_v32 = vmax.f32 %v1005_v45, 0.0  ;;  %v6915_v18 = vld [vmem:[#allocation120_spill] sm:$0xff]  ;;  %v6958_v2 = vld [vmem:[#allocation85_spill] sm:$0xff] }
 0x29a   :  { %v1070_v41 = vmax.f32 %v1006_v44, 0.0  ;;  %v1473_v5 = vmul.f32 %v1406_v48, %v6914_v58  ;;  %v1474_v1 = vmul.f32 %v1408_v24, %v6915_v18  ;;  %v1075_v40 = vmax.f32 %v1011_v3, 0.0  ;;  %v6930_v18 = vld [vmem:[#allocation14_spill] sm:$0xff] }
 0x29b   :  { %v1076_v42 = vmax.f32 %v1012_v37, 0.0  ;;  %v4901_v11 = vmax.f32 %v1718_v8, 1e-08  ;;  %v4903_v46 = vmax.f32 %v1719_v22, 1e-08  ;;  %v1089_v35 = vmax.f32 %v4880_v33, 0.0 }
 0x29c   :  { %v1090_v9 = vmax.f32 %v4885_v52, 0.0  ;;  %v6916_v21 = vmin.f32 %v6860_v56, %v3568_v59  ;;  %1632 = vperm.xlu0 %2890, %v1474_v1   ;;  %1627 = vperm.xlu2 %2892, %v1473_v5   ;;  %v6917_v48 = vmax.f32 %v4665_v30, 0.0  ;;  %v1081_v44 = vmax.f32 %v1017_v55, 0.0  ;;  %v6919_v33 = vld [vmem:[#allocation98_spill] sm:$0xff]  ;;  %v6922_v55 = vld [vmem:[#allocation99_spill] sm:$0xff]  ;;  %v6925_v22 = vld [vmem:[#allocation12_spill] sm:$0xff] }
 0x29d   :  { %v1082_v3 = vmax.f32 %v1018_v16, 0.0  ;;  %v6918_v37 = vmin.f32 %v6860_v56, %v3570_v4  ;;  %2893 = vrcp.f32 %v4901_v11  ;;  %v6920_v59 = vmax.f32 %v4357_v39, 0.0  ;;  %v1412_v16 = vpop.permute.xlu2 %1411  ;;  %v6951_v58 = vld [vmem:[#allocation6_spill] sm:$0xff] }
 0x29e   :  { %v1023_v43 = vsub.f32 %v6916_v21, %v959_v19  ;;  %v4912_v45 = vmul.f32 %v6917_v48, %v556_v31  ;;  %2895 = vrcp.f32 %v4903_v46  ;;  %v6921_v30 = vmax.f32 %v4362_v7, 0.0  ;;  %v6928_v7 = vld [vmem:[#allocation101_spill] sm:$0xff] }
 0x29f   :  { %v1024_v0 = vsub.f32 %v6918_v37, %v960_v29  ;;  %v4922_v19 = vmul.f32 %v1069_v32, %v6920_v59  ;;  %v6923_v4 = vmax.f32 %v4387_v47, 0.0  ;;  %v6924_v29 = vmax.f32 %v4394_v6, 0.0  ;;  %v6937_v59 = vld [vmem:[#allocation107_spill] sm:$0xff] }
 0x2a0   :  { %v4926_v31 = vmul.f32 %v1070_v41, %v6921_v30  ;;  %v6926_v24 = vmax.f32 %v6925_v22, 0.0  ;;  %v6929_v41 = vld [vmem:[#allocation102_spill] sm:$0xff]  ;;  %v1087_v5 = vmax.f32 %v1023_v43, 0.0  ;;  %v6931_v1 = vmax.f32 %v6930_v18, 0.0  ;;  %v6938_v43 = vld [vmem:[#allocation108_spill] sm:$0xff]  ;;  %v6959_v32 = vld [vmem:[#allocation3_spill] sm:$0xff] }
 0x2a1   :  { %v4931_v56 = vmul.f32 %v1075_v40, %v6923_v4  ;;  %v4935_v8 = vmul.f32 %v1076_v42, %v6924_v29  ;;  %v6932_v47 = vmax.f32 %v4767_v54, 0.0  ;;  %v1088_v6 = vmax.f32 %v1024_v0, 0.0  ;;  %v6934_v42 = vld [vmem:[#allocation106_spill] sm:$0xff]  ;;  %v6939_v29 = vld [vmem:[#allocation109_spill] sm:$0xff]  ;;  %v6940_v54 = vld [vmem:[#allocation119_spill] sm:$0xff] }
 0x2a2   :  { %v4941_v39 = vmul.f32 %v1077_v60, %v6926_v24  ;;  %v6935_v48 = vmax.f32 %v4418_v49, 0.0  ;;  %v6936_v57 = vmax.f32 %v4423_v17, 0.0  ;;  %v1093_v4 = vmax.f32 %v6938_v43, 0.0  ;;  %v6941_v0 = vld [vmem:[#allocation110_spill] sm:$0xff] }
 0x2a3   :  { %v4949_v40 = vmul.f32 %v6932_v47, %v6931_v1  ;;  %v1094_v22 = vmax.f32 %v6939_v29, 0.0  ;;  %v1476_v24 = vmul.f32 %v1412_v16, %v6940_v54  ;;  %v2894_v18 = vpop.eup %2893  ;;  %v6942_v47 = vld [vmem:[#allocation111_spill] sm:$0xff]  ;;  %v6943_v49 = vld [vmem:[#allocation18_spill] sm:$0xff]  ;;  %v6949_v30 = vmax.f32 %v4825_v53, 0.0  ;;  %v6952_v54 = vld [vmem:[#allocation76_spill] sm:$0xff] }
 0x2a4   :  { %6927 = vst [vmem:[#allocation47_spill] sm:$0xff] %v4941_v39  ;;  %v4954_v37 = vmul.f32 %v1081_v44, %v6935_v48  ;;  %v4958_v60 = vmul.f32 %v1082_v3, %v6936_v57  ;;  %v6944_v44 = vmax.f32 %v6943_v49, 0.0  ;;  %v6945_v48 = vmax.f32 %v4812_v28, 0.0  ;;  %v6947_v3 = vld [vmem:[#allocation20_spill] sm:$0xff]  ;;  %v2896_v29 = vpop.eup %2895 }
 0x2a5   :  { %6933 = vst [vmem:[#allocation44_spill] sm:$0xff] %v4949_v40  ;;  %v6948_v57 = vmax.f32 %v6947_v3, 0.0  ;;  %v1875_v1 = vmul.f32 %v2894_v18, %v4901_v11  ;;  %1642 = vperm.xlu2 %2892, %v1476_v24   ;;  %v6953_v49 = vmax.f32 %v4462_v10, 0.0  ;;  %v6954_v28 = vld [vmem:[#allocation112_spill] sm:$0xff]  ;;  %v1890_v53 = vmul.f32 %v2896_v29, %v4903_v46 }
 0x2a6   :  { %v4970_v17 = vmul.f32 %v6945_v48, %v6944_v44  ;;  %v6955_v48 = vld [vmem:[#allocation113_spill] sm:$0xff]  ;;  %v6960_v24 = vmax.f32 %v4371_v20, 0.0  ;;  %v1900_v44 = vand.u32 2147483648, %v4903_v46  ;;  %vm1880_vm0 = vweird.f32 %v2894_v18 }
 0x2a7   :  { %v4976_v43 = vmul.f32 %v6949_v30, %v6948_v57  ;;  %v4983_v21 = vmul.f32 %v1087_v5, %v6953_v49  ;;  %v6956_v30 = vmax.f32 %v4467_v12, 0.0  ;;  %v1883_v5 = vand.u32 2147483647, %v4901_v11 }
 0x2a8   :  { %6946 = vst [vmem:[#allocation48_spill] sm:$0xff] %v4970_v17  ;;  %v4996_v10 = vmul.f32 %v1089_v35, %v6960_v24  ;;  %v1885_v49 = vand.u32 2147483648, %v4901_v11  ;;  %v1891_v3 = vsub.f32 1.0, %v1890_v53  ;;  %v1488_v17 = vpop.permute.xlu0 %1487  ;;  %vm1895_vm1 = vweird.f32 %v2896_v29  ;;  %v6964_v53 = vld [vmem:[#allocation86_spill] sm:$0xff] }
 0x2a9   :  { %6950 = vst [vmem:[#allocation49_spill] sm:$0xff] %v4976_v43  ;;  %v4990_v57 = vmul.f32 %v1088_v6, %v6956_v30  ;;  %v1876_v43 = vsub.f32 1.0, %v1875_v1  ;;  %v1652_v6 = vadd.f32 %v4837_v27, %v1488_v17  ;;  %v1653_v30 = vadd.f32 %v4839_v36, %v1488_v17 }
 0x2aa   :  { %6961 = vst [vmem:[#allocation51_spill] sm:$0xff] %v4996_v10  ;;  %v1892_v52 = vmul.f32 %v2896_v29, %v1891_v3  ;;  %v1898_v20 = vand.u32 2147483647, %v4903_v46  ;;  %v6962_v35 = vmax.f32 %v4382_v25, 0.0  ;;  %vm1879_vm2 = vweird.f32 %v4901_v11  ;;  %v6965_v10 = vld [vmem:[#allocation87_spill] sm:$0xff] }
 0x2ab   :  { %6957 = vst [vmem:[#allocation50_spill] sm:$0xff] %v4990_v57  ;;  %v1877_v12 = vmul.f32 %v2894_v18, %v1876_v43  ;;  %v1716_v16 = vsub.f32 %v1652_v6, %v6964_v53  ;;  %v1717_v43 = vsub.f32 %v1653_v30, %v6965_v10  ;;  %vm1881_vm3 = vmor %vm1879_vm2, %vm1880_vm0  ;;  %vm1884_vm4 = vcmp.eq.f32.partialorder %v1883_v5, 8.507059e+37  ;;  %v6967_v6 = vld [vmem:[#allocation28_spill] sm:$0xff] }
 0x2ac   :  { %v5006_v1 = vmul.f32 %v1090_v9, %v6962_v35  ;;  %v1886_v40 = vor.u32 1.1754944e-38, %v1885_v49  ;;  %v1893_v39 = vadd.f32 %v2896_v29, %v1892_v52  ;;  %vm1894_vm5 = vweird.f32 %v4903_v46  ;;  %v6966_v9 = vld [vmem:[#allocation4_spill] sm:$0xff]  ;;  %v1498_v46 = vpop.permute.xlu2 %1497 }
 0x2ad   :  { %v1878_v24 = vadd.f32 %v2894_v18, %v1877_v12  ;;  %vm1896_vm6 = vmor %vm1894_vm5, %vm1895_vm1  ;;  %v1901_v3 = vor.u32 1.1754944e-38, %v1900_v44  ;;  %v5012_v57 = vmax.f32 %v1716_v16, 1e-08  ;;  %v5014_v25 = vmax.f32 %v1717_v43, 1e-08  ;;  %v6972_v43 = vld [vmem:[#allocation21_spill] sm:$0xff] }
 0x2ae   :  { %6963 = vst [vmem:[#allocation52_spill] sm:$0xff] %v5006_v1  ;;  %v1897_v35 = vsel %vm1896_vm6, %v2896_v29, %v1893_v39  ;;  %vm1899_vm7 = vcmp.eq.f32.partialorder %v1898_v20, 8.507059e+37  ;;  %v6968_v16 = vmax.f32 %v4489_v13, 0.0  ;;  %v6969_v39 = vmax.f32 %v4494_v50, 0.0  ;;  %v6970_v29 = vld [vmem:[#allocation2_spill] sm:$0xff] }
 0x2af   :  { %v1882_v17 = vsel %vm1881_vm3, %v2894_v18, %v1878_v24  ;;  %v1902_v49 = vsel %vm1899_vm7, %v1901_v3, %v1897_v35  ;;  %2897 = vrcp.f32 %v5012_v57  ;;  %v1503_v18 = vpop.permute.xlu1 %1502  ;;  %v6974_v13 = vmax.f32 %v6919_v33, 0.0  ;;  %v6976_v3 = vld [vmem:[#allocation27_spill] sm:$0xff] }
 0x2b0   :  { %v1887_v11 = vsel %vm1884_vm4, %v1886_v40, %v1882_v17  ;;  %v1903_v52 = vmul.f32 %v1902_v49, %v4794_v61  ;;  %2899 = vrcp.f32 %v5014_v25  ;;  %v5024_v44 = vmul.f32 %v1093_v4, %v6968_v16  ;;  %v6979_v49 = vld [vmem:[#allocation33_spill] sm:$0xff] }
 0x2b1   :  { %v1888_v5 = vmul.f32 %v1887_v11, %v4790_v14  ;;  %v5028_v40 = vmul.f32 %v1094_v22, %v6969_v39  ;;  %v1658_v61 = vadd.f32 %v4837_v27, %v1503_v18  ;;  %v6973_v17 = vmax.f32 %v6972_v43, 0.0  ;;  %v6983_v43 = vld [vmem:[#allocation46_spill] sm:$0xff] }
 0x2b2   :  { %2807 = vst [vmem:[%s6364_s2 + $0x18] sm:$0xff] %v1903_v52  ;;  %v1659_v50 = vadd.f32 %v4839_v36, %v1503_v18  ;;  %v1656_v22 = vadd.f32 %v4837_v27, %v1498_v46  ;;  %v6977_v11 = vmax.f32 %v6976_v3, 0.0  ;;  %v6978_v35 = vmax.f32 %v6951_v58, 0.0  ;;  %v6987_v3 = vld [vmem:[#allocation22_spill] sm:$0xff] }
 0x2b3   :  { %2806 = vst [vmem:[%s6364_s2 + $0x10] sm:$0xff] %v1888_v5  ;;  %v5040_v4 = vmul.f32 %v6974_v13, %v6973_v17  ;;  %v6980_v16 = vmax.f32 %v6979_v49, 0.0  ;;  %v6981_v33 = vmax.f32 %v6922_v55, 0.0  ;;  %v1722_v17 = vsub.f32 %v1658_v61, %v6983_v43  ;;  %v6984_v13 = vld [vmem:[#allocation29_spill] sm:$0xff] }
 0x2b4   :  { %v5051_v5 = vmul.f32 %v6978_v35, %v6977_v11  ;;  %v1657_v52 = vadd.f32 %v4839_v36, %v1498_v46  ;;  %v6985_v18 = vmax.f32 %v6984_v13, 0.0  ;;  %v6986_v24 = vmax.f32 %v6952_v54, 0.0  ;;  %v6995_v13 = vld [vmem:[#allocation36_spill] sm:$0xff] }
 0x2b5   :  { %6975 = vst [vmem:[#allocation54_spill] sm:$0xff] %v5040_v4  ;;  %v5057_v39 = vmul.f32 %v6981_v33, %v6980_v16  ;;  %v6988_v58 = vmax.f32 %v6987_v3, 0.0  ;;  %v6989_v11 = vmax.f32 %v6928_v7, 0.0  ;;  %v1723_v55 = vsub.f32 %v1659_v50, %v4771_v62  ;;  %v6991_v16 = vld [vmem:[#allocation39_spill] sm:$0xff]  ;;  %v2898_v3 = vpop.eup %2897 }
 0x2b6   :  { %v5065_v20 = vmul.f32 %v6986_v24, %v6985_v18  ;;  %v1720_v49 = vsub.f32 %v1656_v22, %v4853_v63  ;;  %v6992_v61 = vmax.f32 %v6991_v16, 0.0  ;;  %v6993_v46 = vmax.f32 %v6954_v28, 0.0  ;;  %v6999_v22 = vld [vmem:[#allocation42_spill] sm:$0xff]  ;;  %v2900_v16 = vpop.eup %2899 }
 0x2b7   :  { %6982 = vst [vmem:[#allocation55_spill] sm:$0xff] %v5057_v39  ;;  %v5071_v35 = vmul.f32 %v6989_v11, %v6988_v58  ;;  %v6996_v54 = vmax.f32 %v6995_v13, 0.0  ;;  %v6997_v24 = vmax.f32 %v6929_v41, 0.0  ;;  %vm1849_vm8 = vweird.f32 %v5012_v57 }
 0x2b8   :  { %v5079_v33 = vmul.f32 %v6993_v46, %v6992_v61  ;;  %v1853_v7 = vand.u32 2147483647, %v5012_v57  ;;  %v5089_v50 = vmax.f32 %v1722_v17, 1e-08  ;;  %v7000_v58 = vmax.f32 %v6999_v22, 0.0 }
 0x2b9   :  { %6990 = vst [vmem:[#allocation58_spill] sm:$0xff] %v5071_v35  ;;  %v5085_v18 = vmul.f32 %v6997_v24, %v6996_v54  ;;  %v7001_v11 = vmax.f32 %v6955_v48, 0.0  ;;  %v1845_v61 = vmul.f32 %v2898_v3, %v5012_v57  ;;  %v1855_v41 = vand.u32 2147483648, %v5012_v57 }
 0x2ba   :  { %6994 = vst [vmem:[#allocation57_spill] sm:$0xff] %v5079_v33  ;;  %v5099_v46 = vmax.f32 %v1723_v55, 1e-08  ;;  %v1721_v13 = vsub.f32 %v1657_v52, %v4863_v15  ;;  %v1860_v54 = vmul.f32 %v2900_v16, %v5014_v25  ;;  %vm1864_vm9 = vweird.f32 %v5014_v25 }
 0x2bb   :  { %6998 = vst [vmem:[#allocation60_spill] sm:$0xff] %v5085_v18  ;;  %v5095_v28 = vmul.f32 %v7001_v11, %v7000_v58  ;;  %2901 = vrcp.f32 %v5089_v50  ;;  %v5105_v17 = vmax.f32 %v1720_v49, 1e-08  ;;  %v1846_v48 = vsub.f32 1.0, %v1845_v61 }
 0x2bc   :  { %v1868_v24 = vand.u32 2147483647, %v5014_v25  ;;  %v1870_v22 = vand.u32 2147483648, %v5014_v25  ;;  %2903 = vrcp.f32 %v5099_v46  ;;  %vm1850_vm10 = vweird.f32 %v2898_v3 }
 0x2bd   :  { %7002 = vst [vmem:[#allocation63_spill] sm:$0xff] %v5095_v28  ;;  %vm5110_vm11 = vcmp.eq.f32.partialorder %v1853_v7, 8.507059e+37  ;;  %v1861_v52 = vsub.f32 1.0, %v1860_v54  ;;  %v1943_v58 = vand.u32 2147483647, %v5089_v50  ;;  %v1847_v11 = vmul.f32 %v2898_v3, %v1846_v48  ;;  %vm1851_vm14 = vmor %vm1849_vm8, %vm1850_vm10 }
 0x2be   :  { %v1945_v30 = vand.u32 2147483648, %v5089_v50  ;;  %v1960_v49 = vand.u32 2147483648, %v5099_v46  ;;  %v5117_v61 = vmax.f32 %v1721_v13, 1e-08  ;;  %vm1865_vm12 = vweird.f32 %v2900_v16 }
 0x2bf   :  { %v1862_v12 = vmul.f32 %v2900_v16, %v1861_v52  ;;  %v1958_v18 = vand.u32 2147483647, %v5099_v46  ;;  %2905 = vrcp.f32 %v5105_v17  ;;  %v1848_v7 = vadd.f32 %v2898_v3, %v1847_v11  ;;  %vm1866_vm1 = vmor %vm1864_vm9, %vm1865_vm12 }
 0x2c0   :  { %v1856_v35 = vor.u32 1.1754944e-38, %v1855_v41  ;;  %vm5121_vm13 = vcmp.eq.f32.partialorder %v1868_v24, 8.507059e+37  ;;  %v1871_v54 = vor.u32 1.1754944e-38, %v1870_v22  ;;  %vm1939_vm15 = vweird.f32 %v5089_v50 }
 0x2c1   :  { %v2902_v48 = vpop.eup %2901  ;;  %v1863_v13 = vadd.f32 %v2900_v16, %v1862_v12  ;;  %vm1954_vm0 = vweird.f32 %v5099_v46  ;;  %2907 = vrcp.f32 %v5117_v61  ;;  %v1852_v11 = vsel %vm1851_vm14, %v2898_v3, %v1848_v7  ;;  %v1518_v7 = vpop.permute.xlu1 %1517 }
 0x2c2   :  { %v2904_v52 = vpop.eup %2903  ;;  %v1935_v41 = vmul.f32 %v2902_v48, %v5089_v50  ;;  %vm5135_vm2 = vcmp.eq.f32.partialorder %v1943_v58, 8.507059e+37  ;;  %v1946_v57 = vor.u32 1.1754944e-38, %v1945_v30  ;;  %v1961_v12 = vor.u32 1.1754944e-38, %v1960_v49 }
 0x2c3   :  { %v1857_v22 = vsel %vm5110_vm11, %v1856_v35, %v1852_v11  ;;  %v1867_v4 = vsel %vm1866_vm1, %v2900_v16, %v1863_v13  ;;  %v1950_v28 = vmul.f32 %v2904_v52, %v5099_v46  ;;  %vm5142_vm3 = vcmp.eq.f32.partialorder %v1958_v18, 8.507059e+37 }
 0x2c4   :  { %v1915_v25 = vand.u32 2147483648, %v5105_v17  ;;  %v1858_v58 = vmul.f32 %v1857_v22, %v6964_v53  ;;  %v1872_v33 = vsel %vm5121_vm13, %v1871_v54, %v1867_v4  ;;  %v1936_v30 = vsub.f32 1.0, %v1935_v41  ;;  %v1508_v54 = vpop.permute.xlu2 %1507 }
 0x2c5   :  { %vm1909_vm4 = vweird.f32 %v5105_v17  ;;  %v1913_v35 = vand.u32 2147483647, %v5105_v17  ;;  %v2906_v16 = vpop.eup %2905  ;;  %v1873_v55 = vmul.f32 %v1872_v33, %v6965_v10  ;;  %vm1940_vm5 = vweird.f32 %v2902_v48 }
 0x2c6   :  { %v1951_v18 = vsub.f32 1.0, %v1950_v28  ;;  %v1928_v49 = vand.u32 2147483647, %v5117_v61  ;;  %2804 = vst [vmem:[%s6364_s2] sm:$0xff] %v1858_v58  ;;  %v1937_v53 = vmul.f32 %v2902_v48, %v1936_v30  ;;  %vm1955_vm6 = vweird.f32 %v2904_v52  ;;  %vm1941_vm9 = vmor %vm1939_vm15, %vm1940_vm5 }
 0x2c7   :  { %v1905_v4 = vmul.f32 %v2906_v16, %v5105_v17  ;;  %vm1924_vm7 = vweird.f32 %v5117_v61  ;;  %v1664_v39 = vadd.f32 %v4837_v27, %v1518_v7  ;;  %v2908_v13 = vpop.eup %2907  ;;  %2805 = vst [vmem:[%s6364_s2 + $0x8] sm:$0xff] %v1873_v55  ;;  %v1916_v33 = vor.u32 1.1754944e-38, %v1915_v25  ;;  %vm1956_vm10 = vmor %vm1954_vm0, %vm1955_vm6 }
 0x2c8   :  { %v1952_v10 = vmul.f32 %v2904_v52, %v1951_v18  ;;  %v1930_v28 = vand.u32 2147483648, %v5117_v61  ;;  %v1665_v11 = vadd.f32 %v4839_v36, %v1518_v7  ;;  %v1938_v41 = vadd.f32 %v2902_v48, %v1937_v53 }
 0x2c9   :  { %v1906_v22 = vsub.f32 1.0, %v1905_v4  ;;  %vm1910_vm8 = vweird.f32 %v2906_v16  ;;  %v1920_v58 = vmul.f32 %v2908_v13, %v5117_v61  ;;  %v1728_v14 = vsub.f32 %v1664_v39, %v4816_v23  ;;  %v7017_v61 = vld [vmem:[#allocation34_spill] sm:$0xff] }
 0x2ca   :  { %v1953_v30 = vadd.f32 %v2904_v52, %v1952_v10  ;;  %v1729_v55 = vsub.f32 %v1665_v11, %v4820_v38  ;;  %v1660_v25 = vadd.f32 %v4837_v27, %v1508_v54  ;;  %v1942_v18 = vsel %vm1941_vm9, %v2902_v48, %v1938_v41  ;;  %vm1911_vm12 = vmor %vm1909_vm4, %vm1910_vm8 }
 0x2cb   :  { %v1907_v7 = vmul.f32 %v2906_v16, %v1906_v22  ;;  %v1921_v53 = vsub.f32 1.0, %v1920_v58  ;;  %vm1925_vm11 = vweird.f32 %v2908_v13  ;;  %v1947_v4 = vsel %vm5135_vm2, %v1946_v57, %v1942_v18  ;;  %v1533_v57 = vpop.permute.xlu1 %1532 }
 0x2cc   :  { %v1957_v50 = vsel %vm1956_vm10, %v2904_v52, %v1953_v30  ;;  %v5177_v1 = vmax.f32 %v1728_v14, 1e-08  ;;  %v5179_v10 = vmax.f32 %v1729_v55, 1e-08  ;;  %v1948_v39 = vmul.f32 %v1947_v4, %v6983_v43  ;;  %vm1926_vm14 = vmor %vm1924_vm7, %vm1925_vm11 }
 0x2cd   :  { %v1962_v48 = vsel %vm5142_vm3, %v1961_v12, %v1957_v50  ;;  %v1908_v11 = vadd.f32 %v2906_v16, %v1907_v7  ;;  %v1922_v41 = vmul.f32 %v2908_v13, %v1921_v53  ;;  %v1661_v14 = vadd.f32 %v4839_v36, %v1508_v54  ;;  %v7011_v12 = vld [vmem:[#allocation23_spill] sm:$0xff] }
 0x2ce   :  { %v1963_v46 = vmul.f32 %v1962_v48, %v4771_v62  ;;  %2909 = vrcp.f32 %v5177_v1  ;;  %v1724_v52 = vsub.f32 %v1660_v25, %v4922_v19  ;;  %2810 = vst [vmem:[%s6364_s2 + $0x30] sm:$0xff] %v1948_v39  ;;  %vm1914_vm13 = vcmp.eq.f32.partialorder %v1913_v35, 8.507059e+37  ;;  %v7014_v35 = vld [vmem:[#allocation24_spill] sm:$0xff] }
 0x2cf   :  { %v1912_v43 = vsel %vm1911_vm12, %v2906_v16, %v1908_v11  ;;  %v1923_v24 = vadd.f32 %v2908_v13, %v1922_v41  ;;  %2911 = vrcp.f32 %v5179_v10  ;;  %v1931_v17 = vor.u32 1.1754944e-38, %v1930_v28 }
 0x2d0   :  { %2811 = vst [vmem:[%s6364_s2 + $0x38] sm:$0xff] %v1963_v46  ;;  %v1917_v62 = vsel %vm1914_vm13, %v1916_v33, %v1912_v43  ;;  %v7012_v3 = vmax.f32 %v7011_v12, 0.0  ;;  %v7013_v54 = vmax.f32 %v6934_v42, 0.0  ;;  %v7015_v22 = vmax.f32 %v7014_v35, 0.0 }
 0x2d1   :  { %v7016_v58 = vmax.f32 %v6937_v59, 0.0  ;;  %v1918_v33 = vmul.f32 %v1917_v62, %v4853_v63  ;;  %v1927_v55 = vsel %vm1926_vm14, %v2908_v13, %v1923_v24  ;;  %vm1929_vm15 = vcmp.eq.f32.partialorder %v1928_v49, 8.507059e+37 }
 0x2d2   :  { %v5205_v16 = vmul.f32 %v7013_v54, %v7012_v3  ;;  %v7018_v25 = vmax.f32 %v7017_v61, 0.0  ;;  %v7019_v28 = vmax.f32 %v6958_v2, 0.0  ;;  %v1932_v7 = vsel %vm1929_vm15, %v1931_v17, %v1927_v55  ;;  %v7020_v2 = vld [vmem:[#allocation37_spill] sm:$0xff] }
 0x2d3   :  { %v5211_v30 = vmul.f32 %v7016_v58, %v7015_v22  ;;  %v2033_v42 = vand.u32 2147483647, %v5177_v1  ;;  %v1725_v53 = vsub.f32 %v1661_v14, %v4926_v31  ;;  %v5222_v4 = vmax.f32 %v1724_v52, 1e-08  ;;  %2808 = vst [vmem:[%s6364_s2 + $0x20] sm:$0xff] %v1918_v33 }
 0x2d4   :  { %v5218_v18 = vmul.f32 %v7019_v28, %v7018_v25  ;;  %v1933_v59 = vmul.f32 %v1932_v7, %v4863_v15  ;;  %v2035_v63 = vand.u32 2147483648, %v5177_v1  ;;  %v1670_v49 = vadd.f32 %v4837_v27, %v1533_v57  ;;  %v2910_v48 = vpop.eup %2909  ;;  %v1523_v28 = vpop.permute.xlu2 %1522 }
 0x2d5   :  { %v7021_v13 = vmax.f32 %v7020_v2, 0.0  ;;  %v7022_v50 = vmax.f32 %v6959_v32, 0.0  ;;  %v2048_v11 = vand.u32 2147483647, %v5179_v10  ;;  %v5237_v41 = vmax.f32 %v1725_v53, 1e-08  ;;  %v2912_v46 = vpop.eup %2911 }
 0x2d6   :  { %2913 = vrcp.f32 %v5222_v4  ;;  %v1671_v15 = vadd.f32 %v4839_v36, %v1533_v57  ;;  %2809 = vst [vmem:[%s6364_s2 + $0x28] sm:$0xff] %v1933_v59  ;;  %v2025_v14 = vmul.f32 %v2910_v48, %v5177_v1  ;;  %vm2029_vm0 = vweird.f32 %v5177_v1 }
 0x2d7   :  { %v5234_v39 = vmul.f32 %v7022_v50, %v7021_v13  ;;  %v2050_v32 = vand.u32 2147483648, %v5179_v10  ;;  %v1734_v52 = vsub.f32 %v1670_v49, %v4867_v51  ;;  %vm5248_vm1 = vcmp.eq.f32.partialorder %v2033_v42, 8.507059e+37 }
 0x2d8   :  { %v2040_v24 = vmul.f32 %v2912_v46, %v5179_v10  ;;  %vm2044_vm2 = vweird.f32 %v5179_v10  ;;  %2915 = vrcp.f32 %v5237_v41  ;;  %v2026_v62 = vsub.f32 1.0, %v2025_v14 }
 0x2d9   :  { %v2036_v17 = vor.u32 1.1754944e-38, %v2035_v63  ;;  %v1973_v57 = vand.u32 2147483647, %v5222_v4  ;;  %v1975_v12 = vand.u32 2147483648, %v5222_v4  ;;  %vm5257_vm3 = vcmp.eq.f32.partialorder %v2048_v11, 8.507059e+37 }
 0x2da   :  { %v2041_v3 = vsub.f32 1.0, %v2040_v24  ;;  %v1735_v35 = vsub.f32 %v1671_v15, %v4912_v45  ;;  %v5262_v22 = vmax.f32 %v1734_v52, 1e-08  ;;  %v2027_v58 = vmul.f32 %v2910_v48, %v2026_v62 }
 0x2db   :  { %vm2030_vm4 = vweird.f32 %v2910_v48  ;;  %v2051_v33 = vor.u32 1.1754944e-38, %v2050_v32  ;;  %vm1969_vm5 = vweird.f32 %v5222_v4  ;;  %vm2045_vm6 = vweird.f32 %v2912_v46 }
 0x2dc   :  { %v2914_v55 = vpop.eup %2913  ;;  %v2042_v61 = vmul.f32 %v2912_v46, %v2041_v3  ;;  %v5265_v25 = vmax.f32 %v1735_v35, 1e-08  ;;  %2917 = vrcp.f32 %v5262_v22  ;;  %v2028_v7 = vadd.f32 %v2910_v48, %v2027_v58  ;;  %vm2031_vm9 = vmor %vm2029_vm0, %vm2030_vm4 }
 0x2dd   :  { %v1965_v42 = vmul.f32 %v2914_v55, %v5222_v4  ;;  %vm5269_vm7 = vcmp.eq.f32.partialorder %v1973_v57, 8.507059e+37  ;;  %v1976_v59 = vor.u32 1.1754944e-38, %v1975_v12  ;;  %vm1984_vm8 = vweird.f32 %v5237_v41  ;;  %vm2046_vm10 = vmor %vm2044_vm2, %vm2045_vm6 }
 0x2de   :  { %v2916_v63 = vpop.eup %2915  ;;  %v2043_v49 = vadd.f32 %v2912_v46, %v2042_v61  ;;  %v1988_v2 = vand.u32 2147483647, %v5237_v41  ;;  %v1990_v13 = vand.u32 2147483648, %v5237_v41  ;;  %2919 = vrcp.f32 %v5265_v25 }
 0x2df   :  { %v2032_v50 = vsel %vm2031_vm9, %v2910_v48, %v2028_v7  ;;  %v1966_v11 = vsub.f32 1.0, %v1965_v42  ;;  %v1980_v15 = vmul.f32 %v2916_v63, %v5237_v41  ;;  %v1666_v14 = vadd.f32 %v4837_v27, %v1523_v28 }
 0x2e0   :  { %v2037_v1 = vsel %vm5248_vm1, %v2036_v17, %v2032_v50  ;;  %v2047_v32 = vsel %vm2046_vm10, %v2912_v46, %v2043_v49  ;;  %vm1970_vm11 = vweird.f32 %v2914_v55  ;;  %v1667_v52 = vadd.f32 %v4839_v36, %v1523_v28 }
 0x2e1   :  { %v2038_v24 = vmul.f32 %v2037_v1, %v4816_v23  ;;  %v2052_v48 = vsel %vm5257_vm3, %v2051_v33, %v2047_v32  ;;  %v1967_v62 = vmul.f32 %v2914_v55, %v1966_v11  ;;  %v1981_v10 = vsub.f32 1.0, %v1980_v15  ;;  %vm1971_vm14 = vmor %vm1969_vm5, %vm1970_vm11 }
 0x2e2   :  { %v2918_v57 = vpop.eup %2917  ;;  %v2053_v12 = vmul.f32 %v2052_v48, %v4820_v38  ;;  %vm5292_vm12 = vcmp.eq.f32.partialorder %v1988_v2, 8.507059e+37  ;;  %v1991_v43 = vor.u32 1.1754944e-38, %v1990_v13  ;;  %v2123_v46 = vand.u32 2147483647, %v5262_v22 }
 0x2e3   :  { %2816 = vst [vmem:[%s6364_s2 + $0x60] sm:$0xff] %v2038_v24  ;;  %v1968_v23 = vadd.f32 %v2914_v55, %v1967_v62  ;;  %v1982_v17 = vmul.f32 %v2916_v63, %v1981_v10  ;;  %vm1985_vm13 = vweird.f32 %v2916_v63  ;;  %v2115_v54 = vmul.f32 %v2918_v57, %v5262_v22 }
 0x2e4   :  { %v2920_v35 = vpop.eup %2919  ;;  %2817 = vst [vmem:[%s6364_s2 + $0x68] sm:$0xff] %v2053_v12  ;;  %v2125_v38 = vand.u32 2147483648, %v5262_v22  ;;  %v2138_v58 = vand.u32 2147483647, %v5265_v25  ;;  %v1730_v33 = vsub.f32 %v1666_v14, %v4931_v56  ;;  %v1731_v61 = vsub.f32 %v1667_v52, %v4935_v8  ;;  %vm1986_vm15 = vmor %vm1984_vm8, %vm1985_vm13 }
 0x2e5   :  { %v1972_v28 = vsel %vm1971_vm14, %v2914_v55, %v1968_v23  ;;  %v1983_v7 = vadd.f32 %v2916_v63, %v1982_v17  ;;  %v2116_v42 = vsub.f32 1.0, %v2115_v54  ;;  %v2130_v49 = vmul.f32 %v2920_v35, %v5265_v25  ;;  %v7031_v23 = vld [vmem:[#allocation95_spill] sm:$0xff]  ;;  %v7032_v54 = vld [vmem:[#allocation96_spill] sm:$0xff] }
 0x2e6   :  { %v1977_v2 = vsel %vm5269_vm7, %v1976_v59, %v1972_v28  ;;  %vm2120_vm0 = vweird.f32 %v2918_v57  ;;  %v5316_v4 = vmax.f32 %v1730_v33, 1e-08  ;;  %v5318_v13 = vmax.f32 %v1731_v61, 1e-08 }
 0x2e7   :  { %v1978_v50 = vmul.f32 %v1977_v2, %v4922_v19  ;;  %v1987_v11 = vsel %vm1986_vm15, %v2916_v63, %v1983_v7  ;;  %v2117_v15 = vmul.f32 %v2918_v57, %v2116_v42  ;;  %v2131_v55 = vsub.f32 1.0, %v2130_v49  ;;  %v1548_v63 = vpop.permute.xlu1 %1547 }
 0x2e8   :  { %v1992_v14 = vsel %vm5292_vm12, %v1991_v43, %v1987_v11  ;;  %vm2119_vm1 = vweird.f32 %v5262_v22  ;;  %v2140_v53 = vand.u32 2147483648, %v5265_v25  ;;  %2921 = vrcp.f32 %v5316_v4  ;;  %v1538_v22 = vpop.permute.xlu2 %1537 }
 0x2e9   :  { %v1993_v41 = vmul.f32 %v1992_v14, %v4926_v31  ;;  %2812 = vst [vmem:[%s6364_s2 + $0x40] sm:$0xff] %v1978_v50  ;;  %v2118_v59 = vadd.f32 %v2918_v57, %v2117_v15  ;;  %v2132_v19 = vmul.f32 %v2920_v35, %v2131_v55  ;;  %vm2135_vm2 = vweird.f32 %v2920_v35  ;;  %vm2121_vm3 = vmor %vm2119_vm1, %vm2120_vm0 }
 0x2ea   :  { %vm2124_vm4 = vcmp.eq.f32.partialorder %v2123_v46, 8.507059e+37  ;;  %v2126_v1 = vor.u32 1.1754944e-38, %v2125_v38  ;;  %vm2134_vm5 = vweird.f32 %v5265_v25  ;;  %2923 = vrcp.f32 %v5318_v13 }
 0x2eb   :  { %2813 = vst [vmem:[%s6364_s2 + $0x48] sm:$0xff] %v1993_v41  ;;  %v2122_v31 = vsel %vm2121_vm3, %v2918_v57, %v2118_v59  ;;  %v2133_v32 = vadd.f32 %v2920_v35, %v2132_v19  ;;  %vm2139_vm6 = vcmp.eq.f32.partialorder %v2138_v58, 8.507059e+37  ;;  %v2063_v52 = vand.u32 2147483647, %v5316_v4  ;;  %vm2136_vm7 = vmor %vm2134_vm5, %vm2135_vm2  ;;  %v1513_v41 = vpop.permute.xlu0 %1512 }
 0x2ec   :  { %v2127_v24 = vsel %vm2124_vm4, %v2126_v1, %v2122_v31  ;;  %v2141_v48 = vor.u32 1.1754944e-38, %v2140_v53  ;;  %v1676_v62 = vadd.f32 %v4837_v27, %v1548_v63  ;;  %v1677_v10 = vadd.f32 %v4839_v36, %v1548_v63 }
 0x2ed   :  { %v2128_v25 = vmul.f32 %v2127_v24, %v4867_v51  ;;  %v2137_v12 = vsel %vm2136_vm7, %v2920_v35, %v2133_v32  ;;  %v2065_v3 = vand.u32 2147483648, %v5316_v4  ;;  %v1672_v43 = vadd.f32 %v4837_v27, %v1538_v22 }
 0x2ee   :  { %v2922_v46 = vpop.eup %2921  ;;  %v2142_v57 = vsel %vm2139_vm6, %v2141_v48, %v2137_v12  ;;  %v1740_v17 = vsub.f32 %v1676_v62, %v7031_v23  ;;  %v1741_v38 = vsub.f32 %v1677_v10, %v7032_v54  ;;  %v1673_v58 = vadd.f32 %v4839_v36, %v1538_v22 }
 0x2ef   :  { %v2143_v33 = vmul.f32 %v2142_v57, %v4912_v45  ;;  %2822 = vst [vmem:[%s6364_s2 + $0x90] sm:$0xff] %v2128_v25  ;;  %v2055_v51 = vmul.f32 %v2922_v46, %v5316_v4  ;;  %vm5350_vm8 = vcmp.eq.f32.partialorder %v2063_v52, 8.507059e+37  ;;  %v1736_v61 = vsub.f32 %v1672_v43, %v4954_v37 }
 0x2f0   :  { %v2924_v28 = vpop.eup %2923  ;;  %vm2059_vm9 = vweird.f32 %v5316_v4  ;;  %v2078_v7 = vand.u32 2147483647, %v5318_v13  ;;  %v5357_v42 = vmax.f32 %v1740_v17, 1e-08  ;;  %v5359_v45 = vmax.f32 %v1741_v38, 1e-08 }
 0x2f1   :  { %2823 = vst [vmem:[%s6364_s2 + $0x98] sm:$0xff] %v2143_v33  ;;  %v2056_v49 = vsub.f32 1.0, %v2055_v51  ;;  %v2070_v2 = vmul.f32 %v2924_v28, %v5318_v13  ;;  %v1737_v50 = vsub.f32 %v1673_v58, %v4958_v60  ;;  %v5366_v11 = vmax.f32 %v1736_v61, 1e-08 }
 0x2f2   :  { %v2066_v15 = vor.u32 1.1754944e-38, %v2065_v3  ;;  %vm2074_vm10 = vweird.f32 %v5318_v13  ;;  %v2080_v55 = vand.u32 2147483648, %v5318_v13  ;;  %2925 = vrcp.f32 %v5357_v42 }
 0x2f3   :  { %v2057_v14 = vmul.f32 %v2922_v46, %v2056_v49  ;;  %vm2060_vm11 = vweird.f32 %v2922_v46  ;;  %v2071_v53 = vsub.f32 1.0, %v2070_v2  ;;  %2927 = vrcp.f32 %v5359_v45 }
 0x2f4   :  { %vm2075_vm12 = vweird.f32 %v2924_v28  ;;  %vm5372_vm13 = vcmp.eq.f32.partialorder %v2078_v7, 8.507059e+37  ;;  %v2213_v19 = vand.u32 2147483647, %v5357_v42  ;;  %v2215_v63 = vand.u32 2147483648, %v5357_v42  ;;  %vm2061_vm14 = vmor %vm2059_vm9, %vm2060_vm11 }
 0x2f5   :  { %v2058_v1 = vadd.f32 %v2922_v46, %v2057_v14  ;;  %v2072_v22 = vmul.f32 %v2924_v28, %v2071_v53  ;;  %v5378_v31 = vmax.f32 %v1737_v50, 1e-08  ;;  %2929 = vrcp.f32 %v5366_v11  ;;  %vm2076_vm0 = vmor %vm2074_vm10, %vm2075_vm12 }
 0x2f6   :  { %v2081_v32 = vor.u32 1.1754944e-38, %v2080_v55  ;;  %v2228_v52 = vand.u32 2147483647, %v5359_v45  ;;  %v2230_v24 = vand.u32 2147483648, %v5359_v45  ;;  %v1662_v48 = vadd.f32 %v4837_v27, %v1513_v41 }
 0x2f7   :  { %v2062_v62 = vsel %vm2061_vm14, %v2922_v46, %v2058_v1  ;;  %v2073_v10 = vadd.f32 %v2924_v28, %v2072_v22  ;;  %vm2209_vm15 = vweird.f32 %v5357_v42  ;;  %2931 = vrcp.f32 %v5378_v31 }
 0x2f8   :  { %v2926_v25 = vpop.eup %2925  ;;  %v2067_v12 = vsel %vm5350_vm8, %v2066_v15, %v2062_v62  ;;  %v2216_v4 = vor.u32 1.1754944e-38, %v2215_v63  ;;  %vm2224_vm1 = vweird.f32 %v5359_v45  ;;  %v2153_v3 = vand.u32 2147483647, %v5366_v11  ;;  %v1563_v15 = vpop.permute.xlu1 %1562 }
 0x2f9   :  { %v2928_v43 = vpop.eup %2927  ;;  %v2068_v46 = vmul.f32 %v2067_v12, %v4931_v56  ;;  %v2077_v57 = vsel %vm2076_vm0, %v2924_v28, %v2073_v10  ;;  %v2205_v17 = vmul.f32 %v2926_v25, %v5357_v42  ;;  %vm5397_vm2 = vcmp.eq.f32.partialorder %v2213_v19, 8.507059e+37 }
 0x2fa   :  { %v2155_v58 = vand.u32 2147483648, %v5366_v11  ;;  %v2082_v13 = vsel %vm5372_vm13, %v2081_v32, %v2077_v57  ;;  %v2220_v33 = vmul.f32 %v2928_v43, %v5359_v45  ;;  %vm5405_vm3 = vcmp.eq.f32.partialorder %v2228_v52, 8.507059e+37 }
 0x2fb   :  { %v2231_v35 = vor.u32 1.1754944e-38, %v2230_v24  ;;  %v2930_v56 = vpop.eup %2929  ;;  %v2083_v61 = vmul.f32 %v2082_v13, %v4935_v8  ;;  %2818 = vst [vmem:[%s6364_s2 + $0x70] sm:$0xff] %v2068_v46  ;;  %v2206_v28 = vsub.f32 1.0, %v2205_v17  ;;  %vm2149_vm4 = vweird.f32 %v5366_v11  ;;  %v7043_v13 = vld [vmem:[#allocation104_spill] sm:$0xff] }
 0x2fc   :  { %v2168_v7 = vand.u32 2147483647, %v5378_v31  ;;  %vm2210_vm5 = vweird.f32 %v2926_v25  ;;  %v2221_v49 = vsub.f32 1.0, %v2220_v33  ;;  %v2145_v2 = vmul.f32 %v2930_v56, %v5366_v11 }
 0x2fd   :  { %vm5416_vm6 = vcmp.eq.f32.partialorder %v2153_v3, 8.507059e+37  ;;  %vm2164_vm7 = vweird.f32 %v5378_v31  ;;  %v1663_v8 = vadd.f32 %v4839_v36, %v1513_v41  ;;  %v2932_v55 = vpop.eup %2931  ;;  %2819 = vst [vmem:[%s6364_s2 + $0x78] sm:$0xff] %v2083_v61  ;;  %v2207_v14 = vmul.f32 %v2926_v25, %v2206_v28  ;;  %vm2211_vm9 = vmor %vm2209_vm15, %vm2210_vm5 }
 0x2fe   :  { %vm2225_vm8 = vweird.f32 %v2928_v43  ;;  %v2156_v53 = vor.u32 1.1754944e-38, %v2155_v58  ;;  %v1726_v59 = vsub.f32 %v1662_v48, %v4798_v26  ;;  %v2222_v19 = vmul.f32 %v2928_v43, %v2221_v49 }
 0x2ff   :  { %v2146_v63 = vsub.f32 1.0, %v2145_v2  ;;  %v2160_v1 = vmul.f32 %v2932_v55, %v5378_v31  ;;  %v2170_v22 = vand.u32 2147483648, %v5378_v31  ;;  %v2208_v32 = vadd.f32 %v2926_v25, %v2207_v14  ;;  %vm2226_vm11 = vmor %vm2224_vm1, %vm2225_vm8 }
 0x300   :  { %v1727_v41 = vsub.f32 %v1663_v8, %v4802_v34  ;;  %v5429_v52 = vmax.f32 %v1726_v59, 1e-08  ;;  %v1682_v24 = vadd.f32 %v4837_v27, %v1563_v15  ;;  %v2223_v62 = vadd.f32 %v2928_v43, %v2222_v19  ;;  %v7050_v59 = vld [vmem:[#allocation105_spill] sm:$0xff] }
 0x301   :  { %v2147_v10 = vmul.f32 %v2930_v56, %v2146_v63  ;;  %vm2150_vm10 = vweird.f32 %v2930_v56  ;;  %v2161_v48 = vsub.f32 1.0, %v2160_v1  ;;  %v2212_v12 = vsel %vm2211_vm9, %v2926_v25, %v2208_v32 }
 0x302   :  { %vm2165_vm12 = vweird.f32 %v2932_v55  ;;  %v5438_v3 = vmax.f32 %v1727_v41, 1e-08  ;;  %2933 = vrcp.f32 %v5429_v52  ;;  %v2217_v46 = vsel %vm5397_vm2, %v2216_v4, %v2212_v12  ;;  %vm2151_vm13 = vmor %vm2149_vm4, %vm2150_vm10  ;;  %v7044_v4 = vld [vmem:[#allocation25_spill] sm:$0xff] }
 0x303   :  { %v2227_v57 = vsel %vm2226_vm11, %v2928_v43, %v2223_v62  ;;  %v2148_v42 = vadd.f32 %v2930_v56, %v2147_v10  ;;  %v2162_v17 = vmul.f32 %v2932_v55, %v2161_v48  ;;  %v2218_v58 = vmul.f32 %v2217_v46, %v7031_v23  ;;  %vm2166_vm14 = vmor %vm2164_vm7, %vm2165_vm12  ;;  %v7054_v48 = vld [vmem:[#allocation43_spill] sm:$0xff] }
 0x304   :  { %v2232_v25 = vsel %vm5405_vm3, %v2231_v35, %v2227_v57  ;;  %v1683_v45 = vadd.f32 %v4839_v36, %v1563_v15  ;;  %v1746_v33 = vsub.f32 %v1682_v24, %v7043_v13  ;;  %2935 = vrcp.f32 %v5438_v3  ;;  %v7047_v35 = vld [vmem:[#allocation26_spill] sm:$0xff]  ;;  %v1553_v15 = vpop.permute.xlu2 %1552 }
 0x305   :  { %v2233_v61 = vmul.f32 %v2232_v25, %v7032_v54  ;;  %v2152_v28 = vsel %vm2151_vm13, %v2930_v56, %v2148_v42  ;;  %v2163_v38 = vadd.f32 %v2932_v55, %v2162_v17  ;;  %2828 = vst [vmem:[%s6364_s2 + $0xc0] sm:$0xff] %v2218_v58  ;;  %v2171_v11 = vor.u32 1.1754944e-38, %v2170_v22 }
 0x306   :  { %v2157_v23 = vsel %vm5416_vm6, %v2156_v53, %v2152_v28  ;;  %v7045_v43 = vmax.f32 %v7044_v4, 0.0  ;;  %v7046_v54 = vmax.f32 %v6941_v0, 0.0  ;;  %v7048_v56 = vmax.f32 %v7047_v35, 0.0 }
 0x307   :  { %v7049_v49 = vmax.f32 %v6942_v47, 0.0  ;;  %2829 = vst [vmem:[%s6364_s2 + $0xc8] sm:$0xff] %v2233_v61  ;;  %v2158_v31 = vmul.f32 %v2157_v23, %v4954_v37  ;;  %v2167_v50 = vsel %vm2166_vm14, %v2932_v55, %v2163_v38  ;;  %vm2169_vm15 = vcmp.eq.f32.partialorder %v2168_v7, 8.507059e+37  ;;  %v7051_v55 = vld [vmem:[#allocation38_spill] sm:$0xff] }
 0x308   :  { %v5464_v51 = vmul.f32 %v7046_v54, %v7045_v43  ;;  %v2003_v8 = vand.u32 2147483647, %v5429_v52  ;;  %v2934_v0 = vpop.eup %2933  ;;  %v2172_v14 = vsel %vm2169_vm15, %v2171_v11, %v2167_v50  ;;  %v2005_v53 = vand.u32 2147483648, %v5429_v52  ;;  %v7061_v38 = vld [vmem:[#allocation50_spill] sm:$0xff] }
 0x309   :  { %v5470_v2 = vmul.f32 %v7049_v49, %v7048_v56  ;;  %v1747_v19 = vsub.f32 %v1683_v45, %v7050_v59  ;;  %v5479_v47 = vmax.f32 %v1746_v33, 1e-08  ;;  %v2173_v63 = vmul.f32 %v2172_v14, %v4958_v60  ;;  %2824 = vst [vmem:[%s6364_s2 + $0xa0] sm:$0xff] %v2158_v31 }
 0x30a   :  { %v1995_v37 = vmul.f32 %v2934_v0, %v5429_v52  ;;  %v2018_v7 = vand.u32 2147483647, %v5438_v3  ;;  %v7052_v1 = vmax.f32 %v7051_v55, 0.0  ;;  %v7053_v22 = vmax.f32 %v6966_v9, 0.0  ;;  %v2936_v62 = vpop.eup %2935 }
 0x30b   :  { %v2020_v41 = vand.u32 2147483648, %v5438_v3  ;;  %v5494_v24 = vmax.f32 %v1747_v19, 1e-08  ;;  %2937 = vrcp.f32 %v5479_v47  ;;  %v1678_v60 = vadd.f32 %v4837_v27, %v1553_v15  ;;  %2825 = vst [vmem:[%s6364_s2 + $0xa8] sm:$0xff] %v2173_v63 }
 0x30c   :  { %v5491_v32 = vmul.f32 %v7053_v22, %v7052_v1  ;;  %v1996_v10 = vsub.f32 1.0, %v1995_v37  ;;  %vm1999_vm0 = vweird.f32 %v5429_v52  ;;  %v1679_v9 = vadd.f32 %v4839_v36, %v1553_v15  ;;  %v7062_v1 = vld [vmem:[#allocation47_spill] sm:$0xff] }
 0x30d   :  { %v7055_v12 = vmax.f32 %v7054_v48, 0.0  ;;  %v7056_v46 = vmax.f32 %v6967_v6, 0.0  ;;  %vm5509_vm1 = vcmp.eq.f32.partialorder %v2003_v8, 8.507059e+37  ;;  %v2006_v17 = vor.u32 1.1754944e-38, %v2005_v53  ;;  %v1528_v6 = vpop.permute.xlu0 %1527 }
 0x30e   :  { %v2010_v58 = vmul.f32 %v2936_v62, %v5438_v3  ;;  %2939 = vrcp.f32 %v5494_v24  ;;  %v1997_v25 = vmul.f32 %v2934_v0, %v1996_v10  ;;  %vm2000_vm2 = vweird.f32 %v2934_v0 }
 0x30f   :  { %v5507_v57 = vmul.f32 %v7056_v46, %v7055_v12  ;;  %vm2014_vm3 = vweird.f32 %v5438_v3  ;;  %vm5516_vm4 = vcmp.eq.f32.partialorder %v2018_v7, 8.507059e+37  ;;  %v2021_v61 = vor.u32 1.1754944e-38, %v2020_v41  ;;  %vm2001_vm7 = vmor %vm1999_vm0, %vm2000_vm2  ;;  %v7067_v46 = vld [vmem:[#allocation44_spill] sm:$0xff] }
 0x310   :  { %v2011_v33 = vsub.f32 1.0, %v2010_v58  ;;  %v1742_v28 = vsub.f32 %v1678_v60, %v4983_v21  ;;  %v1743_v23 = vsub.f32 %v1679_v9, %v7061_v38  ;;  %v1998_v11 = vadd.f32 %v2934_v0, %v1997_v25 }
 0x311   :  { %vm2015_vm5 = vweird.f32 %v2936_v62  ;;  %vm2299_vm6 = vweird.f32 %v5479_v47  ;;  %v2303_v4 = vand.u32 2147483647, %v5479_v47  ;;  %v2938_v43 = vpop.eup %2937  ;;  %v1668_v49 = vadd.f32 %v4837_v27, %v1528_v6 }
 0x312   :  { %v2012_v54 = vmul.f32 %v2936_v62, %v2011_v33  ;;  %v5526_v35 = vmax.f32 %v1742_v28, 1e-08  ;;  %v5528_v56 = vmax.f32 %v1743_v23, 1e-08  ;;  %v2002_v31 = vsel %vm2001_vm7, %v2934_v0, %v1998_v11  ;;  %vm2016_vm9 = vmor %vm2014_vm3, %vm2015_vm5  ;;  %v1578_v28 = vpop.permute.xlu1 %1577 }
 0x313   :  { %v2295_v50 = vmul.f32 %v2938_v43, %v5479_v47  ;;  %v2305_v8 = vand.u32 2147483648, %v5479_v47  ;;  %vm2314_vm8 = vweird.f32 %v5494_v24  ;;  %v2007_v14 = vsel %vm5509_vm1, %v2006_v17, %v2002_v31 }
 0x314   :  { %v2940_v15 = vpop.eup %2939  ;;  %v2013_v52 = vadd.f32 %v2936_v62, %v2012_v54  ;;  %v2318_v53 = vand.u32 2147483647, %v5494_v24  ;;  %2941 = vrcp.f32 %v5526_v35  ;;  %v2008_v19 = vmul.f32 %v2007_v14, %v4798_v26 }
 0x315   :  { %v2296_v0 = vsub.f32 1.0, %v2295_v50  ;;  %v2310_v63 = vmul.f32 %v2940_v15, %v5494_v24  ;;  %v1669_v37 = vadd.f32 %v4839_v36, %v1528_v6  ;;  %v2320_v55 = vand.u32 2147483648, %v5494_v24 }
 0x316   :  { %v2017_v7 = vsel %vm2016_vm9, %v2936_v62, %v2013_v52  ;;  %2943 = vrcp.f32 %v5528_v56  ;;  %v1732_v22 = vsub.f32 %v1668_v49, %v7062_v1  ;;  %2814 = vst [vmem:[%s6364_s2 + $0x50] sm:$0xff] %v2008_v19  ;;  %vm2300_vm10 = vweird.f32 %v2938_v43 }
 0x317   :  { %v2022_v41 = vsel %vm5516_vm4, %v2021_v61, %v2017_v7  ;;  %v2297_v26 = vmul.f32 %v2938_v43, %v2296_v0  ;;  %v2311_v3 = vsub.f32 1.0, %v2310_v63  ;;  %vm5553_vm11 = vcmp.eq.f32.partialorder %v2303_v4, 8.507059e+37  ;;  %vm2301_vm14 = vmor %vm2299_vm6, %vm2300_vm10 }
 0x318   :  { %v2023_v60 = vmul.f32 %v2022_v41, %v4802_v34  ;;  %v2306_v10 = vor.u32 1.1754944e-38, %v2305_v8  ;;  %vm5557_vm12 = vcmp.eq.f32.partialorder %v2318_v53, 8.507059e+37  ;;  %vm2315_vm13 = vweird.f32 %v2940_v15  ;;  %v1543_v53 = vpop.permute.xlu0 %1542 }
 0x319   :  { %v2298_v48 = vadd.f32 %v2938_v43, %v2297_v26  ;;  %v2312_v12 = vmul.f32 %v2940_v15, %v2311_v3  ;;  %v1733_v42 = vsub.f32 %v1669_v37, %v7067_v46  ;;  %v2321_v34 = vor.u32 1.1754944e-38, %v2320_v55  ;;  %vm2316_vm0 = vmor %vm2314_vm8, %vm2315_vm13  ;;  %v7073_v26 = vld [vmem:[#allocation7_spill] sm:$0xff] }
 0x31a   :  { %v2942_v17 = vpop.eup %2941  ;;  %2815 = vst [vmem:[%s6364_s2 + $0x58] sm:$0xff] %v2023_v60  ;;  %vm2239_vm15 = vweird.f32 %v5526_v35  ;;  %v2243_v58 = vand.u32 2147483647, %v5526_v35  ;;  %v5569_v25 = vmax.f32 %v1732_v22, 1e-08  ;;  %v2245_v61 = vand.u32 2147483648, %v5526_v35 }
 0x31b   :  { %v2302_v45 = vsel %vm2301_vm14, %v2938_v43, %v2298_v48  ;;  %v2313_v6 = vadd.f32 %v2940_v15, %v2312_v12  ;;  %v2235_v33 = vmul.f32 %v2942_v17, %v5526_v35  ;;  %v2258_v47 = vand.u32 2147483647, %v5528_v56  ;;  %v7072_v22 = vld [vmem:[#allocation83_spill] sm:$0xff]  ;;  %v1568_v48 = vpop.permute.xlu2 %1567 }
 0x31c   :  { %v2944_v23 = vpop.eup %2943  ;;  %v2307_v11 = vsel %vm5553_vm11, %v2306_v10, %v2302_v45  ;;  %v5579_v4 = vmax.f32 %v1733_v42, 1e-08  ;;  %2945 = vrcp.f32 %v5569_v25  ;;  %v2260_v8 = vand.u32 2147483648, %v5528_v56 }
 0x31d   :  { %v2308_v43 = vmul.f32 %v2307_v11, %v7043_v13  ;;  %v2317_v54 = vsel %vm2316_vm0, %v2940_v15, %v2313_v6  ;;  %v2236_v49 = vsub.f32 1.0, %v2235_v33  ;;  %v2250_v31 = vmul.f32 %v2944_v23, %v5528_v56 }
 0x31e   :  { %v2322_v50 = vsel %vm5557_vm12, %v2321_v34, %v2317_v54  ;;  %v1688_v24 = vadd.f32 %v4837_v27, %v1578_v28  ;;  %v1689_v14 = vadd.f32 %v4839_v36, %v1578_v28  ;;  %vm2240_vm1 = vweird.f32 %v2942_v17 }
 0x31f   :  { %v2323_v52 = vmul.f32 %v2322_v50, %v7050_v59  ;;  %2834 = vst [vmem:[%s6364_s2 + $0xf0] sm:$0xff] %v2308_v43  ;;  %v2237_v13 = vmul.f32 %v2942_v17, %v2236_v49  ;;  %v2251_v15 = vsub.f32 1.0, %v2250_v31  ;;  %vm5593_vm2 = vcmp.eq.f32.partialorder %v2243_v58, 8.507059e+37  ;;  %vm2241_vm6 = vmor %vm2239_vm15, %vm2240_vm1  ;;  %v7076_v43 = vld [vmem:[#allocation41_spill] sm:$0xff] }
 0x320   :  { %v2246_v19 = vor.u32 1.1754944e-38, %v2245_v61  ;;  %vm2254_vm3 = vweird.f32 %v5528_v56  ;;  %2947 = vrcp.f32 %v5579_v4  ;;  %vm2255_vm4 = vweird.f32 %v2944_v23 }
 0x321   :  { %2835 = vst [vmem:[%s6364_s2 + $0xf8] sm:$0xff] %v2323_v52  ;;  %v2238_v59 = vadd.f32 %v2942_v17, %v2237_v13  ;;  %v2252_v0 = vmul.f32 %v2944_v23, %v2251_v15  ;;  %vm5602_vm5 = vcmp.eq.f32.partialorder %v2258_v47, 8.507059e+37  ;;  %v2261_v7 = vor.u32 1.1754944e-38, %v2260_v8  ;;  %vm2256_vm7 = vmor %vm2254_vm3, %vm2255_vm4 }
 0x322   :  { %v2946_v37 = vpop.eup %2945  ;;  %v2093_v55 = vand.u32 2147483647, %v5569_v25  ;;  %v1752_v41 = vsub.f32 %v1688_v24, %v7072_v22  ;;  %v1753_v3 = vsub.f32 %v1689_v14, %v7073_v26  ;;  %v2095_v9 = vand.u32 2147483648, %v5569_v25 }
 0x323   :  { %v2242_v60 = vsel %vm2241_vm6, %v2942_v17, %v2238_v59  ;;  %v2253_v62 = vadd.f32 %v2944_v23, %v2252_v0  ;;  %v2085_v10 = vmul.f32 %v2946_v37, %v5569_v25  ;;  %v2108_v35 = vand.u32 2147483647, %v5579_v4 }
 0x324   :  { %v2247_v12 = vsel %vm5593_vm2, %v2246_v19, %v2242_v60  ;;  %v5618_v42 = vmax.f32 %v1752_v41, 1e-08  ;;  %v5620_v34 = vmax.f32 %v1753_v3, 1e-08  ;;  %v2110_v6 = vand.u32 2147483648, %v5579_v4 }
 0x325   :  { %v2248_v17 = vmul.f32 %v2247_v12, %v4983_v21  ;;  %v2257_v58 = vsel %vm2256_vm7, %v2944_v23, %v2253_v62  ;;  %v2086_v45 = vsub.f32 1.0, %v2085_v10  ;;  %v1684_v56 = vadd.f32 %v4837_v27, %v1568_v48  ;;  %v7092_v12 = vld [vmem:[#allocation53_spill] sm:$0xff] }
 0x326   :  { %v2948_v33 = vpop.eup %2947  ;;  %v2262_v61 = vsel %vm5602_vm5, %v2261_v7, %v2257_v58  ;;  %2949 = vrcp.f32 %v5618_v42  ;;  %v1685_v28 = vadd.f32 %v4839_v36, %v1568_v48  ;;  %vm2090_vm8 = vweird.f32 %v2946_v37 }
 0x327   :  { %v2263_v11 = vmul.f32 %v2262_v61, %v7061_v38  ;;  %2830 = vst [vmem:[%s6364_s2 + $0xd0] sm:$0xff] %v2248_v17  ;;  %v2087_v21 = vmul.f32 %v2946_v37, %v2086_v45  ;;  %v2100_v23 = vmul.f32 %v2948_v33, %v5579_v4  ;;  %vm2089_vm9 = vweird.f32 %v5569_v25 }
 0x328   :  { %vm5635_vm10 = vcmp.eq.f32.partialorder %v2093_v55, 8.507059e+37  ;;  %2951 = vrcp.f32 %v5620_v34  ;;  %v7077_v54 = vmax.f32 %v7076_v43, 0.0  ;;  %v7078_v38 = vmax.f32 %v6970_v29, 0.0  ;;  %vm2091_vm12 = vmor %vm2089_vm9, %vm2090_vm8  ;;  %v1593_v43 = vpop.permute.xlu1 %1592 }
 0x329   :  { %2831 = vst [vmem:[%s6364_s2 + $0xd8] sm:$0xff] %v2263_v11  ;;  %v2088_v31 = vadd.f32 %v2946_v37, %v2087_v21  ;;  %v2096_v50 = vor.u32 1.1754944e-38, %v2095_v9  ;;  %v2101_v8 = vsub.f32 1.0, %v2100_v23  ;;  %vm2104_vm11 = vweird.f32 %v5579_v4  ;;  %v7086_v11 = vld [vmem:[#allocation49_spill] sm:$0xff] }
 0x32a   :  { %v5644_v49 = vmul.f32 %v7078_v38, %v7077_v54  ;;  %vm5650_vm13 = vcmp.eq.f32.partialorder %v2108_v35, 8.507059e+37  ;;  %v2111_v24 = vor.u32 1.1754944e-38, %v2110_v6  ;;  %v1748_v14 = vsub.f32 %v1684_v56, %v5024_v44  ;;  %v7085_v56 = vld [vmem:[#allocation48_spill] sm:$0xff] }
 0x32b   :  { %v1749_v29 = vsub.f32 %v1685_v28, %v5028_v40  ;;  %v2092_v52 = vsel %vm2091_vm12, %v2946_v37, %v2088_v31  ;;  %v2102_v13 = vmul.f32 %v2948_v33, %v2101_v8  ;;  %vm2105_vm14 = vweird.f32 %v2948_v33 }
 0x32c   :  { %vm2389_vm15 = vweird.f32 %v5618_v42  ;;  %v2393_v15 = vand.u32 2147483647, %v5618_v42  ;;  %v2950_v19 = vpop.eup %2949  ;;  %v2097_v59 = vsel %vm5635_vm10, %v2096_v50, %v2092_v52  ;;  %v2395_v0 = vand.u32 2147483648, %v5618_v42  ;;  %vm2106_vm0 = vmor %vm2104_vm11, %vm2105_vm14 }
 0x32d   :  { %v5661_v63 = vmax.f32 %v1748_v14, 1e-08  ;;  %v5663_v7 = vmax.f32 %v1749_v29, 1e-08  ;;  %v2098_v55 = vmul.f32 %v2097_v59, %v7062_v1  ;;  %v2103_v37 = vadd.f32 %v2948_v33, %v2102_v13 }
 0x32e   :  { %v2385_v41 = vmul.f32 %v2950_v19, %v5618_v42  ;;  %v2408_v3 = vand.u32 2147483647, %v5620_v34  ;;  %v2952_v60 = vpop.eup %2951  ;;  %v2410_v62 = vand.u32 2147483648, %v5620_v34  ;;  %v1674_v10 = vadd.f32 %v4837_v27, %v1543_v53 }
 0x32f   :  { %2953 = vrcp.f32 %v5661_v63  ;;  %v1675_v9 = vadd.f32 %v4839_v36, %v1543_v53  ;;  %v2107_v48 = vsel %vm2106_vm0, %v2948_v33, %v2103_v37  ;;  %2820 = vst [vmem:[%s6364_s2 + $0x80] sm:$0xff] %v2098_v55  ;;  %vm5677_vm1 = vcmp.eq.f32.partialorder %v2393_v15, 8.507059e+37 }
 0x330   :  { %v2386_v1 = vsub.f32 1.0, %v2385_v41  ;;  %v2400_v4 = vmul.f32 %v2952_v60, %v5620_v34  ;;  %v2112_v35 = vsel %vm5650_vm13, %v2111_v24, %v2107_v48  ;;  %v2396_v17 = vor.u32 1.1754944e-38, %v2395_v0  ;;  %v7091_v48 = vld [vmem:[#allocation78_spill] sm:$0xff] }
 0x331   :  { %vm2404_vm2 = vweird.f32 %v5620_v34  ;;  %2955 = vrcp.f32 %v5663_v7  ;;  %v2113_v58 = vmul.f32 %v2112_v35, %v7067_v46  ;;  %vm2390_vm3 = vweird.f32 %v2950_v19 }
 0x332   :  { %v2387_v45 = vmul.f32 %v2950_v19, %v2386_v1  ;;  %v2401_v6 = vsub.f32 1.0, %v2400_v4  ;;  %vm5687_vm4 = vcmp.eq.f32.partialorder %v2408_v3, 8.507059e+37  ;;  %v2411_v61 = vor.u32 1.1754944e-38, %v2410_v62  ;;  %vm2391_vm7 = vmor %vm2389_vm15, %vm2390_vm3 }
 0x333   :  { %v1738_v28 = vsub.f32 %v1674_v10, %v7085_v56  ;;  %v1739_v21 = vsub.f32 %v1675_v9, %v7086_v11  ;;  %2821 = vst [vmem:[%s6364_s2 + $0x88] sm:$0xff] %v2113_v58  ;;  %vm2405_vm5 = vweird.f32 %v2952_v60  ;;  %vm2329_vm6 = vweird.f32 %v5661_v63 }
 0x334   :  { %v2388_v23 = vadd.f32 %v2950_v19, %v2387_v45  ;;  %v2402_v47 = vmul.f32 %v2952_v60, %v2401_v6  ;;  %v2333_v46 = vand.u32 2147483647, %v5661_v63  ;;  %v2335_v38 = vand.u32 2147483648, %v5661_v63  ;;  %vm2406_vm8 = vmor %vm2404_vm2, %vm2405_vm5 }
 0x335   :  { %v2954_v54 = vpop.eup %2953  ;;  %v2348_v31 = vand.u32 2147483647, %v5663_v7  ;;  %v2350_v50 = vand.u32 2147483648, %v5663_v7  ;;  %v5703_v8 = vmax.f32 %v1738_v28, 1e-08  ;;  %v1694_v42 = vadd.f32 %v4837_v27, %v1593_v43 }
 0x336   :  { %v2392_v25 = vsel %vm2391_vm7, %v2950_v19, %v2388_v23  ;;  %v2403_v24 = vadd.f32 %v2952_v60, %v2402_v47  ;;  %v2325_v14 = vmul.f32 %v2954_v54, %v5661_v63  ;;  %v5706_v29 = vmax.f32 %v1739_v21, 1e-08 }
 0x337   :  { %v2956_v52 = vpop.eup %2955  ;;  %v2397_v13 = vsel %vm5677_vm1, %v2396_v17, %v2392_v25  ;;  %2957 = vrcp.f32 %v5703_v8  ;;  %v1695_v15 = vadd.f32 %v4839_v36, %v1593_v43  ;;  %vm2330_vm9 = vweird.f32 %v2954_v54 }
 0x338   :  { %v2398_v53 = vmul.f32 %v2397_v13, %v7072_v22  ;;  %v2407_v19 = vsel %vm2406_vm8, %v2952_v60, %v2403_v24  ;;  %v2326_v59 = vsub.f32 1.0, %v2325_v14  ;;  %v2340_v0 = vmul.f32 %v2956_v52, %v5663_v7  ;;  %v1583_v60 = vpop.permute.xlu2 %1582  ;;  %vm2331_vm14 = vmor %vm2329_vm6, %vm2330_vm9 }
 0x339   :  { %v2412_v55 = vsel %vm5687_vm4, %v2411_v61, %v2407_v19  ;;  %vm5720_vm10 = vcmp.eq.f32.partialorder %v2333_v46, 8.507059e+37  ;;  %v2336_v34 = vor.u32 1.1754944e-38, %v2335_v38  ;;  %2959 = vrcp.f32 %v5706_v29 }
 0x33a   :  { %v2413_v41 = vmul.f32 %v2412_v55, %v7073_v26  ;;  %2840 = vst [vmem:[%s6364_s2 + $0x120] sm:$0xff] %v2398_v53  ;;  %v2327_v22 = vmul.f32 %v2954_v54, %v2326_v59  ;;  %v2341_v3 = vsub.f32 1.0, %v2340_v0  ;;  %vm2344_vm11 = vweird.f32 %v5663_v7 }
 0x33b   :  { %vm2345_vm12 = vweird.f32 %v2956_v52  ;;  %vm5730_vm13 = vcmp.eq.f32.partialorder %v2348_v31, 8.507059e+37  ;;  %v2351_v10 = vor.u32 1.1754944e-38, %v2350_v50  ;;  %v1758_v1 = vsub.f32 %v1694_v42, %v7091_v48 }
 0x33c   :  { %2841 = vst [vmem:[%s6364_s2 + $0x128] sm:$0xff] %v2413_v41  ;;  %v2328_v26 = vadd.f32 %v2954_v54, %v2327_v22  ;;  %v2342_v9 = vmul.f32 %v2956_v52, %v2341_v3  ;;  %v1759_v4 = vsub.f32 %v1695_v15, %v7092_v12  ;;  %vm2179_vm15 = vweird.f32 %v5703_v8  ;;  %vm2346_vm0 = vmor %vm2344_vm11, %vm2345_vm12  ;;  %v1558_v22 = vpop.permute.xlu0 %1557 }
 0x33d   :  { %v2958_v35 = vpop.eup %2957  ;;  %v2183_v17 = vand.u32 2147483647, %v5703_v8  ;;  %v1690_v58 = vadd.f32 %v4837_v27, %v1583_v60  ;;  %v1691_v45 = vadd.f32 %v4839_v36, %v1583_v60  ;;  %v2185_v28 = vand.u32 2147483648, %v5703_v8 }
 0x33e   :  { %v2332_v6 = vsel %vm2331_vm14, %v2954_v54, %v2328_v26  ;;  %v2343_v33 = vadd.f32 %v2956_v52, %v2342_v9  ;;  %v2175_v61 = vmul.f32 %v2958_v35, %v5703_v8  ;;  %v2198_v63 = vand.u32 2147483647, %v5706_v29 }
 0x33f   :  { %v2337_v21 = vsel %vm5720_vm10, %v2336_v34, %v2332_v6  ;;  %v5754_v23 = vmax.f32 %v1758_v1, 1e-08  ;;  %v5756_v47 = vmax.f32 %v1759_v4, 1e-08  ;;  %v2960_v46 = vpop.eup %2959  ;;  %v1754_v31 = vsub.f32 %v1690_v58, %v5051_v5  ;;  %v7106_v4 = vld [vmem:[#allocation79_spill] sm:$0xff] }
 0x340   :  { %v2338_v43 = vmul.f32 %v2337_v21, %v5024_v44  ;;  %v2347_v54 = vsel %vm2346_vm0, %v2956_v52, %v2343_v33  ;;  %v2176_v38 = vsub.f32 1.0, %v2175_v61  ;;  %v2190_v25 = vmul.f32 %v2960_v46, %v5706_v29 }
 0x341   :  { %v2352_v50 = vsel %vm5730_vm13, %v2351_v10, %v2347_v54  ;;  %2961 = vrcp.f32 %v5754_v23  ;;  %v1755_v7 = vsub.f32 %v1691_v45, %v5065_v20  ;;  %vm2180_vm1 = vweird.f32 %v2958_v35 }
 0x342   :  { %v2353_v24 = vmul.f32 %v2352_v50, %v5028_v40  ;;  %2836 = vst [vmem:[%s6364_s2 + $0x100] sm:$0xff] %v2338_v43  ;;  %v2177_v44 = vmul.f32 %v2958_v35, %v2176_v38  ;;  %v2200_v14 = vand.u32 2147483648, %v5706_v29  ;;  %vm5770_vm2 = vcmp.eq.f32.partialorder %v2183_v17, 8.507059e+37  ;;  %vm2181_vm6 = vmor %vm2179_vm15, %vm2180_vm1  ;;  %v7101_v38 = vld [vmem:[#allocation51_spill] sm:$0xff] }
 0x343   :  { %v2186_v13 = vor.u32 1.1754944e-38, %v2185_v28  ;;  %v2191_v42 = vsub.f32 1.0, %v2190_v25  ;;  %2963 = vrcp.f32 %v5756_v47  ;;  %vm2194_vm3 = vweird.f32 %v5706_v29 }
 0x344   :  { %2837 = vst [vmem:[%s6364_s2 + $0x108] sm:$0xff] %v2353_v24  ;;  %v2178_v40 = vadd.f32 %v2958_v35, %v2177_v44  ;;  %vm2195_vm4 = vweird.f32 %v2960_v46  ;;  %vm5779_vm5 = vcmp.eq.f32.partialorder %v2198_v63, 8.507059e+37  ;;  %v2483_v19 = vand.u32 2147483647, %v5754_v23 }
 0x345   :  { %v2192_v53 = vmul.f32 %v2960_v46, %v2191_v42  ;;  %v5786_v59 = vmax.f32 %v1754_v31, 1e-08  ;;  %v5788_v0 = vmax.f32 %v1755_v7, 1e-08  ;;  %v2201_v37 = vor.u32 1.1754944e-38, %v2200_v14  ;;  %vm2196_vm7 = vmor %vm2194_vm3, %vm2195_vm4  ;;  %v7102_v14 = vld [vmem:[#allocation52_spill] sm:$0xff] }
 0x346   :  { %v2182_v55 = vsel %vm2181_vm6, %v2958_v35, %v2178_v40  ;;  %v2485_v34 = vand.u32 2147483648, %v5754_v23  ;;  %v2498_v41 = vand.u32 2147483647, %v5756_v47  ;;  %v2500_v62 = vand.u32 2147483648, %v5756_v47 }
 0x347   :  { %v2962_v3 = vpop.eup %2961  ;;  %v2187_v60 = vsel %vm5770_vm2, %v2186_v13, %v2182_v55  ;;  %v2193_v8 = vadd.f32 %v2960_v46, %v2192_v53  ;;  %2965 = vrcp.f32 %v5786_v59  ;;  %vm2479_vm8 = vweird.f32 %v5754_v23 }
 0x348   :  { %v2188_v10 = vmul.f32 %v2187_v60, %v7085_v56  ;;  %v2475_v26 = vmul.f32 %v2962_v3, %v5754_v23  ;;  %vm2494_vm9 = vweird.f32 %v5756_v47  ;;  %vm5803_vm10 = vcmp.eq.f32.partialorder %v2483_v19, 8.507059e+37 }
 0x349   :  { %v2964_v9 = vpop.eup %2963  ;;  %v2197_v1 = vsel %vm2196_vm7, %v2960_v46, %v2193_v8  ;;  %2967 = vrcp.f32 %v5788_v0  ;;  %v1680_v56 = vadd.f32 %v4837_v27, %v1558_v22  ;;  %v2486_v17 = vor.u32 1.1754944e-38, %v2485_v34  ;;  %v1608_v46 = vpop.permute.xlu1 %1607  ;;  %v7103_v8 = vld [vmem:[#allocation30_spill] sm:$0xff] }
 0x34a   :  { %v2202_v29 = vsel %vm5779_vm5, %v2201_v37, %v2197_v1  ;;  %2826 = vst [vmem:[%s6364_s2 + $0xb0] sm:$0xff] %v2188_v10  ;;  %v2476_v35 = vsub.f32 1.0, %v2475_v26  ;;  %v2490_v58 = vmul.f32 %v2964_v9, %v5756_v47  ;;  %vm2480_vm11 = vweird.f32 %v2962_v3 }
 0x34b   :  { %v2203_v45 = vmul.f32 %v2202_v29, %v7086_v11  ;;  %vm5816_vm12 = vcmp.eq.f32.partialorder %v2498_v41, 8.507059e+37  ;;  %v2501_v33 = vor.u32 1.1754944e-38, %v2500_v62  ;;  %v2423_v21 = vand.u32 2147483647, %v5786_v59  ;;  %vm2481_vm14 = vmor %vm2479_vm8, %vm2480_vm11 }
 0x34c   :  { %v2477_v61 = vmul.f32 %v2962_v3, %v2476_v35  ;;  %v2491_v28 = vsub.f32 1.0, %v2490_v58  ;;  %v1681_v63 = vadd.f32 %v4839_v36, %v1558_v22  ;;  %vm2495_vm13 = vweird.f32 %v2964_v9 }
 0x34d   :  { %v2966_v43 = vpop.eup %2965  ;;  %2827 = vst [vmem:[%s6364_s2 + $0xb8] sm:$0xff] %v2203_v45  ;;  %v2425_v11 = vand.u32 2147483648, %v5786_v59  ;;  %v2438_v54 = vand.u32 2147483647, %v5788_v0  ;;  %v1744_v31 = vsub.f32 %v1680_v56, %v7101_v38  ;;  %v2440_v24 = vand.u32 2147483648, %v5788_v0  ;;  %vm2496_vm15 = vmor %vm2494_vm9, %vm2495_vm13  ;;  %v1598_v45 = vpop.permute.xlu2 %1597 }
 0x34e   :  { %v2478_v50 = vadd.f32 %v2962_v3, %v2477_v61  ;;  %v2492_v25 = vmul.f32 %v2964_v9, %v2491_v28  ;;  %v2415_v7 = vmul.f32 %v2966_v43, %v5786_v59  ;;  %v1745_v52 = vsub.f32 %v1681_v63, %v7102_v14 }
 0x34f   :  { %v2968_v44 = vpop.eup %2967  ;;  %v5834_v13 = vmax.f32 %v1744_v31, 1e-08  ;;  %v1700_v42 = vadd.f32 %v4837_v27, %v1608_v46  ;;  %v1701_v40 = vadd.f32 %v4839_v36, %v1608_v46  ;;  %vm2420_vm0 = vweird.f32 %v2966_v43  ;;  %v7107_v31 = vld [vmem:[#allocation45_spill] sm:$0xff] }
 0x350   :  { %v2482_v15 = vsel %vm2481_vm14, %v2962_v3, %v2478_v50  ;;  %v2493_v53 = vadd.f32 %v2964_v9, %v2492_v25  ;;  %v2416_v19 = vsub.f32 1.0, %v2415_v7  ;;  %v2430_v55 = vmul.f32 %v2968_v44, %v5788_v0  ;;  %v7109_v25 = vld [vmem:[#allocation5_spill] sm:$0xff] }
 0x351   :  { %v2487_v37 = vsel %vm5803_vm10, %v2486_v17, %v2482_v15  ;;  %v5844_v23 = vmax.f32 %v1745_v52, 1e-08  ;;  %2969 = vrcp.f32 %v5834_v13  ;;  %vm2419_vm1 = vweird.f32 %v5786_v59 }
 0x352   :  { %v2488_v34 = vmul.f32 %v2487_v37, %v7091_v48  ;;  %v2497_v41 = vsel %vm2496_vm15, %v2964_v9, %v2493_v53  ;;  %v2417_v22 = vmul.f32 %v2966_v43, %v2416_v19  ;;  %v2431_v3 = vsub.f32 1.0, %v2430_v55  ;;  %vm2421_vm3 = vmor %vm2419_vm1, %vm2420_vm0 }
 0x353   :  { %v2502_v60 = vsel %vm5816_vm12, %v2501_v33, %v2497_v41  ;;  %vm2435_vm2 = vweird.f32 %v2968_v44  ;;  %v1764_v62 = vsub.f32 %v1700_v42, %v7103_v8  ;;  %2971 = vrcp.f32 %v5844_v23  ;;  %v7115_v41 = vld [vmem:[#allocation57_spill] sm:$0xff] }
 0x354   :  { %v2503_v47 = vmul.f32 %v2502_v60, %v7092_v12  ;;  %2846 = vst [vmem:[%s6364_s2 + $0x150] sm:$0xff] %v2488_v34  ;;  %v2418_v10 = vadd.f32 %v2966_v43, %v2417_v22  ;;  %v2432_v26 = vmul.f32 %v2968_v44, %v2431_v3  ;;  %vm2424_vm4 = vcmp.eq.f32.partialorder %v2423_v21, 8.507059e+37 }
 0x355   :  { %v2426_v48 = vor.u32 1.1754944e-38, %v2425_v11  ;;  %vm2434_vm5 = vweird.f32 %v5788_v0  ;;  %vm5859_vm6 = vcmp.eq.f32.partialorder %v2438_v54, 8.507059e+37  ;;  %v2441_v1 = vor.u32 1.1754944e-38, %v2440_v24 }
 0x356   :  { %2847 = vst [vmem:[%s6364_s2 + $0x158] sm:$0xff] %v2503_v47  ;;  %v2422_v12 = vsel %vm2421_vm3, %v2966_v43, %v2418_v10  ;;  %v2433_v9 = vadd.f32 %v2968_v44, %v2432_v26  ;;  %v1765_v56 = vsub.f32 %v1701_v40, %v7106_v4  ;;  %vm2436_vm7 = vmor %vm2434_vm5, %vm2435_vm2  ;;  %v2273_v17 = vand.u32 2147483647, %v5834_v13  ;;  %v1573_v40 = vpop.permute.xlu0 %1572 }
 0x357   :  { %v2970_v29 = vpop.eup %2969  ;;  %v2427_v35 = vsel %vm2424_vm4, %v2426_v48, %v2422_v12  ;;  %v2275_v0 = vand.u32 2147483648, %v5834_v13  ;;  %v5870_v58 = vmax.f32 %v1764_v62, 1e-08  ;;  %v2288_v28 = vand.u32 2147483647, %v5844_v23  ;;  %v7116_v62 = vld [vmem:[#allocation63_spill] sm:$0xff] }
 0x358   :  { %v2428_v6 = vmul.f32 %v2427_v35, %v5051_v5  ;;  %v2437_v33 = vsel %vm2436_vm7, %v2968_v44, %v2433_v9  ;;  %v2265_v61 = vmul.f32 %v2970_v29, %v5834_v13  ;;  %v2290_v63 = vand.u32 2147483648, %v5844_v23 }
 0x359   :  { %v2442_v21 = vsel %vm5859_vm6, %v2441_v1, %v2437_v33  ;;  %v5878_v46 = vmax.f32 %v1765_v56, 1e-08  ;;  %2973 = vrcp.f32 %v5870_v58  ;;  %v2972_v43 = vpop.eup %2971  ;;  %v1696_v54 = vadd.f32 %v4837_v27, %v1598_v45 }
 0x35a   :  { %v2443_v11 = vmul.f32 %v2442_v21, %v5065_v20  ;;  %2842 = vst [vmem:[%s6364_s2 + $0x130] sm:$0xff] %v2428_v6  ;;  %v2266_v5 = vsub.f32 1.0, %v2265_v61  ;;  %v7108_v50 = vmax.f32 %v7107_v31, 0.0  ;;  %v7110_v7 = vmax.f32 %v7109_v25, 0.0  ;;  %v7117_v61 = vld [vmem:[#allocation54_spill] sm:$0xff] }
 0x35b   :  { %vm2269_vm8 = vweird.f32 %v5834_v13  ;;  %vm5893_vm9 = vcmp.eq.f32.partialorder %v2273_v17, 8.507059e+37  ;;  %v2280_v20 = vmul.f32 %v2972_v43, %v5844_v23  ;;  %2975 = vrcp.f32 %v5878_v46 }
 0x35c   :  { %v5890_v24 = vmul.f32 %v7110_v7, %v7108_v50  ;;  %2843 = vst [vmem:[%s6364_s2 + $0x138] sm:$0xff] %v2443_v11  ;;  %v2267_v52 = vmul.f32 %v2970_v29, %v2266_v5  ;;  %vm2270_vm10 = vweird.f32 %v2970_v29  ;;  %v2276_v42 = vor.u32 1.1754944e-38, %v2275_v0  ;;  %v7122_v50 = vld [vmem:[#allocation55_spill] sm:$0xff] }
 0x35d   :  { %vm2284_vm11 = vweird.f32 %v5844_v23  ;;  %v2281_v15 = vsub.f32 1.0, %v2280_v20  ;;  %vm5903_vm12 = vcmp.eq.f32.partialorder %v2288_v28, 8.507059e+37  ;;  %v2291_v19 = vor.u32 1.1754944e-38, %v2290_v63  ;;  %vm2271_vm14 = vmor %vm2269_vm8, %vm2270_vm10 }
 0x35e   :  { %v1697_v55 = vadd.f32 %v4839_v36, %v1598_v45  ;;  %v2268_v37 = vadd.f32 %v2970_v29, %v2267_v52  ;;  %vm2569_vm13 = vweird.f32 %v5870_v58  ;;  %v2573_v34 = vand.u32 2147483647, %v5870_v58 }
 0x35f   :  { %v1760_v22 = vsub.f32 %v1696_v54, %v7115_v41  ;;  %v2974_v3 = vpop.eup %2973  ;;  %v2282_v60 = vmul.f32 %v2972_v43, %v2281_v15  ;;  %vm2285_vm15 = vweird.f32 %v2972_v43  ;;  %v1686_v10 = vadd.f32 %v4837_v27, %v1573_v40 }
 0x360   :  { %v1761_v47 = vsub.f32 %v1697_v55, %v7116_v62  ;;  %v2272_v26 = vsel %vm2271_vm14, %v2970_v29, %v2268_v37  ;;  %v2565_v48 = vmul.f32 %v2974_v3, %v5870_v58  ;;  %v2575_v59 = vand.u32 2147483648, %v5870_v58  ;;  %vm2286_vm0 = vmor %vm2284_vm11, %vm2285_vm15 }
 0x361   :  { %v5917_v12 = vmax.f32 %v1760_v22, 1e-08  ;;  %v2976_v9 = vpop.eup %2975  ;;  %v2277_v1 = vsel %vm5893_vm9, %v2276_v42, %v2272_v26  ;;  %v2283_v56 = vadd.f32 %v2972_v43, %v2282_v60  ;;  %v2588_v13 = vand.u32 2147483647, %v5878_v46 }
 0x362   :  { %v5922_v35 = vmax.f32 %v1761_v47, 1e-08  ;;  %v2278_v17 = vmul.f32 %v2277_v1, %v7101_v38  ;;  %v2566_v29 = vsub.f32 1.0, %v2565_v48  ;;  %v2580_v0 = vmul.f32 %v2976_v9, %v5878_v46 }
 0x363   :  { %v2590_v45 = vand.u32 2147483648, %v5878_v46  ;;  %v2287_v6 = vsel %vm2286_vm0, %v2972_v43, %v2283_v56  ;;  %2977 = vrcp.f32 %v5917_v12  ;;  %v1687_v33 = vadd.f32 %v4839_v36, %v1573_v40  ;;  %v1623_v40 = vpop.permute.xlu1 %1622 }
 0x364   :  { %v1750_v28 = vsub.f32 %v1686_v10, %v7117_v61  ;;  %v2292_v21 = vsel %vm5903_vm12, %v2291_v19, %v2287_v6  ;;  %2832 = vst [vmem:[%s6364_s2 + $0xe0] sm:$0xff] %v2278_v17  ;;  %v2567_v38 = vmul.f32 %v2974_v3, %v2566_v29  ;;  %vm2570_vm1 = vweird.f32 %v2974_v3  ;;  %v7128_v6 = vld [vmem:[#allocation59_spill] sm:$0xff] }
 0x365   :  { %v2581_v23 = vsub.f32 1.0, %v2580_v0  ;;  %v2293_v63 = vmul.f32 %v2292_v21, %v7102_v14  ;;  %vm5938_vm2 = vcmp.eq.f32.partialorder %v2573_v34, 8.507059e+37  ;;  %vm2584_vm3 = vweird.f32 %v5878_v46  ;;  %vm2571_vm5 = vmor %vm2569_vm13, %vm2570_vm1  ;;  %v7127_v0 = vld [vmem:[#allocation81_spill] sm:$0xff] }
 0x366   :  { %2979 = vrcp.f32 %v5922_v35  ;;  %v2568_v11 = vadd.f32 %v2974_v3, %v2567_v38  ;;  %v2576_v5 = vor.u32 1.1754944e-38, %v2575_v59  ;;  %vm2585_vm4 = vweird.f32 %v2976_v9  ;;  %v1613_v59 = vpop.permute.xlu2 %1612 }
 0x367   :  { %v2582_v54 = vmul.f32 %v2976_v9, %v2581_v23  ;;  %2833 = vst [vmem:[%s6364_s2 + $0xe8] sm:$0xff] %v2293_v63  ;;  %vm5949_vm6 = vcmp.eq.f32.partialorder %v2588_v13, 8.507059e+37  ;;  %v2591_v31 = vor.u32 1.1754944e-38, %v2590_v45  ;;  %v1751_v25 = vsub.f32 %v1687_v33, %v7122_v50  ;;  %vm2586_vm7 = vmor %vm2584_vm3, %vm2585_vm4 }
 0x368   :  { %v5954_v7 = vmax.f32 %v1750_v28, 1e-08  ;;  %v2572_v44 = vsel %vm2571_vm5, %v2974_v3, %v2568_v11  ;;  %v2513_v52 = vand.u32 2147483647, %v5917_v12  ;;  %v2515_v42 = vand.u32 2147483648, %v5917_v12 }
 0x369   :  { %v2583_v20 = vadd.f32 %v2976_v9, %v2582_v54  ;;  %v2978_v15 = vpop.eup %2977  ;;  %v2577_v58 = vsel %vm5938_vm2, %v2576_v5, %v2572_v44  ;;  %v2528_v53 = vand.u32 2147483647, %v5922_v35  ;;  %v5963_v19 = vmax.f32 %v1751_v25, 1e-08 }
 0x36a   :  { %2981 = vrcp.f32 %v5954_v7  ;;  %v2578_v55 = vmul.f32 %v2577_v58, %v7103_v8  ;;  %v2505_v34 = vmul.f32 %v2978_v15, %v5917_v12  ;;  %v2530_v22 = vand.u32 2147483648, %v5922_v35 }
 0x36b   :  { %v2587_v37 = vsel %vm2586_vm7, %v2976_v9, %v2583_v20  ;;  %vm2509_vm8 = vweird.f32 %v5917_v12  ;;  %v1706_v46 = vadd.f32 %v4837_v27, %v1623_v40  ;;  %v1707_v47 = vadd.f32 %v4839_v36, %v1623_v40 }
 0x36c   :  { %v2980_v3 = vpop.eup %2979  ;;  %v2592_v60 = vsel %vm5949_vm6, %v2591_v31, %v2587_v37  ;;  %2852 = vst [vmem:[%s6364_s2 + $0x180] sm:$0xff] %v2578_v55  ;;  %v2506_v8 = vsub.f32 1.0, %v2505_v34  ;;  %vm5978_vm9 = vcmp.eq.f32.partialorder %v2513_v52, 8.507059e+37  ;;  %v2516_v9 = vor.u32 1.1754944e-38, %v2515_v42 }
 0x36d   :  { %v2593_v10 = vmul.f32 %v2592_v60, %v7106_v4  ;;  %v2520_v48 = vmul.f32 %v2980_v3, %v5922_v35  ;;  %vm2524_vm10 = vweird.f32 %v5922_v35  ;;  %vm5984_vm11 = vcmp.eq.f32.partialorder %v2528_v53, 8.507059e+37 }
 0x36e   :  { %2983 = vrcp.f32 %v5963_v19  ;;  %v2507_v4 = vmul.f32 %v2978_v15, %v2506_v8  ;;  %vm2510_vm12 = vweird.f32 %v2978_v15  ;;  %v2531_v13 = vor.u32 1.1754944e-38, %v2530_v22 }
 0x36f   :  { %2853 = vst [vmem:[%s6364_s2 + $0x188] sm:$0xff] %v2593_v10  ;;  %v2521_v56 = vsub.f32 1.0, %v2520_v48  ;;  %v2363_v29 = vand.u32 2147483647, %v5954_v7  ;;  %v1770_v45 = vsub.f32 %v1706_v46, %v7127_v0  ;;  %v1771_v33 = vsub.f32 %v1707_v47, %v7128_v6  ;;  %vm2511_vm14 = vmor %vm2509_vm8, %vm2510_vm12  ;;  %v1588_v48 = vpop.permute.xlu0 %1587 }
 0x370   :  { %v2982_v17 = vpop.eup %2981  ;;  %v1702_v28 = vadd.f32 %v4837_v27, %v1613_v59  ;;  %v2508_v21 = vadd.f32 %v2978_v15, %v2507_v4  ;;  %vm2525_vm13 = vweird.f32 %v2980_v3  ;;  %v2365_v63 = vand.u32 2147483648, %v5954_v7 }
 0x371   :  { %v2522_v38 = vmul.f32 %v2980_v3, %v2521_v56  ;;  %v2355_v23 = vmul.f32 %v2982_v17, %v5954_v7  ;;  %v2378_v43 = vand.u32 2147483647, %v5963_v19  ;;  %v6001_v11 = vmax.f32 %v1770_v45, 1e-08  ;;  %vm2526_vm15 = vmor %vm2524_vm10, %vm2525_vm13 }
 0x372   :  { %v1703_v5 = vadd.f32 %v4839_v36, %v1613_v59  ;;  %v2512_v54 = vsel %vm2511_vm14, %v2978_v15, %v2508_v21  ;;  %v6004_v25 = vmax.f32 %v1771_v33, 1e-08  ;;  %vm2360_vm0 = vweird.f32 %v2982_v17 }
 0x373   :  { %v2523_v14 = vadd.f32 %v2980_v3, %v2522_v38  ;;  %v2356_v31 = vsub.f32 1.0, %v2355_v23  ;;  %v2517_v20 = vsel %vm5978_vm9, %v2516_v9, %v2512_v54  ;;  %2985 = vrcp.f32 %v6001_v11 }
 0x374   :  { %v2984_v44 = vpop.eup %2983  ;;  %v1766_v12 = vsub.f32 %v1702_v28, %v5218_v18  ;;  %v2518_v52 = vmul.f32 %v2517_v20, %v7115_v41  ;;  %vm2359_vm1 = vweird.f32 %v5954_v7  ;;  %vm6017_vm2 = vcmp.eq.f32.partialorder %v2363_v29, 8.507059e+37  ;;  %v7138_v20 = vld [vmem:[#allocation60_spill] sm:$0xff] }
 0x375   :  { %v2527_v42 = vsel %vm2526_vm15, %v2980_v3, %v2523_v14  ;;  %v2357_v40 = vmul.f32 %v2982_v17, %v2356_v31  ;;  %v2370_v15 = vmul.f32 %v2984_v44, %v5963_v19  ;;  %v2380_v35 = vand.u32 2147483648, %v5963_v19  ;;  %vm2361_vm3 = vmor %vm2359_vm1, %vm2360_vm0 }
 0x376   :  { %v2532_v58 = vsel %vm5984_vm11, %v2531_v13, %v2527_v42  ;;  %2848 = vst [vmem:[%s6364_s2 + $0x160] sm:$0xff] %v2518_v52  ;;  %2987 = vrcp.f32 %v6004_v25  ;;  %v2366_v34 = vor.u32 1.1754944e-38, %v2365_v63  ;;  %vm2374_vm4 = vweird.f32 %v5963_v19 }
 0x377   :  { %v2533_v55 = vmul.f32 %v2532_v58, %v7116_v62  ;;  %v2358_v41 = vadd.f32 %v2982_v17, %v2357_v40  ;;  %v2371_v37 = vsub.f32 1.0, %v2370_v15  ;;  %vm2375_vm5 = vweird.f32 %v2984_v44 }
 0x378   :  { %vm6029_vm6 = vcmp.eq.f32.partialorder %v2378_v43, 8.507059e+37  ;;  %v1767_v3 = vsub.f32 %v1703_v5, %v5234_v39  ;;  %v6037_v60 = vmax.f32 %v1766_v12, 1e-08  ;;  %v2381_v10 = vor.u32 1.1754944e-38, %v2380_v35  ;;  %vm2376_vm8 = vmor %vm2374_vm4, %vm2375_vm5  ;;  %v1638_v43 = vpop.permute.xlu1 %1637 }
 0x379   :  { %2849 = vst [vmem:[%s6364_s2 + $0x168] sm:$0xff] %v2533_v55  ;;  %v2362_v62 = vsel %vm2361_vm3, %v2982_v17, %v2358_v41  ;;  %v2372_v22 = vmul.f32 %v2984_v44, %v2371_v37  ;;  %v2986_v46 = vpop.eup %2985  ;;  %v2663_v8 = vand.u32 2147483647, %v6001_v11  ;;  %v2665_v26 = vand.u32 2147483648, %v6001_v11 }
 0x37a   :  { %v2367_v47 = vsel %vm6017_vm2, %v2366_v34, %v2362_v62  ;;  %v2655_v1 = vmul.f32 %v2986_v46, %v6001_v11  ;;  %vm2659_vm7 = vweird.f32 %v6001_v11  ;;  %v2678_v4 = vand.u32 2147483647, %v6004_v25 }
 0x37b   :  { %v2368_v59 = vmul.f32 %v2367_v47, %v7117_v61  ;;  %v2373_v9 = vadd.f32 %v2984_v44, %v2372_v22  ;;  %v2680_v56 = vand.u32 2147483648, %v6004_v25  ;;  %v6051_v13 = vmax.f32 %v1767_v3, 1e-08 }
 0x37c   :  { %2989 = vrcp.f32 %v6037_v60  ;;  %v2988_v17 = vpop.eup %2987  ;;  %v2656_v61 = vsub.f32 1.0, %v2655_v1  ;;  %v1692_v45 = vadd.f32 %v4837_v27, %v1588_v48  ;;  %v1693_v19 = vadd.f32 %v4839_v36, %v1588_v48 }
 0x37d   :  { %v2377_v29 = vsel %vm2376_vm8, %v2984_v44, %v2373_v9  ;;  %2838 = vst [vmem:[%s6364_s2 + $0x110] sm:$0xff] %v2368_v59  ;;  %vm6061_vm9 = vcmp.eq.f32.partialorder %v2663_v8, 8.507059e+37  ;;  %v2666_v21 = vor.u32 1.1754944e-38, %v2665_v26  ;;  %v2670_v38 = vmul.f32 %v2988_v17, %v6004_v25  ;;  %v7139_v8 = vld [vmem:[#allocation84_spill] sm:$0xff] }
 0x37e   :  { %v2382_v33 = vsel %vm6029_vm6, %v2381_v10, %v2377_v29  ;;  %v2657_v63 = vmul.f32 %v2986_v46, %v2656_v61  ;;  %vm2660_vm10 = vweird.f32 %v2986_v46  ;;  %2991 = vrcp.f32 %v6051_v13  ;;  %v7144_v29 = vld [vmem:[#allocation61_spill] sm:$0xff] }
 0x37f   :  { %v2383_v23 = vmul.f32 %v2382_v33, %v7122_v50  ;;  %v2671_v5 = vsub.f32 1.0, %v2670_v38  ;;  %vm2674_vm11 = vweird.f32 %v6004_v25  ;;  %vm6069_vm12 = vcmp.eq.f32.partialorder %v2678_v4, 8.507059e+37  ;;  %v7137_v50 = vld [vmem:[#allocation58_spill] sm:$0xff]  ;;  %vm2661_vm14 = vmor %vm2659_vm7, %vm2660_vm10 }
 0x380   :  { %v2681_v14 = vor.u32 1.1754944e-38, %v2680_v56  ;;  %v2658_v31 = vadd.f32 %v2986_v46, %v2657_v63  ;;  %vm2599_vm13 = vweird.f32 %v6037_v60  ;;  %v1756_v44 = vsub.f32 %v1692_v45, %v7137_v50 }
 0x381   :  { %2839 = vst [vmem:[%s6364_s2 + $0x118] sm:$0xff] %v2383_v23  ;;  %v1757_v12 = vsub.f32 %v1693_v19, %v7138_v20  ;;  %v2672_v42 = vmul.f32 %v2988_v17, %v2671_v5  ;;  %vm2675_vm15 = vweird.f32 %v2988_v17  ;;  %v2603_v40 = vand.u32 2147483647, %v6037_v60  ;;  %v1628_v19 = vpop.permute.xlu2 %1627 }
 0x382   :  { %v2990_v52 = vpop.eup %2989  ;;  %v1712_v15 = vadd.f32 %v4837_v27, %v1638_v43  ;;  %v2662_v58 = vsel %vm2661_vm14, %v2986_v46, %v2658_v31  ;;  %v2605_v35 = vand.u32 2147483648, %v6037_v60  ;;  %v6085_v55 = vmax.f32 %v1756_v44, 1e-08  ;;  %vm2676_vm0 = vmor %vm2674_vm11, %vm2675_vm15 }
 0x383   :  { %v2595_v53 = vmul.f32 %v2990_v52, %v6037_v60  ;;  %v2667_v41 = vsel %vm6061_vm9, %v2666_v21, %v2662_v58  ;;  %v2673_v37 = vadd.f32 %v2988_v17, %v2672_v42  ;;  %v2618_v11 = vand.u32 2147483647, %v6051_v13 }
 0x384   :  { %v6090_v34 = vmax.f32 %v1757_v12, 1e-08  ;;  %v2992_v7 = vpop.eup %2991  ;;  %v2668_v62 = vmul.f32 %v2667_v41, %v7127_v0  ;;  %v2620_v3 = vand.u32 2147483648, %v6051_v13  ;;  %2993 = vrcp.f32 %v6085_v55 }
 0x385   :  { %v2596_v22 = vsub.f32 1.0, %v2595_v53  ;;  %v2677_v46 = vsel %vm2676_vm0, %v2988_v17, %v2673_v37  ;;  %v2610_v47 = vmul.f32 %v2992_v7, %v6051_v13  ;;  %v1713_v10 = vadd.f32 %v4839_v36, %v1638_v43 }
 0x386   :  { %v1776_v26 = vsub.f32 %v1712_v15, %v7139_v8  ;;  %v2682_v48 = vsel %vm6069_vm12, %v2681_v14, %v2677_v46  ;;  %2858 = vst [vmem:[%s6364_s2 + $0x1b0] sm:$0xff] %v2668_v62  ;;  %vm2600_vm1 = vweird.f32 %v2990_v52  ;;  %2995 = vrcp.f32 %v6090_v34 }
 0x387   :  { %v2597_v0 = vmul.f32 %v2990_v52, %v2596_v22  ;;  %v2683_v25 = vmul.f32 %v2682_v48, %v7128_v6  ;;  %vm6107_vm2 = vcmp.eq.f32.partialorder %v2603_v40, 8.507059e+37  ;;  %v2606_v9 = vor.u32 1.1754944e-38, %v2605_v35  ;;  %vm2601_vm5 = vmor %vm2599_vm13, %vm2600_vm1  ;;  %v1603_v35 = vpop.permute.xlu0 %1602 }
 0x388   :  { %v2611_v1 = vsub.f32 1.0, %v2610_v47  ;;  %vm2614_vm3 = vweird.f32 %v6051_v13  ;;  %vm6112_vm4 = vcmp.eq.f32.partialorder %v2618_v11, 8.507059e+37  ;;  %v2621_v17 = vor.u32 1.1754944e-38, %v2620_v3 }
 0x389   :  { %v2598_v4 = vadd.f32 %v2990_v52, %v2597_v0  ;;  %2859 = vst [vmem:[%s6364_s2 + $0x1b8] sm:$0xff] %v2683_v25  ;;  %vm2615_vm6 = vweird.f32 %v2992_v7  ;;  %v1777_v61 = vsub.f32 %v1713_v10, %v7144_v29  ;;  %v6122_v45 = vmax.f32 %v1776_v26, 1e-08 }
 0x38a   :  { %v2612_v6 = vmul.f32 %v2992_v7, %v2611_v1  ;;  %v2994_v33 = vpop.eup %2993  ;;  %vm2449_vm7 = vweird.f32 %v6085_v55  ;;  %v2453_v21 = vand.u32 2147483647, %v6085_v55  ;;  %v2455_v38 = vand.u32 2147483648, %v6085_v55  ;;  %vm2616_vm8 = vmor %vm2614_vm3, %vm2615_vm6 }
 0x38b   :  { %v2602_v28 = vsel %vm2601_vm5, %v2990_v52, %v2598_v4  ;;  %v2445_v63 = vmul.f32 %v2994_v33, %v6085_v55  ;;  %v2468_v43 = vand.u32 2147483647, %v6090_v34  ;;  %v6135_v14 = vmax.f32 %v1777_v61, 1e-08 }
 0x38c   :  { %v2607_v23 = vsel %vm6107_vm2, %v2606_v9, %v2602_v28  ;;  %v2613_v60 = vadd.f32 %v2992_v7, %v2612_v6  ;;  %v2996_v5 = vpop.eup %2995  ;;  %2997 = vrcp.f32 %v6122_v45  ;;  %v1708_v31 = vadd.f32 %v4837_v27, %v1628_v19 }
 0x38d   :  { %v2608_v54 = vmul.f32 %v2607_v23, %v5218_v18  ;;  %v2446_v12 = vsub.f32 1.0, %v2445_v63  ;;  %v2460_v52 = vmul.f32 %v2996_v5, %v6090_v34  ;;  %v1709_v42 = vadd.f32 %v4839_v36, %v1628_v19 }
 0x38e   :  { %v2617_v44 = vsel %vm2616_vm8, %v2992_v7, %v2613_v60  ;;  %vm6146_vm9 = vcmp.eq.f32.partialorder %v2453_v21, 8.507059e+37  ;;  %v2470_v13 = vand.u32 2147483648, %v6090_v34  ;;  %2999 = vrcp.f32 %v6135_v14 }
 0x38f   :  { %v2622_v40 = vsel %vm6112_vm4, %v2621_v17, %v2617_v44  ;;  %2854 = vst [vmem:[%s6364_s2 + $0x190] sm:$0xff] %v2608_v54  ;;  %v2447_v58 = vmul.f32 %v2994_v33, %v2446_v12  ;;  %vm2450_vm10 = vweird.f32 %v2994_v33  ;;  %v2461_v53 = vsub.f32 1.0, %v2460_v52 }
 0x390   :  { %v2623_v15 = vmul.f32 %v2622_v40, %v5234_v39  ;;  %v2456_v41 = vor.u32 1.1754944e-38, %v2455_v38  ;;  %vm2464_vm11 = vweird.f32 %v6090_v34  ;;  %vm2465_vm12 = vweird.f32 %v2996_v5  ;;  %vm2451_vm14 = vmor %vm2449_vm7, %vm2450_vm10 }
 0x391   :  { %vm6154_vm13 = vcmp.eq.f32.partialorder %v2468_v43, 8.507059e+37  ;;  %v2448_v11 = vadd.f32 %v2994_v33, %v2447_v58  ;;  %v2462_v7 = vmul.f32 %v2996_v5, %v2461_v53  ;;  %v1772_v39 = vsub.f32 %v1708_v31, %v5491_v32  ;;  %vm2466_vm0 = vmor %vm2464_vm11, %vm2465_vm12 }
 0x392   :  { %2855 = vst [vmem:[%s6364_s2 + $0x198] sm:$0xff] %v2623_v15  ;;  %v1773_v62 = vsub.f32 %v1709_v42, %v5507_v57  ;;  %v2998_v22 = vpop.eup %2997  ;;  %v2471_v3 = vor.u32 1.1754944e-38, %v2470_v13  ;;  %vm2749_vm15 = vweird.f32 %v6122_v45  ;;  %v2753_v46 = vand.u32 2147483647, %v6122_v45  ;;  %v1643_v42 = vpop.permute.xlu2 %1642 }
 0x393   :  { %v1698_v47 = vadd.f32 %v4837_v27, %v1603_v35  ;;  %v2452_v10 = vsel %vm2451_vm14, %v2994_v33, %v2448_v11  ;;  %v2463_v26 = vadd.f32 %v2996_v5, %v2462_v7  ;;  %v2745_v48 = vmul.f32 %v2998_v22, %v6122_v45  ;;  %v7158_v7 = vld [vmem:[#allocation40_spill] sm:$0xff] }
 0x394   :  { %v2755_v0 = vand.u32 2147483648, %v6122_v45  ;;  %v3000_v25 = vpop.eup %2999  ;;  %v2457_v59 = vsel %vm6146_vm9, %v2456_v41, %v2452_v10  ;;  %v2770_v55 = vand.u32 2147483648, %v6135_v14  ;;  %v6176_v9 = vmax.f32 %v1772_v39, 1e-08 }
 0x395   :  { %v6178_v1 = vmax.f32 %v1773_v62, 1e-08  ;;  %v2458_v4 = vmul.f32 %v2457_v59, %v7137_v50  ;;  %v2467_v56 = vsel %vm2466_vm0, %v2996_v5, %v2463_v26  ;;  %v2746_v17 = vsub.f32 1.0, %v2745_v48 }
 0x396   :  { %v2760_v6 = vmul.f32 %v3000_v25, %v6135_v14  ;;  %v2472_v61 = vsel %vm6154_vm13, %v2471_v3, %v2467_v56  ;;  %3001 = vrcp.f32 %v6176_v9  ;;  %v1699_v34 = vadd.f32 %v4839_v36, %v1603_v35 }
 0x397   :  { %v1762_v19 = vsub.f32 %v1698_v47, %v5205_v16  ;;  %v2473_v33 = vmul.f32 %v2472_v61, %v7138_v20  ;;  %2844 = vst [vmem:[%s6364_s2 + $0x140] sm:$0xff] %v2458_v4  ;;  %v2747_v50 = vmul.f32 %v2998_v22, %v2746_v17  ;;  %vm2750_vm1 = vweird.f32 %v2998_v22  ;;  %v1618_v47 = vpop.permute.xlu0 %1617 }
 0x398   :  { %v2761_v28 = vsub.f32 1.0, %v2760_v6  ;;  %vm6191_vm2 = vcmp.eq.f32.partialorder %v2753_v46, 8.507059e+37  ;;  %v2756_v38 = vor.u32 1.1754944e-38, %v2755_v0  ;;  %vm2764_vm3 = vweird.f32 %v6135_v14  ;;  %vm2751_vm5 = vmor %vm2749_vm15, %vm2750_vm1 }
 0x399   :  { %3003 = vrcp.f32 %v6178_v1  ;;  %2845 = vst [vmem:[%s6364_s2 + $0x148] sm:$0xff] %v2473_v33  ;;  %v2748_v20 = vadd.f32 %v2998_v22, %v2747_v50  ;;  %vm2765_vm4 = vweird.f32 %v3000_v25  ;;  %v2768_v60 = vand.u32 2147483647, %v6135_v14 }
 0x39a   :  { %v2762_v23 = vmul.f32 %v3000_v25, %v2761_v28  ;;  %v2771_v63 = vor.u32 1.1754944e-38, %v2770_v55  ;;  %v2693_v43 = vand.u32 2147483647, %v6176_v9  ;;  %v1763_v5 = vsub.f32 %v1699_v34, %v5211_v30  ;;  %vm2766_vm6 = vmor %vm2764_vm3, %vm2765_vm4 }
 0x39b   :  { %v6205_v54 = vmax.f32 %v1762_v19, 1e-08  ;;  %v2752_v31 = vsel %vm2751_vm5, %v2998_v22, %v2748_v20  ;;  %v2695_v12 = vand.u32 2147483648, %v6176_v9  ;;  %v2708_v52 = vand.u32 2147483647, %v6178_v1 }
 0x39c   :  { %v2763_v44 = vadd.f32 %v3000_v25, %v2762_v23  ;;  %v3002_v40 = vpop.eup %3001  ;;  %v2757_v18 = vsel %vm6191_vm2, %v2756_v38, %v2752_v31  ;;  %v2710_v45 = vand.u32 2147483648, %v6178_v1  ;;  %v6214_v13 = vmax.f32 %v1763_v5, 1e-08 }
 0x39d   :  { %3005 = vrcp.f32 %v6205_v54  ;;  %v2758_v15 = vmul.f32 %v2757_v18, %v7139_v8  ;;  %vm2769_vm7 = vcmp.eq.f32.partialorder %v2768_v60, 8.507059e+37  ;;  %v2685_v53 = vmul.f32 %v3002_v40, %v6176_v9 }
 0x39e   :  { %v2767_v58 = vsel %vm2766_vm6, %v3000_v25, %v2763_v44  ;;  %vm2689_vm8 = vweird.f32 %v6176_v9  ;;  %3007 = vrcp.f32 %v6214_v13  ;;  %v1714_v14 = vadd.f32 %v4837_v27, %v1643_v42 }
 0x39f   :  { %v3004_v35 = vpop.eup %3003  ;;  %v2772_v41 = vsel %vm2769_vm7, %v2771_v63, %v2767_v58  ;;  %2864 = vst [vmem:[%s6364_s2 + $0x1e0] sm:$0xff] %v2758_v15  ;;  %v2686_v11 = vsub.f32 1.0, %v2685_v53  ;;  %vm2704_vm9 = vweird.f32 %v6178_v1  ;;  %vm6228_vm10 = vcmp.eq.f32.partialorder %v2693_v43, 8.507059e+37  ;;  %v7157_v58 = vld [vmem:[#allocation82_spill] sm:$0xff] }
 0x3a0   :  { %v2773_v37 = vmul.f32 %v2772_v41, %v7144_v29  ;;  %v2700_v8 = vmul.f32 %v3004_v35, %v6178_v1  ;;  %v2696_v39 = vor.u32 1.1754944e-38, %v2695_v12  ;;  %vm6232_vm11 = vcmp.eq.f32.partialorder %v2708_v52, 8.507059e+37  ;;  %v7156_v52 = vld [vmem:[#allocation80_spill] sm:$0xff] }
 0x3a1   :  { %v2711_v22 = vor.u32 1.1754944e-38, %v2710_v45  ;;  %v2687_v29 = vmul.f32 %v3002_v40, %v2686_v11  ;;  %vm2690_vm12 = vweird.f32 %v3002_v40  ;;  %vm2539_vm13 = vweird.f32 %v6205_v54 }
 0x3a2   :  { %2865 = vst [vmem:[%s6364_s2 + $0x1e8] sm:$0xff] %v2773_v37  ;;  %v2701_v3 = vsub.f32 1.0, %v2700_v8  ;;  %v1715_v46 = vadd.f32 %v4839_v36, %v1643_v42  ;;  %vm2705_vm14 = vweird.f32 %v3004_v35  ;;  %v2543_v26 = vand.u32 2147483647, %v6205_v54  ;;  %vm2691_vm15 = vmor %vm2689_vm8, %vm2690_vm12 }
 0x3a3   :  { %v3006_v10 = vpop.eup %3005  ;;  %v2545_v48 = vand.u32 2147483648, %v6205_v54  ;;  %v1778_v0 = vsub.f32 %v1714_v14, %v5644_v49  ;;  %v2688_v25 = vadd.f32 %v3002_v40, %v2687_v29  ;;  %v2558_v4 = vand.u32 2147483647, %v6214_v13  ;;  %vm2706_vm0 = vmor %vm2704_vm9, %vm2705_vm14  ;;  %v1633_v14 = vpop.permute.xlu0 %1632 }
 0x3a4   :  { %v2702_v59 = vmul.f32 %v3004_v35, %v2701_v3  ;;  %v2535_v55 = vmul.f32 %v3006_v10, %v6205_v54  ;;  %v3008_v56 = vpop.eup %3007  ;;  %v1779_v17 = vsub.f32 %v1715_v46, %v5890_v24  ;;  %v1704_v61 = vadd.f32 %v4837_v27, %v1618_v47 }
 0x3a5   :  { %v6250_v6 = vmax.f32 %v1778_v0, 1e-08  ;;  %v1705_v34 = vadd.f32 %v4839_v36, %v1618_v47  ;;  %v2692_v19 = vsel %vm2691_vm15, %v3002_v40, %v2688_v25  ;;  %v2550_v28 = vmul.f32 %v3008_v56, %v6214_v13 }
 0x3a6   :  { %v2703_v33 = vadd.f32 %v3004_v35, %v2702_v59  ;;  %v2536_v50 = vsub.f32 1.0, %v2535_v55  ;;  %v2697_v21 = vsel %vm6228_vm10, %v2696_v39, %v2692_v19  ;;  %vm2540_vm1 = vweird.f32 %v3006_v10 }
 0x3a7   :  { %v6260_v9 = vmax.f32 %v1779_v17, 1e-08  ;;  %3009 = vrcp.f32 %v6250_v6  ;;  %v2698_v38 = vmul.f32 %v2697_v21, %v5491_v32  ;;  %v2551_v60 = vsub.f32 1.0, %v2550_v28  ;;  %v7155_v32 = vld [vmem:[#allocation31_spill] sm:$0xff]  ;;  %vm2541_vm3 = vmor %vm2539_vm13, %vm2540_vm1 }
 0x3a8   :  { %v2707_v20 = vsel %vm2706_vm0, %v3004_v35, %v2703_v33  ;;  %v2537_v23 = vmul.f32 %v3006_v10, %v2536_v50  ;;  %vm2555_vm2 = vweird.f32 %v3008_v56  ;;  %v2560_v43 = vand.u32 2147483648, %v6214_v13 }
 0x3a9   :  { %v2712_v63 = vsel %vm6232_vm11, %v2711_v22, %v2707_v20  ;;  %v1768_v5 = vsub.f32 %v1704_v61, %v5464_v51  ;;  %2860 = vst [vmem:[%s6364_s2 + $0x1c0] sm:$0xff] %v2698_v38  ;;  %v2552_v44 = vmul.f32 %v3008_v56, %v2551_v60  ;;  %3011 = vrcp.f32 %v6260_v9 }
 0x3aa   :  { %v2713_v1 = vmul.f32 %v2712_v63, %v5507_v57  ;;  %v2538_v31 = vadd.f32 %v3006_v10, %v2537_v23  ;;  %v595_v12 = vmax.f32 %v7155_v32, 0.0  ;;  %v1119_v42 = vmax.f32 %v7156_v52, 0.0 }
 0x3ab   :  { %vm2544_vm4 = vcmp.eq.f32.partialorder %v2543_v26, 8.507059e+37  ;;  %v2546_v40 = vor.u32 1.1754944e-38, %v2545_v48  ;;  %v2553_v18 = vadd.f32 %v3008_v56, %v2552_v44  ;;  %vm2554_vm5 = vweird.f32 %v6214_v13 }
 0x3ac   :  { %2861 = vst [vmem:[%s6364_s2 + $0x1c8] sm:$0xff] %v2713_v1  ;;  %v2542_v57 = vsel %vm2541_vm3, %v3006_v10, %v2538_v31  ;;  %v1769_v45 = vsub.f32 %v1705_v34, %v5470_v2  ;;  %v1120_v53 = vmax.f32 %v7157_v58, 0.0  ;;  %vm2556_vm6 = vmor %vm2554_vm5, %vm2555_vm2  ;;  %v2561_v54 = vor.u32 1.1754944e-38, %v2560_v43 }
 0x3ad   :  { %v3010_v15 = vpop.eup %3009  ;;  %v2547_v35 = vsel %vm2544_vm4, %v2546_v40, %v2542_v57  ;;  %v6285_v41 = vmax.f32 %v1768_v5, 1e-08  ;;  %v2557_v11 = vsel %vm2556_vm6, %v3008_v56, %v2553_v18  ;;  %vm2559_vm7 = vcmp.eq.f32.partialorder %v2558_v4, 8.507059e+37 }
 0x3ae   :  { %v2548_v37 = vmul.f32 %v2547_v35, %v5205_v16  ;;  %v2775_v8 = vmul.f32 %v3010_v15, %v6250_v6  ;;  %v596_v13 = vmax.f32 %v7158_v7, 0.0  ;;  %v2562_v39 = vsel %vm2559_vm7, %v2561_v54, %v2557_v11 }
 0x3af   :  { %v6290_v62 = vmax.f32 %v1769_v45, 1e-08  ;;  %3013 = vrcp.f32 %v6285_v41  ;;  %v3012_v22 = vpop.eup %3011  ;;  %v2563_v29 = vmul.f32 %v2562_v39, %v5211_v30  ;;  %v2783_v16 = vand.u32 2147483647, %v6250_v6 }
 0x3b0   :  { %2850 = vst [vmem:[%s6364_s2 + $0x170] sm:$0xff] %v2548_v37  ;;  %v2776_v3 = vsub.f32 1.0, %v2775_v8  ;;  %v1710_v46 = vadd.f32 %v4837_v27, %v1633_v14  ;;  %v2785_v47 = vand.u32 2147483648, %v6250_v6  ;;  %v2790_v10 = vmul.f32 %v3012_v22, %v6260_v9 }
 0x3b1   :  { %3015 = vrcp.f32 %v6290_v62  ;;  %2851 = vst [vmem:[%s6364_s2 + $0x178] sm:$0xff] %v2563_v29  ;;  %vm2780_vm8 = vweird.f32 %v3010_v15  ;;  %v6305_v26 = vmul.f32 %v1119_v42, %v595_v12  ;;  %v6307_v48 = vmul.f32 %v1120_v53, %v596_v13 }
 0x3b2   :  { %v2777_v30 = vmul.f32 %v3010_v15, %v2776_v3  ;;  %vm2779_vm9 = vweird.f32 %v6250_v6  ;;  %v2791_v0 = vsub.f32 1.0, %v2790_v10  ;;  %v2798_v27 = vand.u32 2147483647, %v6260_v9 }
 0x3b3   :  { %v1711_v25 = vadd.f32 %v4839_v36, %v1633_v14  ;;  %vm2784_vm10 = vcmp.eq.f32.partialorder %v2783_v16, 8.507059e+37  ;;  %v2800_v55 = vand.u32 2147483648, %v6260_v9  ;;  %v1774_v4 = vsub.f32 %v1710_v46, %v6305_v26  ;;  %vm2781_vm11 = vmor %vm2779_vm9, %vm2780_vm8 }
 0x3b4   :  { %v2778_v59 = vadd.f32 %v3010_v15, %v2777_v30  ;;  %v2786_v17 = vor.u32 1.1754944e-38, %v2785_v47  ;;  %v2792_v61 = vmul.f32 %v3012_v22, %v2791_v0  ;;  %vm2795_vm12 = vweird.f32 %v3012_v22 }
 0x3b5   :  { %v3014_v56 = vpop.eup %3013  ;;  %v1775_v34 = vsub.f32 %v1711_v25, %v6307_v48  ;;  %vm2794_vm13 = vweird.f32 %v6260_v9  ;;  %v6317_v33 = vmax.f32 %v1774_v4, 1e-08  ;;  %vm2799_vm14 = vcmp.eq.f32.partialorder %v2798_v27, 8.507059e+37 }
 0x3b6   :  { %v2782_v19 = vsel %vm2781_vm11, %v3010_v15, %v2778_v59  ;;  %v2625_v6 = vmul.f32 %v3014_v56, %v6285_v41  ;;  %v2793_v28 = vadd.f32 %v3012_v22, %v2792_v61  ;;  %vm2796_vm15 = vmor %vm2794_vm13, %vm2795_vm12  ;;  %v2801_v20 = vor.u32 1.1754944e-38, %v2800_v55 }
 0x3b7   :  { %v3016_v36 = vpop.eup %3015  ;;  %v2787_v50 = vsel %vm2784_vm10, %v2786_v17, %v2782_v19  ;;  %v6319_v21 = vmax.f32 %v1775_v34, 1e-08  ;;  %v2633_v9 = vand.u32 2147483647, %v6285_v41  ;;  %v2635_v43 = vand.u32 2147483648, %v6285_v41 }
 0x3b8   :  { %v2788_v38 = vmul.f32 %v2787_v50, %v5644_v49  ;;  %v2626_v23 = vsub.f32 1.0, %v2625_v6  ;;  %v2640_v60 = vmul.f32 %v3016_v36, %v6290_v62  ;;  %v2797_v63 = vsel %vm2796_vm15, %v3012_v22, %v2793_v28 }
 0x3b9   :  { %3017 = vrcp.f32 %v6317_v33  ;;  %v2802_v5 = vsel %vm2799_vm14, %v2801_v20, %v2797_v63  ;;  %vm2630_vm0 = vweird.f32 %v3014_v56  ;;  %vm2629_vm1 = vweird.f32 %v6285_v41 }
 0x3ba   :  { %2866 = vst [vmem:[%s6364_s2 + $0x1f0] sm:$0xff] %v2788_v38  ;;  %v2627_v1 = vmul.f32 %v3014_v56, %v2626_v23  ;;  %v2641_v49 = vsub.f32 1.0, %v2640_v60  ;;  %v2803_v31 = vmul.f32 %v2802_v5, %v5890_v24  ;;  %v2650_v44 = vand.u32 2147483648, %v6290_v62  ;;  %vm2631_vm3 = vmor %vm2629_vm1, %vm2630_vm0 }
 0x3bb   :  { %3019 = vrcp.f32 %v6319_v21  ;;  %vm2645_vm2 = vweird.f32 %v3016_v36  ;;  %v2648_v52 = vand.u32 2147483647, %v6290_v62  ;;  %v2636_v42 = vor.u32 1.1754944e-38, %v2635_v43 }
 0x3bc   :  { %v2628_v32 = vadd.f32 %v3014_v56, %v2627_v1  ;;  %v2642_v12 = vmul.f32 %v3016_v36, %v2641_v49  ;;  %2867 = vst [vmem:[%s6364_s2 + $0x1f8] sm:$0xff] %v2803_v31  ;;  %vm2634_vm4 = vcmp.eq.f32.partialorder %v2633_v9, 8.507059e+37  ;;  %vm2644_vm5 = vweird.f32 %v6290_v62 }
 0x3bd   :  { %vm2646_vm6 = vmor %vm2644_vm5, %vm2645_vm2  ;;  %v2651_v45 = vor.u32 1.1754944e-38, %v2650_v44  ;;  %vm2649_vm7 = vcmp.eq.f32.partialorder %v2648_v52, 8.507059e+37  ;;  %v2725_v11 = vand.u32 2147483648, %v6317_v33  ;;  %v2723_v8 = vand.u32 2147483647, %v6317_v33 }
 0x3be   :  { %v2632_v40 = vsel %vm2631_vm3, %v3014_v56, %v2628_v32  ;;  %v2643_v24 = vadd.f32 %v3016_v36, %v2642_v12  ;;  %vm2719_vm9 = vweird.f32 %v6317_v33  ;;  %v2738_v62 = vand.u32 2147483647, %v6319_v21 }
 0x3bf   :  { %v3018_v57 = vpop.eup %3017  ;;  %v2637_v18 = vsel %vm2634_vm4, %v2636_v42, %v2632_v40  ;;  %v2726_v22 = vor.u32 1.1754944e-38, %v2725_v11  ;;  %vm2724_vm12 = vcmp.eq.f32.partialorder %v2723_v8, 8.507059e+37  ;;  %vm2734_vm13 = vweird.f32 %v6319_v21 }
 0x3c0   :  { %v2638_v15 = vmul.f32 %v2637_v18, %v5464_v51  ;;  %v2647_v58 = vsel %vm2646_vm6, %v3016_v36, %v2643_v24  ;;  %v2715_v53 = vmul.f32 %v3018_v57, %v6317_v33  ;;  %vm2720_vm8 = vweird.f32 %v3018_v57 }
 0x3c1   :  { %v3020_v35 = vpop.eup %3019  ;;  %v2652_v54 = vsel %vm2649_vm7, %v2651_v45, %v2647_v58  ;;  %vm2721_vm11 = vmor %vm2719_vm9, %vm2720_vm8  ;;  %vm2739_vm15 = vcmp.eq.f32.partialorder %v2738_v62, 8.507059e+37 }
 0x3c2   :  { %v2653_v41 = vmul.f32 %v2652_v54, %v5470_v2  ;;  %2856 = vst [vmem:[%s6364_s2 + $0x1a0] sm:$0xff] %v2638_v15  ;;  %v2716_v14 = vsub.f32 1.0, %v2715_v53  ;;  %v2730_v37 = vmul.f32 %v3020_v35, %v6319_v21  ;;  %v2740_v2 = vand.u32 2147483648, %v6319_v21 }
 0x3c3   :  { %vm2735_vm10 = vweird.f32 %v3020_v35 }
 0x3c4   :  { %2857 = vst [vmem:[%s6364_s2 + $0x1a8] sm:$0xff] %v2653_v41  ;;  %v2717_v51 = vmul.f32 %v3018_v57, %v2716_v14  ;;  %v2731_v7 = vsub.f32 1.0, %v2730_v37  ;;  %vm2736_vm14 = vmor %vm2734_vm13, %vm2735_vm10  ;;  %v2741_v46 = vor.u32 1.1754944e-38, %v2740_v2 }
 0x3c6   :  { %v2718_v13 = vadd.f32 %v3018_v57, %v2717_v51  ;;  %v2732_v39 = vmul.f32 %v3020_v35, %v2731_v7 }
 0x3c8   :  { %v2722_v29 = vsel %vm2721_vm11, %v3018_v57, %v2718_v13  ;;  %v2733_v3 = vadd.f32 %v3020_v35, %v2732_v39 }
 0x3c9   :  { %v2727_v16 = vsel %vm2724_vm12, %v2726_v22, %v2722_v29 }
 0x3ca   :  { %v2728_v47 = vmul.f32 %v2727_v16, %v6305_v26  ;;  %v2737_v10 = vsel %vm2736_vm14, %v3020_v35, %v2733_v3 }
 0x3cb   :  { %v2742_v30 = vsel %vm2739_vm15, %v2741_v46, %v2737_v10 }
 0x3cc   :  { %v2743_v0 = vmul.f32 %v2742_v30, %v6307_v48  ;;  %2862 = vst [vmem:[%s6364_s2 + $0x1d0] sm:$0xff] %v2728_v47 }
 0x3ce   :  { %2863 = vst [vmem:[%s6364_s2 + $0x1d8] sm:$0xff] %v2743_v0 }

</bundles_post_ra>
